<compile_context>
chip_gen: v7x
topology: tpu7x:2x2x1
jax: 0.10.0
libtpu: 0.0.40
codegen_flags: <defaults>
</compile_context>

<pallas_src>
import functools

import numpy as np

import jax
import jax.numpy as jnp
from jax.experimental import pallas as pl
from jax.experimental.pallas import tpu as pltpu

LANES = 128        # lane-padded channel count (logical 100)
BR = 64            # lane-padded branch width  (logical 50)
C_LOGICAL = 100
BR_LOGICAL = 50

_VMEM = pl.BlockSpec(memory_space=pltpu.MemorySpace.VMEM)
_VMEM_LIMIT = 32 * 1024 * 1024


# ----------------------------------------------------------------------------
# In-kernel helpers
# ----------------------------------------------------------------------------
def _pool_3x3_s2_rows(pool_ref, rowtmp_ref, o_ref, hp, wp):
    """3x3 / stride-2 / pad-1 max pool read from a zero-bordered VMEM scratch.

    pool_ref: (h+2, w+2, C) with the activation in the interior and a zero border
    (all activations are post-ReLU, so the 0 border is equivalent to PyTorch's
    -inf padding).  Writes the pooled (hp, wp, C) result row-by-row into the
    flat output block o_ref (1, hp*wp, C).
    """
    for i in range(hp):
        # H-direction 3-tap max for output row i (rows 2i, 2i+1, 2i+2 of padded grid)
        r = jnp.maximum(jnp.maximum(pool_ref[2 * i], pool_ref[2 * i + 1]),
                        pool_ref[2 * i + 2])
        rowtmp_ref[...] = r
        # W-direction 3-tap max with stride 2 (sublane-strided reads)
        m = jnp.maximum(
            jnp.maximum(rowtmp_ref[pl.ds(0, wp, 2), :],
                        rowtmp_ref[pl.ds(1, wp, 2), :]),
            rowtmp_ref[pl.ds(2, wp, 2), :])
        o_ref[0, i * wp:(i + 1) * wp, :] = m


# ----------------------------------------------------------------------------
# Stem: first_conv (3x3 s2 p1, Cin=1) + BN + ReLU + MaxPool(3,2,1), fused
# ----------------------------------------------------------------------------
def _stem_kernel(patch_ref, w_ref, b_ref, o_ref, pool_ref, rowtmp_ref, *, ho, wo):
    hp = (ho - 1) // 2 + 1
    wp = (wo - 1) // 2 + 1
    # conv1 as (Ho*Wo, 9) x (9, 128) matmul, bias (+folded BN) and ReLU
    y = jnp.dot(patch_ref[0], w_ref[...], preferred_element_type=jnp.float32)
    y = jnp.maximum(y + b_ref[...], 0.0)                       # (ho*wo, 128)
    # scatter rows into the zero-bordered pooling scratch (halo handled in VMEM)
    pool_ref[...] = jnp.zeros_like(pool_ref)
    for r in range(ho):
        pool_ref[r + 1, 1:wo + 1, :] = y[r * wo:(r + 1) * wo, :]
    # fused stride-2 maxpool, written directly to the flat output block
    _pool_3x3_s2_rows(pool_ref, rowtmp_ref, o_ref, hp, wp)


def _stem_call(patches, w, b, ho, wo):
    n, s, _ = patches.shape
    hp = (ho - 1) // 2 + 1
    wp = (wo - 1) // 2 + 1
    kernel = functools.partial(_stem_kernel, ho=ho, wo=wo)
    return pl.pallas_call(
        kernel,
        out_shape=jax.ShapeDtypeStruct((n, hp * wp, LANES), jnp.float32),
        grid_spec=pltpu.PrefetchScalarGridSpec(
            num_scalar_prefetch=0,
            grid=(n,),
            in_specs=[
                pl.BlockSpec((1, s, 9), lambda i: (i, 0, 0)),
                pl.BlockSpec((9, LANES), lambda i: (0, 0)),
                pl.BlockSpec((1, LANES), lambda i: (0, 0)),
            ],
            out_specs=pl.BlockSpec((1, hp * wp, LANES), lambda i: (i, 0, 0)),
            scratch_shapes=[
                pltpu.VMEM((ho + 2, wo + 2, LANES), jnp.float32),   # pooling halo
                pltpu.VMEM((wo + 2, LANES), jnp.float32),           # one pooled H-row
            ],
        ),
        compiler_params=pltpu.CompilerParams(
            dimension_semantics=("parallel",),
            vmem_limit_bytes=_VMEM_LIMIT,
        ),
    )(patches, w, b)


# ----------------------------------------------------------------------------
# Fused InvertedResidual (stride=1) layer + MaxPool(3,2,1)
#   x1/x2 split and channel_shuffle(2) are folded into the (lane-padded,
#   permuted) weights; the passthrough half is selected with a keep mask.
# ----------------------------------------------------------------------------
def _layer_kernel(x_ref, w1_ref, b1_ref, wdw_ref, bdw_ref, w2_ref, b2_ref, keep_ref,
                  o_ref, dwpad_ref, poolpad_ref, rowtmp_ref, *, h, w):
    hp = (h - 1) // 2 + 1
    wp = (w - 1) // 2 + 1
    x = x_ref[0]                                                 # (h*w, 128)

    # pw1: 1x1 conv + BN + ReLU over the (shuffled) x2 half, folded into w1 rows
    t = jnp.dot(x, w1_ref[...], preferred_element_type=jnp.float32)
    t = jnp.maximum(t + b1_ref[...], 0.0)                        # (h*w, 64)

    # depthwise 3x3 + BN (no ReLU); zero halo kept in VMEM scratch
    dwpad_ref[...] = jnp.zeros_like(dwpad_ref)
    for r in range(h):
        dwpad_ref[r + 1, 1:w + 1, :] = t[r * w:(r + 1) * w, :]
    wdw = wdw_ref[...]                                           # (9, 64), loaded once
    d = jnp.zeros((h, w, BR), jnp.float32)
    for dy in range(3):
        for dx in range(3):
            d = d + dwpad_ref[dy:dy + h, dx:dx + w, :] * wdw[dy * 3 + dx]
    d = d + bdw_ref[...]                                         # BN shift, no ReLU

    # pw2: 1x1 conv + BN + ReLU; its columns already scatter the branch output to
    # its post-shuffle lane positions.  Combine with the x1 passthrough (keep mask)
    # and write into the zero-bordered pooling scratch.
    w2 = w2_ref[...]
    b2 = b2_ref[...]
    keep = keep_ref[...]
    poolpad_ref[...] = jnp.zeros_like(poolpad_ref)
    for r in range(h):
        branch = jnp.dot(d[r], w2, preferred_element_type=jnp.float32)   # (w, 128)
        row = jnp.maximum(branch + b2, 0.0) + x[r * w:(r + 1) * w, :] * keep
        poolpad_ref[r + 1, 1:w + 1, :] = row

    # fused stride-2 maxpool
    _pool_3x3_s2_rows(poolpad_ref, rowtmp_ref, o_ref, hp, wp)


def _layer_call(x, p, h, w):
    n = x.shape[0]
    hp = (h - 1) // 2 + 1
    wp = (w - 1) // 2 + 1
    kernel = functools.partial(_layer_kernel, h=h, w=w)
    return pl.pallas_call(
        kernel,
        out_shape=jax.ShapeDtypeStruct((n, hp * wp, LANES), jnp.float32),
        grid_spec=pltpu.PrefetchScalarGridSpec(
            num_scalar_prefetch=0,
            grid=(n,),
            in_specs=[
                pl.BlockSpec((1, h * w, LANES), lambda i: (i, 0, 0)),
                pl.BlockSpec((LANES, BR), lambda i: (0, 0)),
                pl.BlockSpec((1, BR), lambda i: (0, 0)),
                pl.BlockSpec((9, BR), lambda i: (0, 0)),
                pl.BlockSpec((1, BR), lambda i: (0, 0)),
                pl.BlockSpec((BR, LANES), lambda i: (0, 0)),
                pl.BlockSpec((1, LANES), lambda i: (0, 0)),
                pl.BlockSpec((1, LANES), lambda i: (0, 0)),
            ],
            out_specs=pl.BlockSpec((1, hp * wp, LANES), lambda i: (i, 0, 0)),
            scratch_shapes=[
                pltpu.VMEM((h + 2, w + 2, BR), jnp.float32),      # dwconv halo
                pltpu.VMEM((h + 2, w + 2, LANES), jnp.float32),   # pooling halo
                pltpu.VMEM((w + 2, LANES), jnp.float32),          # one pooled H-row
            ],
        ),
        compiler_params=pltpu.CompilerParams(
            dimension_semantics=("parallel",),
            vmem_limit_bytes=_VMEM_LIMIT,
        ),
    )(x, p["pw1_w"], p["pw1_b"], p["dw_w"], p["dw_b"],
      p["pw2_w"], p["pw2_b"], p["keep"])


# ----------------------------------------------------------------------------
# Head: global mean over H*W + fc_bottleneck + fc_out, fused
# ----------------------------------------------------------------------------
def _head_kernel(x_ref, w1_ref, b1_ref, w2_ref, b2_ref, feat_ref, cls_ref, *, inv_hw):
    pooled = jnp.sum(x_ref[...], axis=1) * inv_hw                # (N, 128)
    feat = jnp.dot(pooled, w1_ref[...], preferred_element_type=jnp.float32) + b1_ref[...]
    cls = jnp.dot(feat, w2_ref[...], preferred_element_type=jnp.float32) + b2_ref[...]
    feat_ref[...] = feat
    cls_ref[...] = cls


def _head_call(x, w1, b1, w2, b2, hw):
    n = x.shape[0]
    nb = w1.shape[1]
    nc = w2.shape[1]
    kernel = functools.partial(_head_kernel, inv_hw=1.0 / float(hw))
    return pl.pallas_call(
        kernel,
        out_shape=(jax.ShapeDtypeStruct((n, nb), jnp.float32),
                   jax.ShapeDtypeStruct((n, nc), jnp.float32)),
        in_specs=[_VMEM] * 5,
        out_specs=(_VMEM, _VMEM),
        compiler_params=pltpu.CompilerParams(vmem_limit_bytes=_VMEM_LIMIT),
    )(x, w1, b1, w2, b2)


# ----------------------------------------------------------------------------
# Forward pass
# ----------------------------------------------------------------------------
def feature_classifier_forward(x_nchw, params, num_layers):
    x = x_nchw[:, 0, :, :].astype(jnp.float32)                   # (N, H, W), Cin=1
    n, h, w = x.shape
    ho, wo = (h - 1) // 2 + 1, (w - 1) // 2 + 1

    # im2col for the Cin=1 first conv (k = dy*3 + dx).  Tiny JAX glue: the 9-tap
    # patch tensor of a 1-channel image is negligible vs the 128-channel activations.
    xp = jnp.pad(x, ((0, 0), (1, 1), (1, 1)))
    cols = []
    for dy in range(3):
        for dx in range(3):
            cols.append(xp[:, dy:dy + 2 * ho:2, dx:dx + 2 * wo:2])
    patches = jnp.stack(cols, axis=-1).reshape(n, ho * wo, 9)

    # stem: conv1 + BN + ReLU + maxpool (one kernel)
    y = _stem_call(patches, params["conv1_w"], params["conv1_b"], ho, wo)
    hc, wc = (ho - 1) // 2 + 1, (wo - 1) // 2 + 1

    # fused InvertedResidual + maxpool layers (one kernel each)
    for i in range(num_layers):
        y = _layer_call(y, params["layers"][i], hc, wc)
        hc, wc = (hc - 1) // 2 + 1, (wc - 1) // 2 + 1

    # fused global mean + fc_bottleneck + fc_out
    feat_vec, class_probs = _head_call(y, params["fc1_w"], params["fc1_b"],
                                       params["fc2_w"], params["fc2_b"], hc * wc)
    return feat_vec, class_probs


# ----------------------------------------------------------------------------
# Deterministic synthetic parameters: BN folded (eps=1e-5), lanes padded to
# 128/64, and the channel_shuffle(2) permutation folded into the weights.
# ----------------------------------------------------------------------------
def _bn_fold(key, c, eps=1e-5):
    k1, k2, k3, k4 = jax.random.split(key, 4)
    gamma = 1.0 + 0.1 * jax.random.normal(k1, (c,), jnp.float32)
    beta = 0.1 * jax.random.normal(k2, (c,), jnp.float32)
    mean = 0.1 * jax.random.normal(k3, (c,), jnp.float32)
    var = 1.0 + 0.1 * jax.random.uniform(k4, (c,), jnp.float32)
    scale = gamma / jnp.sqrt(var + eps)
    shift = beta - mean * scale
    return scale, shift


def init_params(key, num_layers, classes, bottleneck=20):
    c, bf = C_LOGICAL, BR_LOGICAL
    keys = jax.random.split(key, 2 + num_layers)
    params = {}

    # first conv (9 taps, Cin=1) + folded BN, zero-padded to 128 output lanes
    kw, kbn = jax.random.split(keys[0])
    w = 0.2 * jax.random.normal(kw, (9, c), jnp.float32)
    s, sh = _bn_fold(kbn, c)
    params["conv1_w"] = jnp.zeros((9, LANES), jnp.float32).at[:, :c].set(w * s[None, :])
    params["conv1_b"] = jnp.zeros((1, LANES), jnp.float32).at[0, :c].set(sh)

    # pos[l] = physical lane holding logical channel l of the inter-layer tensor.
    # Folding the shuffle: logical x2 channels feed pw1 (row permutation), branch
    # outputs are scattered back by pw2 columns, x1 stays in place (keep mask).
    pos = np.arange(c)
    params["layers"] = []
    for i in range(num_layers):
        k1, k2, k3, kb1, kb2, kb3 = jax.random.split(keys[1 + i], 6)
        pw1 = 0.2 * jax.random.normal(k1, (bf, bf), jnp.float32)       # (in=x2 ch, out=branch)
        s1, b1 = _bn_fold(kb1, bf)
        dw = 0.2 * jax.random.normal(k2, (9, bf), jnp.float32)
        s2, b2 = _bn_fold(kb2, bf)
        pw2 = 0.2 * jax.random.normal(k3, (bf, bf), jnp.float32)       # (in=branch, out)
        s3, b3 = _bn_fold(kb3, bf)

        x1_pos = pos[:bf]        # lanes holding logical channels   0..49 (passthrough)
        x2_pos = pos[bf:]        # lanes holding logical channels  50..99 (branch input)

        w1_fold = jnp.zeros((LANES, BR), jnp.float32).at[x2_pos, :bf].set(pw1 * s1[None, :])
        b1_fold = jnp.zeros((1, BR), jnp.float32).at[0, :bf].set(b1)
        dw_fold = jnp.zeros((9, BR), jnp.float32).at[:, :bf].set(dw * s2[None, :])
        b2_fold = jnp.zeros((1, BR), jnp.float32).at[0, :bf].set(b2)
        w2_fold = jnp.zeros((BR, LANES), jnp.float32).at[:bf, x2_pos].set(pw2 * s3[None, :])
        b3_fold = jnp.zeros((1, LANES), jnp.float32).at[0, x2_pos].set(b3)
        keep = jnp.zeros((1, LANES), jnp.float32).at[0, x1_pos].set(1.0)

        params["layers"].append(dict(
            pw1_w=w1_fold, pw1_b=b1_fold, dw_w=dw_fold, dw_b=b2_fold,
            pw2_w=w2_fold, pw2_b=b3_fold, keep=keep))

        # channel_shuffle(2): out[2c] = x1[c] (stays at pos[c]), out[2c+1] = branch[c]
        # (written to pos[50+c]) -> update the logical->physical map instead of moving data.
        new_pos = np.empty_like(pos)
        new_pos[0::2] = pos[:bf]
        new_pos[1::2] = pos[bf:]
        pos = new_pos

    # fc heads; fold the final logical->physical lane permutation into fc1 rows
    kf1, kf2 = jax.random.split(keys[1 + num_layers])
    fc1 = 0.2 * jax.random.normal(kf1, (c, bottleneck), jnp.float32)
    fc1b = 0.05 * jax.random.normal(jax.random.fold_in(kf1, 1), (bottleneck,), jnp.float32)
    fc2 = 0.2 * jax.random.normal(kf2, (bottleneck, classes), jnp.float32)
    fc2b = 0.05 * jax.random.normal(jax.random.fold_in(kf2, 1), (classes,), jnp.float32)
    params["fc1_w"] = jnp.zeros((LANES, bottleneck), jnp.float32).at[pos, :].set(fc1)
    params["fc1_b"] = fc1b.reshape(1, bottleneck)
    params["fc2_w"] = fc2
    params["fc2_b"] = fc2b.reshape(1, classes)
    return params


# TODO(synk): FeatureClassifier.get_cluster() calls an external kmeans library on GPU;
# it is not part of forward() and has no Pallas equivalent here.

if __name__ == "__main__":
    num_layers = 2
    classes = 10
    in_res = 32
    batch = 2
    bottleneck = 20

    key = jax.random.PRNGKey(0)
    kx, kp = jax.random.split(key)
    x = jax.random.normal(kx, (batch, 1, in_res, in_res), dtype=jnp.float32)   # NCHW
    params = init_params(kp, num_layers, classes, bottleneck)

    fwd = jax.jit(functools.partial(feature_classifier_forward, num_layers=num_layers))
    feat_vec, class_probs = fwd(x, params)
    jax.block_until_ready((feat_vec, class_probs))

    assert feat_vec.shape == (batch, bottleneck)
    assert class_probs.shape == (batch, classes)
    assert bool(jnp.all(jnp.isfinite(feat_vec))) and bool(jnp.all(jnp.isfinite(class_probs)))
    print("KERNEL_OK")
</pallas_src>

<mosaic_0001>
module attributes {stable_mosaic.version = 11 : i64} {
  func.func @_stem_kernel(%arg0: i32, %arg1: memref<1x256x9xf32, #tpu.memory_space<vmem>>, %arg2: memref<9x128xf32, #tpu.memory_space<vmem>>, %arg3: memref<1x128xf32, #tpu.memory_space<vmem>>, %arg4: memref<1x64x128xf32, #tpu.memory_space<vmem>>, %arg5: memref<18x18x128xf32, #tpu.memory_space<vmem>>, %arg6: memref<18x128xf32, #tpu.memory_space<vmem>>) attributes {dimension_semantics = [#tpu.dimension_semantics<parallel>], iteration_bounds = array<i64: 2>, scalar_prefetch = 0 : i64, scratch_operands = 2 : i64, tpu.core_type = #tpu.core_type<tc>, window_params = [{transform_indices = @transform_0, window_bounds = array<i64: 1, 256, 9>}, {pipeline_mode = #tpu.pipeline_mode<synchronous>, transform_indices = @transform_1, window_bounds = array<i64: 9, 128>}, {pipeline_mode = #tpu.pipeline_mode<synchronous>, transform_indices = @transform_2, window_bounds = array<i64: 1, 128>}, {transform_indices = @transform_3, window_bounds = array<i64: 1, 64, 128>}]} {
    %c0 = arith.constant 0 : index
    %c0_0 = arith.constant 0 : index
    %c0_1 = arith.constant 0 : index
    %0 = vector.load %arg1[%c0, %c0_0, %c0_1] : memref<1x256x9xf32, #tpu.memory_space<vmem>>, vector<1x256x9xf32>
    %1 = vector.shape_cast %0 : vector<1x256x9xf32> to vector<256x9xf32>
    %c0_2 = arith.constant 0 : index
    %c0_3 = arith.constant 0 : index
    %2 = vector.load %arg2[%c0_2, %c0_3] : memref<9x128xf32, #tpu.memory_space<vmem>>, vector<9x128xf32>
    %cst = arith.constant dense<0.000000e+00> : vector<256x128xf32>
    %3 = tpu.matmul %1, %2, %cst {dimension_numbers = #tpu.dot_dimension_numbers<[1], [0], [0], [1], [0, 0, 1, 1], [], []>} : vector<256x9xf32>, vector<9x128xf32>, vector<256x128xf32> -> vector<256x128xf32>
    %c0_4 = arith.constant 0 : index
    %c0_5 = arith.constant 0 : index
    %4 = vector.load %arg3[%c0_4, %c0_5] : memref<1x128xf32, #tpu.memory_space<vmem>>, vector<1x128xf32>
    %5 = vector.broadcast %4 : vector<1x128xf32> to vector<256x128xf32>
    %6 = arith.addf %3, %5 : vector<256x128xf32>
    %cst_6 = arith.constant 0.000000e+00 : f32
    %7 = vector.broadcast %cst_6 : f32 to vector<256x128xf32>
    %8 = arith.maximumf %6, %7 : vector<256x128xf32>
    %cst_7 = arith.constant 0.000000e+00 : f32
    %9 = vector.broadcast %cst_7 : f32 to vector<18x18x128xf32>
    %c0_8 = arith.constant 0 : index
    %c0_9 = arith.constant 0 : index
    %c0_10 = arith.constant 0 : index
    %10 = vector.load %arg5[%c0_8, %c0_9, %c0_10] : memref<18x18x128xf32, #tpu.memory_space<vmem>>, vector<18x18x128xf32>
    tpu.vector_store %arg5[%c0_8, %c0_9, %c0_10], %9 {strides = array<i32>} : memref<18x18x128xf32, #tpu.memory_space<vmem>>, vector<18x18x128xf32>,
    %11 = vector.extract_strided_slice %8 {offsets = [0, 0], sizes = [16, 128], strides = [1, 1]} : vector<256x128xf32> to vector<16x128xf32>
    %c1 = arith.constant 1 : index
    %c1_11 = arith.constant 1 : index
    %c0_12 = arith.constant 0 : index
    %12 = vector.load %arg5[%c1, %c1_11, %c0_12] : memref<18x18x128xf32, #tpu.memory_space<vmem>>, vector<1x16x128xf32>
    %13 = vector.shape_cast %12 : vector<1x16x128xf32> to vector<16x128xf32>
    %14 = vector.shape_cast %11 : vector<16x128xf32> to vector<1x16x128xf32>
    tpu.vector_store %arg5[%c1, %c1_11, %c0_12], %14 {strides = array<i32>} : memref<18x18x128xf32, #tpu.memory_space<vmem>>, vector<1x16x128xf32>,
    %15 = vector.extract_strided_slice %8 {offsets = [16, 0], sizes = [16, 128], strides = [1, 1]} : vector<256x128xf32> to vector<16x128xf32>
    %c2 = arith.constant 2 : index
    %c1_13 = arith.constant 1 : index
    %c0_14 = arith.constant 0 : index
    %16 = vector.load %arg5[%c2, %c1_13, %c0_14] : memref<18x18x128xf32, #tpu.memory_space<vmem>>, vector<1x16x128xf32>
    %17 = vector.shape_cast %16 : vector<1x16x128xf32> to vector<16x128xf32>
    %18 = vector.shape_cast %15 : vector<16x128xf32> to vector<1x16x128xf32>
    tpu.vector_store %arg5[%c2, %c1_13, %c0_14], %18 {strides = array<i32>} : memref<18x18x128xf32, #tpu.memory_space<vmem>>, vector<1x16x128xf32>,
    %19 = vector.extract_strided_slice %8 {offsets = [32, 0], sizes = [16, 128], strides = [1, 1]} : vector<256x128xf32> to vector<16x128xf32>
    %c3 = arith.constant 3 : index
    %c1_15 = arith.constant 1 : index
    %c0_16 = arith.constant 0 : index
    %20 = vector.load %arg5[%c3, %c1_15, %c0_16] : memref<18x18x128xf32, #tpu.memory_space<vmem>>, vector<1x16x128xf32>
    %21 = vector.shape_cast %20 : vector<1x16x128xf32> to vector<16x128xf32>
    %22 = vector.shape_cast %19 : vector<16x128xf32> to vector<1x16x128xf32>
    tpu.vector_store %arg5[%c3, %c1_15, %c0_16], %22 {strides = array<i32>} : memref<18x18x128xf32, #tpu.memory_space<vmem>>, vector<1x16x128xf32>,
    %23 = vector.extract_strided_slice %8 {offsets = [48, 0], sizes = [16, 128], strides = [1, 1]} : vector<256x128xf32> to vector<16x128xf32>
    %c4 = arith.constant 4 : index
    %c1_17 = arith.constant 1 : index
    %c0_18 = arith.constant 0 : index
    %24 = vector.load %arg5[%c4, %c1_17, %c0_18] : memref<18x18x128xf32, #tpu.memory_space<vmem>>, vector<1x16x128xf32>
    %25 = vector.shape_cast %24 : vector<1x16x128xf32> to vector<16x128xf32>
    %26 = vector.shape_cast %23 : vector<16x128xf32> to vector<1x16x128xf32>
    tpu.vector_store %arg5[%c4, %c1_17, %c0_18], %26 {strides = array<i32>} : memref<18x18x128xf32, #tpu.memory_space<vmem>>, vector<1x16x128xf32>,
    %27 = vector.extract_strided_slice %8 {offsets = [64, 0], sizes = [16, 128], strides = [1, 1]} : vector<256x128xf32> to vector<16x128xf32>
    %c5 = arith.constant 5 : index
    %c1_19 = arith.constant 1 : index
    %c0_20 = arith.constant 0 : index
    %28 = vector.load %arg5[%c5, %c1_19, %c0_20] : memref<18x18x128xf32, #tpu.memory_space<vmem>>, vector<1x16x128xf32>
    %29 = vector.shape_cast %28 : vector<1x16x128xf32> to vector<16x128xf32>
    %30 = vector.shape_cast %27 : vector<16x128xf32> to vector<1x16x128xf32>
    tpu.vector_store %arg5[%c5, %c1_19, %c0_20], %30 {strides = array<i32>} : memref<18x18x128xf32, #tpu.memory_space<vmem>>, vector<1x16x128xf32>,
    %31 = vector.extract_strided_slice %8 {offsets = [80, 0], sizes = [16, 128], strides = [1, 1]} : vector<256x128xf32> to vector<16x128xf32>
    %c6 = arith.constant 6 : index
    %c1_21 = arith.constant 1 : index
    %c0_22 = arith.constant 0 : index
    %32 = vector.load %arg5[%c6, %c1_21, %c0_22] : memref<18x18x128xf32, #tpu.memory_space<vmem>>, vector<1x16x128xf32>
    %33 = vector.shape_cast %32 : vector<1x16x128xf32> to vector<16x128xf32>
    %34 = vector.shape_cast %31 : vector<16x128xf32> to vector<1x16x128xf32>
    tpu.vector_store %arg5[%c6, %c1_21, %c0_22], %34 {strides = array<i32>} : memref<18x18x128xf32, #tpu.memory_space<vmem>>, vector<1x16x128xf32>,
    %35 = vector.extract_strided_slice %8 {offsets = [96, 0], sizes = [16, 128], strides = [1, 1]} : vector<256x128xf32> to vector<16x128xf32>
    %c7 = arith.constant 7 : index
    %c1_23 = arith.constant 1 : index
    %c0_24 = arith.constant 0 : index
    %36 = vector.load %arg5[%c7, %c1_23, %c0_24] : memref<18x18x128xf32, #tpu.memory_space<vmem>>, vector<1x16x128xf32>
    %37 = vector.shape_cast %36 : vector<1x16x128xf32> to vector<16x128xf32>
    %38 = vector.shape_cast %35 : vector<16x128xf32> to vector<1x16x128xf32>
    tpu.vector_store %arg5[%c7, %c1_23, %c0_24], %38 {strides = array<i32>} : memref<18x18x128xf32, #tpu.memory_space<vmem>>, vector<1x16x128xf32>,
    %39 = vector.extract_strided_slice %8 {offsets = [112, 0], sizes = [16, 128], strides = [1, 1]} : vector<256x128xf32> to vector<16x128xf32>
    %c8 = arith.constant 8 : index
    %c1_25 = arith.constant 1 : index
    %c0_26 = arith.constant 0 : index
    %40 = vector.load %arg5[%c8, %c1_25, %c0_26] : memref<18x18x128xf32, #tpu.memory_space<vmem>>, vector<1x16x128xf32>
    %41 = vector.shape_cast %40 : vector<1x16x128xf32> to vector<16x128xf32>
    %42 = vector.shape_cast %39 : vector<16x128xf32> to vector<1x16x128xf32>
    tpu.vector_store %arg5[%c8, %c1_25, %c0_26], %42 {strides = array<i32>} : memref<18x18x128xf32, #tpu.memory_space<vmem>>, vector<1x16x128xf32>,
    %43 = vector.extract_strided_slice %8 {offsets = [128, 0], sizes = [16, 128], strides = [1, 1]} : vector<256x128xf32> to vector<16x128xf32>
    %c9 = arith.constant 9 : index
    %c1_27 = arith.constant 1 : index
    %c0_28 = arith.constant 0 : index
    %44 = vector.load %arg5[%c9, %c1_27, %c0_28] : memref<18x18x128xf32, #tpu.memory_space<vmem>>, vector<1x16x128xf32>
    %45 = vector.shape_cast %44 : vector<1x16x128xf32> to vector<16x128xf32>
    %46 = vector.shape_cast %43 : vector<16x128xf32> to vector<1x16x128xf32>
    tpu.vector_store %arg5[%c9, %c1_27, %c0_28], %46 {strides = array<i32>} : memref<18x18x128xf32, #tpu.memory_space<vmem>>, vector<1x16x128xf32>,
    %47 = vector.extract_strided_slice %8 {offsets = [144, 0], sizes = [16, 128], strides = [1, 1]} : vector<256x128xf32> to vector<16x128xf32>
    %c10 = arith.constant 10 : index
    %c1_29 = arith.constant 1 : index
    %c0_30 = arith.constant 0 : index
    %48 = vector.load %arg5[%c10, %c1_29, %c0_30] : memref<18x18x128xf32, #tpu.memory_space<vmem>>, vector<1x16x128xf32>
    %49 = vector.shape_cast %48 : vector<1x16x128xf32> to vector<16x128xf32>
    %50 = vector.shape_cast %47 : vector<16x128xf32> to vector<1x16x128xf32>
    tpu.vector_store %arg5[%c10, %c1_29, %c0_30], %50 {strides = array<i32>} : memref<18x18x128xf32, #tpu.memory_space<vmem>>, vector<1x16x128xf32>,
    %51 = vector.extract_strided_slice %8 {offsets = [160, 0], sizes = [16, 128], strides = [1, 1]} : vector<256x128xf32> to vector<16x128xf32>
    %c11 = arith.constant 11 : index
    %c1_31 = arith.constant 1 : index
    %c0_32 = arith.constant 0 : index
    %52 = vector.load %arg5[%c11, %c1_31, %c0_32] : memref<18x18x128xf32, #tpu.memory_space<vmem>>, vector<1x16x128xf32>
    %53 = vector.shape_cast %52 : vector<1x16x128xf32> to vector<16x128xf32>
    %54 = vector.shape_cast %51 : vector<16x128xf32> to vector<1x16x128xf32>
    tpu.vector_store %arg5[%c11, %c1_31, %c0_32], %54 {strides = array<i32>} : memref<18x18x128xf32, #tpu.memory_space<vmem>>, vector<1x16x128xf32>,
    %55 = vector.extract_strided_slice %8 {offsets = [176, 0], sizes = [16, 128], strides = [1, 1]} : vector<256x128xf32> to vector<16x128xf32>
    %c12 = arith.constant 12 : index
    %c1_33 = arith.constant 1 : index
    %c0_34 = arith.constant 0 : index
    %56 = vector.load %arg5[%c12, %c1_33, %c0_34] : memref<18x18x128xf32, #tpu.memory_space<vmem>>, vector<1x16x128xf32>
    %57 = vector.shape_cast %56 : vector<1x16x128xf32> to vector<16x128xf32>
    %58 = vector.shape_cast %55 : vector<16x128xf32> to vector<1x16x128xf32>
    tpu.vector_store %arg5[%c12, %c1_33, %c0_34], %58 {strides = array<i32>} : memref<18x18x128xf32, #tpu.memory_space<vmem>>, vector<1x16x128xf32>,
    %59 = vector.extract_strided_slice %8 {offsets = [192, 0], sizes = [16, 128], strides = [1, 1]} : vector<256x128xf32> to vector<16x128xf32>
    %c13 = arith.constant 13 : index
    %c1_35 = arith.constant 1 : index
    %c0_36 = arith.constant 0 : index
    %60 = vector.load %arg5[%c13, %c1_35, %c0_36] : memref<18x18x128xf32, #tpu.memory_space<vmem>>, vector<1x16x128xf32>
    %61 = vector.shape_cast %60 : vector<1x16x128xf32> to vector<16x128xf32>
    %62 = vector.shape_cast %59 : vector<16x128xf32> to vector<1x16x128xf32>
    tpu.vector_store %arg5[%c13, %c1_35, %c0_36], %62 {strides = array<i32>} : memref<18x18x128xf32, #tpu.memory_space<vmem>>, vector<1x16x128xf32>,
    %63 = vector.extract_strided_slice %8 {offsets = [208, 0], sizes = [16, 128], strides = [1, 1]} : vector<256x128xf32> to vector<16x128xf32>
    %c14 = arith.constant 14 : index
    %c1_37 = arith.constant 1 : index
    %c0_38 = arith.constant 0 : index
    %64 = vector.load %arg5[%c14, %c1_37, %c0_38] : memref<18x18x128xf32, #tpu.memory_space<vmem>>, vector<1x16x128xf32>
    %65 = vector.shape_cast %64 : vector<1x16x128xf32> to vector<16x128xf32>
    %66 = vector.shape_cast %63 : vector<16x128xf32> to vector<1x16x128xf32>
    tpu.vector_store %arg5[%c14, %c1_37, %c0_38], %66 {strides = array<i32>} : memref<18x18x128xf32, #tpu.memory_space<vmem>>, vector<1x16x128xf32>,
    %67 = vector.extract_strided_slice %8 {offsets = [224, 0], sizes = [16, 128], strides = [1, 1]} : vector<256x128xf32> to vector<16x128xf32>
    %c15 = arith.constant 15 : index
    %c1_39 = arith.constant 1 : index
    %c0_40 = arith.constant 0 : index
    %68 = vector.load %arg5[%c15, %c1_39, %c0_40] : memref<18x18x128xf32, #tpu.memory_space<vmem>>, vector<1x16x128xf32>
    %69 = vector.shape_cast %68 : vector<1x16x128xf32> to vector<16x128xf32>
    %70 = vector.shape_cast %67 : vector<16x128xf32> to vector<1x16x128xf32>
    tpu.vector_store %arg5[%c15, %c1_39, %c0_40], %70 {strides = array<i32>} : memref<18x18x128xf32, #tpu.memory_space<vmem>>, vector<1x16x128xf32>,
    %71 = vector.extract_strided_slice %8 {offsets = [240, 0], sizes = [16, 128], strides = [1, 1]} : vector<256x128xf32> to vector<16x128xf32>
    %c16 = arith.constant 16 : index
    %c1_41 = arith.constant 1 : index
    %c0_42 = arith.constant 0 : index
    %72 = vector.load %arg5[%c16, %c1_41, %c0_42] : memref<18x18x128xf32, #tpu.memory_space<vmem>>, vector<1x16x128xf32>
    %73 = vector.shape_cast %72 : vector<1x16x128xf32> to vector<16x128xf32>
    %74 = vector.shape_cast %71 : vector<16x128xf32> to vector<1x16x128xf32>
    tpu.vector_store %arg5[%c16, %c1_41, %c0_42], %74 {strides = array<i32>} : memref<18x18x128xf32, #tpu.memory_space<vmem>>, vector<1x16x128xf32>,
    %c0_43 = arith.constant 0 : index
    %c0_44 = arith.constant 0 : index
    %c0_45 = arith.constant 0 : index
    %75 = vector.load %arg5[%c0_43, %c0_44, %c0_45] : memref<18x18x128xf32, #tpu.memory_space<vmem>>, vector<1x18x128xf32>
    %76 = vector.shape_cast %75 : vector<1x18x128xf32> to vector<18x128xf32>
    %c1_46 = arith.constant 1 : index
    %c0_47 = arith.constant 0 : index
    %c0_48 = arith.constant 0 : index
    %77 = vector.load %arg5[%c1_46, %c0_47, %c0_48] : memref<18x18x128xf32, #tpu.memory_space<vmem>>, vector<1x18x128xf32>
    %78 = vector.shape_cast %77 : vector<1x18x128xf32> to vector<18x128xf32>
    %79 = arith.maximumf %76, %78 : vector<18x128xf32>
    %c2_49 = arith.constant 2 : index
    %c0_50 = arith.constant 0 : index
    %c0_51 = arith.constant 0 : index
    %80 = vector.load %arg5[%c2_49, %c0_50, %c0_51] : memref<18x18x128xf32, #tpu.memory_space<vmem>>, vector<1x18x128xf32>
    %81 = vector.shape_cast %80 : vector<1x18x128xf32> to vector<18x128xf32>
    %82 = arith.maximumf %79, %81 : vector<18x128xf32>
    %c0_52 = arith.constant 0 : index
    %c0_53 = arith.constant 0 : index
    %83 = vector.load %arg6[%c0_52, %c0_53] : memref<18x128xf32, #tpu.memory_space<vmem>>, vector<18x128xf32>
    tpu.vector_store %arg6[%c0_52, %c0_53], %82 {strides = array<i32>} : memref<18x128xf32, #tpu.memory_space<vmem>>, vector<18x128xf32>,
    %c0_54 = arith.constant 0 : index
    %c0_55 = arith.constant 0 : index
    %84 = tpu.strided_load %arg6[%c0_54, %c0_55] {strides = array<i32: 2, 1>} : memref<18x128xf32, #tpu.memory_space<vmem>>, vector<8x128xf32>
    %c1_56 = arith.constant 1 : index
    %c0_57 = arith.constant 0 : index
    %85 = tpu.strided_load %arg6[%c1_56, %c0_57] {strides = array<i32: 2, 1>} : memref<18x128xf32, #tpu.memory_space<vmem>>, vector<8x128xf32>
    %86 = arith.maximumf %84, %85 : vector<8x128xf32>
    %c2_58 = arith.constant 2 : index
    %c0_59 = arith.constant 0 : index
    %87 = tpu.strided_load %arg6[%c2_58, %c0_59] {strides = array<i32: 2, 1>} : memref<18x128xf32, #tpu.memory_space<vmem>>, vector<8x128xf32>
    %88 = arith.maximumf %86, %87 : vector<8x128xf32>
    %c0_60 = arith.constant 0 : index
    %c0_61 = arith.constant 0 : index
    %c0_62 = arith.constant 0 : index
    %89 = vector.load %arg4[%c0_60, %c0_61, %c0_62] : memref<1x64x128xf32, #tpu.memory_space<vmem>>, vector<1x8x128xf32>
    %90 = vector.shape_cast %89 : vector<1x8x128xf32> to vector<8x128xf32>
    %91 = vector.shape_cast %88 : vector<8x128xf32> to vector<1x8x128xf32>
    tpu.vector_store %arg4[%c0_60, %c0_61, %c0_62], %91 {strides = array<i32>} : memref<1x64x128xf32, #tpu.memory_space<vmem>>, vector<1x8x128xf32>,
    %c2_63 = arith.constant 2 : index
    %c0_64 = arith.constant 0 : index
    %c0_65 = arith.constant 0 : index
    %92 = vector.load %arg5[%c2_63, %c0_64, %c0_65] : memref<18x18x128xf32, #tpu.memory_space<vmem>>, vector<1x18x128xf32>
    %93 = vector.shape_cast %92 : vector<1x18x128xf32> to vector<18x128xf32>
    %c3_66 = arith.constant 3 : index
    %c0_67 = arith.constant 0 : index
    %c0_68 = arith.constant 0 : index
    %94 = vector.load %arg5[%c3_66, %c0_67, %c0_68] : memref<18x18x128xf32, #tpu.memory_space<vmem>>, vector<1x18x128xf32>
    %95 = vector.shape_cast %94 : vector<1x18x128xf32> to vector<18x128xf32>
    %96 = arith.maximumf %93, %95 : vector<18x128xf32>
    %c4_69 = arith.constant 4 : index
    %c0_70 = arith.constant 0 : index
    %c0_71 = arith.constant 0 : index
    %97 = vector.load %arg5[%c4_69, %c0_70, %c0_71] : memref<18x18x128xf32, #tpu.memory_space<vmem>>, vector<1x18x128xf32>
    %98 = vector.shape_cast %97 : vector<1x18x128xf32> to vector<18x128xf32>
    %99 = arith.maximumf %96, %98 : vector<18x128xf32>
    %c0_72 = arith.constant 0 : index
    %c0_73 = arith.constant 0 : index
    %100 = vector.load %arg6[%c0_72, %c0_73] : memref<18x128xf32, #tpu.memory_space<vmem>>, vector<18x128xf32>
    tpu.vector_store %arg6[%c0_72, %c0_73], %99 {strides = array<i32>} : memref<18x128xf32, #tpu.memory_space<vmem>>, vector<18x128xf32>,
    %c0_74 = arith.constant 0 : index
    %c0_75 = arith.constant 0 : index
    %101 = tpu.strided_load %arg6[%c0_74, %c0_75] {strides = array<i32: 2, 1>} : memref<18x128xf32, #tpu.memory_space<vmem>>, vector<8x128xf32>
    %c1_76 = arith.constant 1 : index
    %c0_77 = arith.constant 0 : index
    %102 = tpu.strided_load %arg6[%c1_76, %c0_77] {strides = array<i32: 2, 1>} : memref<18x128xf32, #tpu.memory_space<vmem>>, vector<8x128xf32>
    %103 = arith.maximumf %101, %102 : vector<8x128xf32>
    %c2_78 = arith.constant 2 : index
    %c0_79 = arith.constant 0 : index
    %104 = tpu.strided_load %arg6[%c2_78, %c0_79] {strides = array<i32: 2, 1>} : memref<18x128xf32, #tpu.memory_space<vmem>>, vector<8x128xf32>
    %105 = arith.maximumf %103, %104 : vector<8x128xf32>
    %c0_80 = arith.constant 0 : index
    %c8_81 = arith.constant 8 : index
    %c0_82 = arith.constant 0 : index
    %106 = vector.load %arg4[%c0_80, %c8_81, %c0_82] : memref<1x64x128xf32, #tpu.memory_space<vmem>>, vector<1x8x128xf32>
    %107 = vector.shape_cast %106 : vector<1x8x128xf32> to vector<8x128xf32>
    %108 = vector.shape_cast %105 : vector<8x128xf32> to vector<1x8x128xf32>
    tpu.vector_store %arg4[%c0_80, %c8_81, %c0_82], %108 {strides = array<i32>} : memref<1x64x128xf32, #tpu.memory_space<vmem>>, vector<1x8x128xf32>,
    %c4_83 = arith.constant 4 : index
    %c0_84 = arith.constant 0 : index
    %c0_85 = arith.constant 0 : index
    %109 = vector.load %arg5[%c4_83, %c0_84, %c0_85] : memref<18x18x128xf32, #tpu.memory_space<vmem>>, vector<1x18x128xf32>
    %110 = vector.shape_cast %109 : vector<1x18x128xf32> to vector<18x128xf32>
    %c5_86 = arith.constant 5 : index
    %c0_87 = arith.constant 0 : index
    %c0_88 = arith.constant 0 : index
    %111 = vector.load %arg5[%c5_86, %c0_87, %c0_88] : memref<18x18x128xf32, #tpu.memory_space<vmem>>, vector<1x18x128xf32>
    %112 = vector.shape_cast %111 : vector<1x18x128xf32> to vector<18x128xf32>
    %113 = arith.maximumf %110, %112 : vector<18x128xf32>
    %c6_89 = arith.constant 6 : index
    %c0_90 = arith.constant 0 : index
    %c0_91 = arith.constant 0 : index
    %114 = vector.load %arg5[%c6_89, %c0_90, %c0_91] : memref<18x18x128xf32, #tpu.memory_space<vmem>>, vector<1x18x128xf32>
    %115 = vector.shape_cast %114 : vector<1x18x128xf32> to vector<18x128xf32>
    %116 = arith.maximumf %113, %115 : vector<18x128xf32>
    %c0_92 = arith.constant 0 : index
    %c0_93 = arith.constant 0 : index
    %117 = vector.load %arg6[%c0_92, %c0_93] : memref<18x128xf32, #tpu.memory_space<vmem>>, vector<18x128xf32>
    tpu.vector_store %arg6[%c0_92, %c0_93], %116 {strides = array<i32>} : memref<18x128xf32, #tpu.memory_space<vmem>>, vector<18x128xf32>,
    %c0_94 = arith.constant 0 : index
    %c0_95 = arith.constant 0 : index
    %118 = tpu.strided_load %arg6[%c0_94, %c0_95] {strides = array<i32: 2, 1>} : memref<18x128xf32, #tpu.memory_space<vmem>>, vector<8x128xf32>
    %c1_96 = arith.constant 1 : index
    %c0_97 = arith.constant 0 : index
    %119 = tpu.strided_load %arg6[%c1_96, %c0_97] {strides = array<i32: 2, 1>} : memref<18x128xf32, #tpu.memory_space<vmem>>, vector<8x128xf32>
    %120 = arith.maximumf %118, %119 : vector<8x128xf32>
    %c2_98 = arith.constant 2 : index
    %c0_99 = arith.constant 0 : index
    %121 = tpu.strided_load %arg6[%c2_98, %c0_99] {strides = array<i32: 2, 1>} : memref<18x128xf32, #tpu.memory_space<vmem>>, vector<8x128xf32>
    %122 = arith.maximumf %120, %121 : vector<8x128xf32>
    %c0_100 = arith.constant 0 : index
    %c16_101 = arith.constant 16 : index
    %c0_102 = arith.constant 0 : index
    %123 = vector.load %arg4[%c0_100, %c16_101, %c0_102] : memref<1x64x128xf32, #tpu.memory_space<vmem>>, vector<1x8x128xf32>
    %124 = vector.shape_cast %123 : vector<1x8x128xf32> to vector<8x128xf32>
    %125 = vector.shape_cast %122 : vector<8x128xf32> to vector<1x8x128xf32>
    tpu.vector_store %arg4[%c0_100, %c16_101, %c0_102], %125 {strides = array<i32>} : memref<1x64x128xf32, #tpu.memory_space<vmem>>, vector<1x8x128xf32>,
    %c6_103 = arith.constant 6 : index
    %c0_104 = arith.constant 0 : index
    %c0_105 = arith.constant 0 : index
    %126 = vector.load %arg5[%c6_103, %c0_104, %c0_105] : memref<18x18x128xf32, #tpu.memory_space<vmem>>, vector<1x18x128xf32>
    %127 = vector.shape_cast %126 : vector<1x18x128xf32> to vector<18x128xf32>
    %c7_106 = arith.constant 7 : index
    %c0_107 = arith.constant 0 : index
    %c0_108 = arith.constant 0 : index
    %128 = vector.load %arg5[%c7_106, %c0_107, %c0_108] : memref<18x18x128xf32, #tpu.memory_space<vmem>>, vector<1x18x128xf32>
    %129 = vector.shape_cast %128 : vector<1x18x128xf32> to vector<18x128xf32>
    %130 = arith.maximumf %127, %129 : vector<18x128xf32>
    %c8_109 = arith.constant 8 : index
    %c0_110 = arith.constant 0 : index
    %c0_111 = arith.constant 0 : index
    %131 = vector.load %arg5[%c8_109, %c0_110, %c0_111] : memref<18x18x128xf32, #tpu.memory_space<vmem>>, vector<1x18x128xf32>
    %132 = vector.shape_cast %131 : vector<1x18x128xf32> to vector<18x128xf32>
    %133 = arith.maximumf %130, %132 : vector<18x128xf32>
    %c0_112 = arith.constant 0 : index
    %c0_113 = arith.constant 0 : index
    %134 = vector.load %arg6[%c0_112, %c0_113] : memref<18x128xf32, #tpu.memory_space<vmem>>, vector<18x128xf32>
    tpu.vector_store %arg6[%c0_112, %c0_113], %133 {strides = array<i32>} : memref<18x128xf32, #tpu.memory_space<vmem>>, vector<18x128xf32>,
    %c0_114 = arith.constant 0 : index
    %c0_115 = arith.constant 0 : index
    %135 = tpu.strided_load %arg6[%c0_114, %c0_115] {strides = array<i32: 2, 1>} : memref<18x128xf32, #tpu.memory_space<vmem>>, vector<8x128xf32>
    %c1_116 = arith.constant 1 : index
    %c0_117 = arith.constant 0 : index
    %136 = tpu.strided_load %arg6[%c1_116, %c0_117] {strides = array<i32: 2, 1>} : memref<18x128xf32, #tpu.memory_space<vmem>>, vector<8x128xf32>
    %137 = arith.maximumf %135, %136 : vector<8x128xf32>
    %c2_118 = arith.constant 2 : index
    %c0_119 = arith.constant 0 : index
    %138 = tpu.strided_load %arg6[%c2_118, %c0_119] {strides = array<i32: 2, 1>} : memref<18x128xf32, #tpu.memory_space<vmem>>, vector<8x128xf32>
    %139 = arith.maximumf %137, %138 : vector<8x128xf32>
    %c0_120 = arith.constant 0 : index
    %c24 = arith.constant 24 : index
    %c0_121 = arith.constant 0 : index
    %140 = vector.load %arg4[%c0_120, %c24, %c0_121] : memref<1x64x128xf32, #tpu.memory_space<vmem>>, vector<1x8x128xf32>
    %141 = vector.shape_cast %140 : vector<1x8x128xf32> to vector<8x128xf32>
    %142 = vector.shape_cast %139 : vector<8x128xf32> to vector<1x8x128xf32>
    tpu.vector_store %arg4[%c0_120, %c24, %c0_121], %142 {strides = array<i32>} : memref<1x64x128xf32, #tpu.memory_space<vmem>>, vector<1x8x128xf32>,
    %c8_122 = arith.constant 8 : index
    %c0_123 = arith.constant 0 : index
    %c0_124 = arith.constant 0 : index
    %143 = vector.load %arg5[%c8_122, %c0_123, %c0_124] : memref<18x18x128xf32, #tpu.memory_space<vmem>>, vector<1x18x128xf32>
    %144 = vector.shape_cast %143 : vector<1x18x128xf32> to vector<18x128xf32>
    %c9_125 = arith.constant 9 : index
    %c0_126 = arith.constant 0 : index
    %c0_127 = arith.constant 0 : index
    %145 = vector.load %arg5[%c9_125, %c0_126, %c0_127] : memref<18x18x128xf32, #tpu.memory_space<vmem>>, vector<1x18x128xf32>
    %146 = vector.shape_cast %145 : vector<1x18x128xf32> to vector<18x128xf32>
    %147 = arith.maximumf %144, %146 : vector<18x128xf32>
    %c10_128 = arith.constant 10 : index
    %c0_129 = arith.constant 0 : index
    %c0_130 = arith.constant 0 : index
    %148 = vector.load %arg5[%c10_128, %c0_129, %c0_130] : memref<18x18x128xf32, #tpu.memory_space<vmem>>, vector<1x18x128xf32>
    %149 = vector.shape_cast %148 : vector<1x18x128xf32> to vector<18x128xf32>
    %150 = arith.maximumf %147, %149 : vector<18x128xf32>
    %c0_131 = arith.constant 0 : index
    %c0_132 = arith.constant 0 : index
    %151 = vector.load %arg6[%c0_131, %c0_132] : memref<18x128xf32, #tpu.memory_space<vmem>>, vector<18x128xf32>
    tpu.vector_store %arg6[%c0_131, %c0_132], %150 {strides = array<i32>} : memref<18x128xf32, #tpu.memory_space<vmem>>, vector<18x128xf32>,
    %c0_133 = arith.constant 0 : index
    %c0_134 = arith.constant 0 : index
    %152 = tpu.strided_load %arg6[%c0_133, %c0_134] {strides = array<i32: 2, 1>} : memref<18x128xf32, #tpu.memory_space<vmem>>, vector<8x128xf32>
    %c1_135 = arith.constant 1 : index
    %c0_136 = arith.constant 0 : index
    %153 = tpu.strided_load %arg6[%c1_135, %c0_136] {strides = array<i32: 2, 1>} : memref<18x128xf32, #tpu.memory_space<vmem>>, vector<8x128xf32>
    %154 = arith.maximumf %152, %153 : vector<8x128xf32>
    %c2_137 = arith.constant 2 : index
    %c0_138 = arith.constant 0 : index
    %155 = tpu.strided_load %arg6[%c2_137, %c0_138] {strides = array<i32: 2, 1>} : memref<18x128xf32, #tpu.memory_space<vmem>>, vector<8x128xf32>
    %156 = arith.maximumf %154, %155 : vector<8x128xf32>
    %c0_139 = arith.constant 0 : index
    %c32 = arith.constant 32 : index
    %c0_140 = arith.constant 0 : index
    %157 = vector.load %arg4[%c0_139, %c32, %c0_140] : memref<1x64x128xf32, #tpu.memory_space<vmem>>, vector<1x8x128xf32>
    %158 = vector.shape_cast %157 : vector<1x8x128xf32> to vector<8x128xf32>
    %159 = vector.shape_cast %156 : vector<8x128xf32> to vector<1x8x128xf32>
    tpu.vector_store %arg4[%c0_139, %c32, %c0_140], %159 {strides = array<i32>} : memref<1x64x128xf32, #tpu.memory_space<vmem>>, vector<1x8x128xf32>,
    %c10_141 = arith.constant 10 : index
    %c0_142 = arith.constant 0 : index
    %c0_143 = arith.constant 0 : index
    %160 = vector.load %arg5[%c10_141, %c0_142, %c0_143] : memref<18x18x128xf32, #tpu.memory_space<vmem>>, vector<1x18x128xf32>
    %161 = vector.shape_cast %160 : vector<1x18x128xf32> to vector<18x128xf32>
    %c11_144 = arith.constant 11 : index
    %c0_145 = arith.constant 0 : index
    %c0_146 = arith.constant 0 : index
    %162 = vector.load %arg5[%c11_144, %c0_145, %c0_146] : memref<18x18x128xf32, #tpu.memory_space<vmem>>, vector<1x18x128xf32>
    %163 = vector.shape_cast %162 : vector<1x18x128xf32> to vector<18x128xf32>
    %164 = arith.maximumf %161, %163 : vector<18x128xf32>
    %c12_147 = arith.constant 12 : index
    %c0_148 = arith.constant 0 : index
    %c0_149 = arith.constant 0 : index
    %165 = vector.load %arg5[%c12_147, %c0_148, %c0_149] : memref<18x18x128xf32, #tpu.memory_space<vmem>>, vector<1x18x128xf32>
    %166 = vector.shape_cast %165 : vector<1x18x128xf32> to vector<18x128xf32>
    %167 = arith.maximumf %164, %166 : vector<18x128xf32>
    %c0_150 = arith.constant 0 : index
    %c0_151 = arith.constant 0 : index
    %168 = vector.load %arg6[%c0_150, %c0_151] : memref<18x128xf32, #tpu.memory_space<vmem>>, vector<18x128xf32>
    tpu.vector_store %arg6[%c0_150, %c0_151], %167 {strides = array<i32>} : memref<18x128xf32, #tpu.memory_space<vmem>>, vector<18x128xf32>,
    %c0_152 = arith.constant 0 : index
    %c0_153 = arith.constant 0 : index
    %169 = tpu.strided_load %arg6[%c0_152, %c0_153] {strides = array<i32: 2, 1>} : memref<18x128xf32, #tpu.memory_space<vmem>>, vector<8x128xf32>
    %c1_154 = arith.constant 1 : index
    %c0_155 = arith.constant 0 : index
    %170 = tpu.strided_load %arg6[%c1_154, %c0_155] {strides = array<i32: 2, 1>} : memref<18x128xf32, #tpu.memory_space<vmem>>, vector<8x128xf32>
    %171 = arith.maximumf %169, %170 : vector<8x128xf32>
    %c2_156 = arith.constant 2 : index
    %c0_157 = arith.constant 0 : index
    %172 = tpu.strided_load %arg6[%c2_156, %c0_157] {strides = array<i32: 2, 1>} : memref<18x128xf32, #tpu.memory_space<vmem>>, vector<8x128xf32>
    %173 = arith.maximumf %171, %172 : vector<8x128xf32>
    %c0_158 = arith.constant 0 : index
    %c40 = arith.constant 40 : index
    %c0_159 = arith.constant 0 : index
    %174 = vector.load %arg4[%c0_158, %c40, %c0_159] : memref<1x64x128xf32, #tpu.memory_space<vmem>>, vector<1x8x128xf32>
    %175 = vector.shape_cast %174 : vector<1x8x128xf32> to vector<8x128xf32>
    %176 = vector.shape_cast %173 : vector<8x128xf32> to vector<1x8x128xf32>
    tpu.vector_store %arg4[%c0_158, %c40, %c0_159], %176 {strides = array<i32>} : memref<1x64x128xf32, #tpu.memory_space<vmem>>, vector<1x8x128xf32>,
    %c12_160 = arith.constant 12 : index
    %c0_161 = arith.constant 0 : index
    %c0_162 = arith.constant 0 : index
    %177 = vector.load %arg5[%c12_160, %c0_161, %c0_162] : memref<18x18x128xf32, #tpu.memory_space<vmem>>, vector<1x18x128xf32>
    %178 = vector.shape_cast %177 : vector<1x18x128xf32> to vector<18x128xf32>
    %c13_163 = arith.constant 13 : index
    %c0_164 = arith.constant 0 : index
    %c0_165 = arith.constant 0 : index
    %179 = vector.load %arg5[%c13_163, %c0_164, %c0_165] : memref<18x18x128xf32, #tpu.memory_space<vmem>>, vector<1x18x128xf32>
    %180 = vector.shape_cast %179 : vector<1x18x128xf32> to vector<18x128xf32>
    %181 = arith.maximumf %178, %180 : vector<18x128xf32>
    %c14_166 = arith.constant 14 : index
    %c0_167 = arith.constant 0 : index
    %c0_168 = arith.constant 0 : index
    %182 = vector.load %arg5[%c14_166, %c0_167, %c0_168] : memref<18x18x128xf32, #tpu.memory_space<vmem>>, vector<1x18x128xf32>
    %183 = vector.shape_cast %182 : vector<1x18x128xf32> to vector<18x128xf32>
    %184 = arith.maximumf %181, %183 : vector<18x128xf32>
    %c0_169 = arith.constant 0 : index
    %c0_170 = arith.constant 0 : index
    %185 = vector.load %arg6[%c0_169, %c0_170] : memref<18x128xf32, #tpu.memory_space<vmem>>, vector<18x128xf32>
    tpu.vector_store %arg6[%c0_169, %c0_170], %184 {strides = array<i32>} : memref<18x128xf32, #tpu.memory_space<vmem>>, vector<18x128xf32>,
    %c0_171 = arith.constant 0 : index
    %c0_172 = arith.constant 0 : index
    %186 = tpu.strided_load %arg6[%c0_171, %c0_172] {strides = array<i32: 2, 1>} : memref<18x128xf32, #tpu.memory_space<vmem>>, vector<8x128xf32>
    %c1_173 = arith.constant 1 : index
    %c0_174 = arith.constant 0 : index
    %187 = tpu.strided_load %arg6[%c1_173, %c0_174] {strides = array<i32: 2, 1>} : memref<18x128xf32, #tpu.memory_space<vmem>>, vector<8x128xf32>
    %188 = arith.maximumf %186, %187 : vector<8x128xf32>
    %c2_175 = arith.constant 2 : index
    %c0_176 = arith.constant 0 : index
    %189 = tpu.strided_load %arg6[%c2_175, %c0_176] {strides = array<i32: 2, 1>} : memref<18x128xf32, #tpu.memory_space<vmem>>, vector<8x128xf32>
    %190 = arith.maximumf %188, %189 : vector<8x128xf32>
    %c0_177 = arith.constant 0 : index
    %c48 = arith.constant 48 : index
    %c0_178 = arith.constant 0 : index
    %191 = vector.load %arg4[%c0_177, %c48, %c0_178] : memref<1x64x128xf32, #tpu.memory_space<vmem>>, vector<1x8x128xf32>
    %192 = vector.shape_cast %191 : vector<1x8x128xf32> to vector<8x128xf32>
    %193 = vector.shape_cast %190 : vector<8x128xf32> to vector<1x8x128xf32>
    tpu.vector_store %arg4[%c0_177, %c48, %c0_178], %193 {strides = array<i32>} : memref<1x64x128xf32, #tpu.memory_space<vmem>>, vector<1x8x128xf32>,
    %c14_179 = arith.constant 14 : index
    %c0_180 = arith.constant 0 : index
    %c0_181 = arith.constant 0 : index
    %194 = vector.load %arg5[%c14_179, %c0_180, %c0_181] : memref<18x18x128xf32, #tpu.memory_space<vmem>>, vector<1x18x128xf32>
    %195 = vector.shape_cast %194 : vector<1x18x128xf32> to vector<18x128xf32>
    %c15_182 = arith.constant 15 : index
    %c0_183 = arith.constant 0 : index
    %c0_184 = arith.constant 0 : index
    %196 = vector.load %arg5[%c15_182, %c0_183, %c0_184] : memref<18x18x128xf32, #tpu.memory_space<vmem>>, vector<1x18x128xf32>
    %197 = vector.shape_cast %196 : vector<1x18x128xf32> to vector<18x128xf32>
    %198 = arith.maximumf %195, %197 : vector<18x128xf32>
    %c16_185 = arith.constant 16 : index
    %c0_186 = arith.constant 0 : index
    %c0_187 = arith.constant 0 : index
    %199 = vector.load %arg5[%c16_185, %c0_186, %c0_187] : memref<18x18x128xf32, #tpu.memory_space<vmem>>, vector<1x18x128xf32>
    %200 = vector.shape_cast %199 : vector<1x18x128xf32> to vector<18x128xf32>
    %201 = arith.maximumf %198, %200 : vector<18x128xf32>
    %c0_188 = arith.constant 0 : index
    %c0_189 = arith.constant 0 : index
    %202 = vector.load %arg6[%c0_188, %c0_189] : memref<18x128xf32, #tpu.memory_space<vmem>>, vector<18x128xf32>
    tpu.vector_store %arg6[%c0_188, %c0_189], %201 {strides = array<i32>} : memref<18x128xf32, #tpu.memory_space<vmem>>, vector<18x128xf32>,
    %c0_190 = arith.constant 0 : index
    %c0_191 = arith.constant 0 : index
    %203 = tpu.strided_load %arg6[%c0_190, %c0_191] {strides = array<i32: 2, 1>} : memref<18x128xf32, #tpu.memory_space<vmem>>, vector<8x128xf32>
    %c1_192 = arith.constant 1 : index
    %c0_193 = arith.constant 0 : index
    %204 = tpu.strided_load %arg6[%c1_192, %c0_193] {strides = array<i32: 2, 1>} : memref<18x128xf32, #tpu.memory_space<vmem>>, vector<8x128xf32>
    %205 = arith.maximumf %203, %204 : vector<8x128xf32>
    %c2_194 = arith.constant 2 : index
    %c0_195 = arith.constant 0 : index
    %206 = tpu.strided_load %arg6[%c2_194, %c0_195] {strides = array<i32: 2, 1>} : memref<18x128xf32, #tpu.memory_space<vmem>>, vector<8x128xf32>
    %207 = arith.maximumf %205, %206 : vector<8x128xf32>
    %c0_196 = arith.constant 0 : index
    %c56 = arith.constant 56 : index
    %c0_197 = arith.constant 0 : index
    %208 = vector.load %arg4[%c0_196, %c56, %c0_197] : memref<1x64x128xf32, #tpu.memory_space<vmem>>, vector<1x8x128xf32>
    %209 = vector.shape_cast %208 : vector<1x8x128xf32> to vector<8x128xf32>
    %210 = vector.shape_cast %207 : vector<8x128xf32> to vector<1x8x128xf32>
    tpu.vector_store %arg4[%c0_196, %c56, %c0_197], %210 {strides = array<i32>} : memref<1x64x128xf32, #tpu.memory_space<vmem>>, vector<1x8x128xf32>,
    return
  }
  func.func @transform_0(%arg0: i32) -> (i32, i32, i32) {
    %c0_i32 = arith.constant 0 : i32
    %c0_i32_0 = arith.constant 0 : i32
    %c0_i32_1 = arith.constant 0 : i32
    return %arg0, %c0_i32, %c0_i32_0 : i32, i32, i32
  }
  func.func @transform_1(%arg0: i32) -> (i32, i32) {
    %c0_i32 = arith.constant 0 : i32
    %c0_i32_0 = arith.constant 0 : i32
    %c0_i32_1 = arith.constant 0 : i32
    return %c0_i32, %c0_i32_0 : i32, i32
  }
  func.func @transform_2(%arg0: i32) -> (i32, i32) {
    %c0_i32 = arith.constant 0 : i32
    %c0_i32_0 = arith.constant 0 : i32
    %c0_i32_1 = arith.constant 0 : i32
    return %c0_i32, %c0_i32_0 : i32, i32
  }
  func.func @transform_3(%arg0: i32) -> (i32, i32, i32) {
    %c0_i32 = arith.constant 0 : i32
    %c0_i32_0 = arith.constant 0 : i32
    %c0_i32_1 = arith.constant 0 : i32
    return %arg0, %c0_i32, %c0_i32_0 : i32, i32, i32
  }
}

module attributes {stable_mosaic.version = 11 : i64} {
  func.func @_layer_kernel(%arg0: i32, %arg1: memref<1x16x128xf32, #tpu.memory_space<vmem>>, %arg2: memref<128x64xf32, #tpu.memory_space<vmem>>, %arg3: memref<1x64xf32, #tpu.memory_space<vmem>>, %arg4: memref<9x64xf32, #tpu.memory_space<vmem>>, %arg5: memref<1x64xf32, #tpu.memory_space<vmem>>, %arg6: memref<64x128xf32, #tpu.memory_space<vmem>>, %arg7: memref<1x128xf32, #tpu.memory_space<vmem>>, %arg8: memref<1x128xf32, #tpu.memory_space<vmem>>, %arg9: memref<1x4x128xf32, #tpu.memory_space<vmem>>, %arg10: memref<6x6x64xf32, #tpu.memory_space<vmem>>, %arg11: memref<6x6x128xf32, #tpu.memory_space<vmem>>, %arg12: memref<6x128xf32, #tpu.memory_space<vmem>>) attributes {dimension_semantics = [#tpu.dimension_semantics<parallel>], iteration_bounds = array<i64: 2>, scalar_prefetch = 0 : i64, scratch_operands = 3 : i64, tpu.core_type = #tpu.core_type<tc>, window_params = [{transform_indices = @transform_0, window_bounds = array<i64: 1, 16, 128>}, {pipeline_mode = #tpu.pipeline_mode<synchronous>, transform_indices = @transform_1, window_bounds = array<i64: 128, 64>}, {pipeline_mode = #tpu.pipeline_mode<synchronous>, transform_indices = @transform_2, window_bounds = array<i64: 1, 64>}, {pipeline_mode = #tpu.pipeline_mode<synchronous>, transform_indices = @transform_3, window_bounds = array<i64: 9, 64>}, {pipeline_mode = #tpu.pipeline_mode<synchronous>, transform_indices = @transform_4, window_bounds = array<i64: 1, 64>}, {pipeline_mode = #tpu.pipeline_mode<synchronous>, transform_indices = @transform_5, window_bounds = array<i64: 64, 128>}, {pipeline_mode = #tpu.pipeline_mode<synchronous>, transform_indices = @transform_6, window_bounds = array<i64: 1, 128>}, {pipeline_mode = #tpu.pipeline_mode<synchronous>, transform_indices = @transform_7, window_bounds = array<i64: 1, 128>}, {transform_indices = @transform_8, window_bounds = array<i64: 1, 4, 128>}]} {
    %c0 = arith.constant 0 : index
    %c0_0 = arith.constant 0 : index
    %c0_1 = arith.constant 0 : index
    %0 = vector.load %arg1[%c0, %c0_0, %c0_1] : memref<1x16x128xf32, #tpu.memory_space<vmem>>, vector<1x16x128xf32>
    %1 = vector.shape_cast %0 : vector<1x16x128xf32> to vector<16x128xf32>
    %c0_2 = arith.constant 0 : index
    %c0_3 = arith.constant 0 : index
    %2 = vector.load %arg2[%c0_2, %c0_3] : memref<128x64xf32, #tpu.memory_space<vmem>>, vector<128x64xf32>
    %cst = arith.constant dense<0.000000e+00> : vector<16x64xf32>
    %3 = tpu.matmul %1, %2, %cst {dimension_numbers = #tpu.dot_dimension_numbers<[1], [0], [0], [1], [0, 0, 1, 1], [], []>} : vector<16x128xf32>, vector<128x64xf32>, vector<16x64xf32> -> vector<16x64xf32>
    %c0_4 = arith.constant 0 : index
    %c0_5 = arith.constant 0 : index
    %4 = vector.load %arg3[%c0_4, %c0_5] : memref<1x64xf32, #tpu.memory_space<vmem>>, vector<1x64xf32>
    %5 = vector.broadcast %4 : vector<1x64xf32> to vector<16x64xf32>
    %6 = arith.addf %3, %5 : vector<16x64xf32>
    %cst_6 = arith.constant 0.000000e+00 : f32
    %7 = vector.broadcast %cst_6 : f32 to vector<16x64xf32>
    %8 = arith.maximumf %6, %7 : vector<16x64xf32>
    %cst_7 = arith.constant 0.000000e+00 : f32
    %9 = vector.broadcast %cst_7 : f32 to vector<6x6x64xf32>
    %c0_8 = arith.constant 0 : index
    %c0_9 = arith.constant 0 : index
    %c0_10 = arith.constant 0 : index
    %10 = vector.load %arg10[%c0_8, %c0_9, %c0_10] : memref<6x6x64xf32, #tpu.memory_space<vmem>>, vector<6x6x64xf32>
    tpu.vector_store %arg10[%c0_8, %c0_9, %c0_10], %9 {strides = array<i32>} : memref<6x6x64xf32, #tpu.memory_space<vmem>>, vector<6x6x64xf32>,
    %11 = vector.extract_strided_slice %8 {offsets = [0, 0], sizes = [4, 64], strides = [1, 1]} : vector<16x64xf32> to vector<4x64xf32>
    %c1 = arith.constant 1 : index
    %c1_11 = arith.constant 1 : index
    %c0_12 = arith.constant 0 : index
    %12 = vector.load %arg10[%c1, %c1_11, %c0_12] : memref<6x6x64xf32, #tpu.memory_space<vmem>>, vector<1x4x64xf32>
    %13 = vector.shape_cast %12 : vector<1x4x64xf32> to vector<4x64xf32>
    %14 = vector.shape_cast %11 : vector<4x64xf32> to vector<1x4x64xf32>
    tpu.vector_store %arg10[%c1, %c1_11, %c0_12], %14 {strides = array<i32>} : memref<6x6x64xf32, #tpu.memory_space<vmem>>, vector<1x4x64xf32>,
    %15 = vector.extract_strided_slice %8 {offsets = [4, 0], sizes = [4, 64], strides = [1, 1]} : vector<16x64xf32> to vector<4x64xf32>
    %c2 = arith.constant 2 : index
    %c1_13 = arith.constant 1 : index
    %c0_14 = arith.constant 0 : index
    %16 = vector.load %arg10[%c2, %c1_13, %c0_14] : memref<6x6x64xf32, #tpu.memory_space<vmem>>, vector<1x4x64xf32>
    %17 = vector.shape_cast %16 : vector<1x4x64xf32> to vector<4x64xf32>
    %18 = vector.shape_cast %15 : vector<4x64xf32> to vector<1x4x64xf32>
    tpu.vector_store %arg10[%c2, %c1_13, %c0_14], %18 {strides = array<i32>} : memref<6x6x64xf32, #tpu.memory_space<vmem>>, vector<1x4x64xf32>,
    %19 = vector.extract_strided_slice %8 {offsets = [8, 0], sizes = [4, 64], strides = [1, 1]} : vector<16x64xf32> to vector<4x64xf32>
    %c3 = arith.constant 3 : index
    %c1_15 = arith.constant 1 : index
    %c0_16 = arith.constant 0 : index
    %20 = vector.load %arg10[%c3, %c1_15, %c0_16] : memref<6x6x64xf32, #tpu.memory_space<vmem>>, vector<1x4x64xf32>
    %21 = vector.shape_cast %20 : vector<1x4x64xf32> to vector<4x64xf32>
    %22 = vector.shape_cast %19 : vector<4x64xf32> to vector<1x4x64xf32>
    tpu.vector_store %arg10[%c3, %c1_15, %c0_16], %22 {strides = array<i32>} : memref<6x6x64xf32, #tpu.memory_space<vmem>>, vector<1x4x64xf32>,
    %23 = vector.extract_strided_slice %8 {offsets = [12, 0], sizes = [4, 64], strides = [1, 1]} : vector<16x64xf32> to vector<4x64xf32>
    %c4 = arith.constant 4 : index
    %c1_17 = arith.constant 1 : index
    %c0_18 = arith.constant 0 : index
    %24 = vector.load %arg10[%c4, %c1_17, %c0_18] : memref<6x6x64xf32, #tpu.memory_space<vmem>>, vector<1x4x64xf32>
    %25 = vector.shape_cast %24 : vector<1x4x64xf32> to vector<4x64xf32>
    %26 = vector.shape_cast %23 : vector<4x64xf32> to vector<1x4x64xf32>
    tpu.vector_store %arg10[%c4, %c1_17, %c0_18], %26 {strides = array<i32>} : memref<6x6x64xf32, #tpu.memory_space<vmem>>, vector<1x4x64xf32>,
    %c0_19 = arith.constant 0 : index
    %c0_20 = arith.constant 0 : index
    %27 = vector.load %arg4[%c0_19, %c0_20] : memref<9x64xf32, #tpu.memory_space<vmem>>, vector<9x64xf32>
    %cst_21 = arith.constant 0.000000e+00 : f32
    %28 = vector.broadcast %cst_21 : f32 to vector<4x4x64xf32>
    %c0_22 = arith.constant 0 : index
    %c0_23 = arith.constant 0 : index
    %c0_24 = arith.constant 0 : index
    %29 = vector.load %arg10[%c0_22, %c0_23, %c0_24] : memref<6x6x64xf32, #tpu.memory_space<vmem>>, vector<4x4x64xf32>
    %30 = vector.extract_strided_slice %27 {offsets = [0, 0], sizes = [1, 64], strides = [1, 1]} : vector<9x64xf32> to vector<1x64xf32>
    %31 = vector.shape_cast %30 : vector<1x64xf32> to vector<64xf32>
    %32 = vector.shape_cast %31 : vector<64xf32> to vector<1x1x64xf32>
    %33 = vector.broadcast %32 : vector<1x1x64xf32> to vector<4x4x64xf32>
    %34 = arith.mulf %29, %33 : vector<4x4x64xf32>
    %35 = arith.addf %28, %34 : vector<4x4x64xf32>
    %c0_25 = arith.constant 0 : index
    %c1_26 = arith.constant 1 : index
    %c0_27 = arith.constant 0 : index
    %36 = vector.load %arg10[%c0_25, %c1_26, %c0_27] : memref<6x6x64xf32, #tpu.memory_space<vmem>>, vector<4x4x64xf32>
    %37 = vector.extract_strided_slice %27 {offsets = [1, 0], sizes = [1, 64], strides = [1, 1]} : vector<9x64xf32> to vector<1x64xf32>
    %38 = vector.shape_cast %37 : vector<1x64xf32> to vector<64xf32>
    %39 = vector.shape_cast %38 : vector<64xf32> to vector<1x1x64xf32>
    %40 = vector.broadcast %39 : vector<1x1x64xf32> to vector<4x4x64xf32>
    %41 = arith.mulf %36, %40 : vector<4x4x64xf32>
    %42 = arith.addf %35, %41 : vector<4x4x64xf32>
    %c0_28 = arith.constant 0 : index
    %c2_29 = arith.constant 2 : index
    %c0_30 = arith.constant 0 : index
    %43 = vector.load %arg10[%c0_28, %c2_29, %c0_30] : memref<6x6x64xf32, #tpu.memory_space<vmem>>, vector<4x4x64xf32>
    %44 = vector.extract_strided_slice %27 {offsets = [2, 0], sizes = [1, 64], strides = [1, 1]} : vector<9x64xf32> to vector<1x64xf32>
    %45 = vector.shape_cast %44 : vector<1x64xf32> to vector<64xf32>
    %46 = vector.shape_cast %45 : vector<64xf32> to vector<1x1x64xf32>
    %47 = vector.broadcast %46 : vector<1x1x64xf32> to vector<4x4x64xf32>
    %48 = arith.mulf %43, %47 : vector<4x4x64xf32>
    %49 = arith.addf %42, %48 : vector<4x4x64xf32>
    %c1_31 = arith.constant 1 : index
    %c0_32 = arith.constant 0 : index
    %c0_33 = arith.constant 0 : index
    %50 = vector.load %arg10[%c1_31, %c0_32, %c0_33] : memref<6x6x64xf32, #tpu.memory_space<vmem>>, vector<4x4x64xf32>
    %51 = vector.extract_strided_slice %27 {offsets = [3, 0], sizes = [1, 64], strides = [1, 1]} : vector<9x64xf32> to vector<1x64xf32>
    %52 = vector.shape_cast %51 : vector<1x64xf32> to vector<64xf32>
    %53 = vector.shape_cast %52 : vector<64xf32> to vector<1x1x64xf32>
    %54 = vector.broadcast %53 : vector<1x1x64xf32> to vector<4x4x64xf32>
    %55 = arith.mulf %50, %54 : vector<4x4x64xf32>
    %56 = arith.addf %49, %55 : vector<4x4x64xf32>
    %c1_34 = arith.constant 1 : index
    %c1_35 = arith.constant 1 : index
    %c0_36 = arith.constant 0 : index
    %57 = vector.load %arg10[%c1_34, %c1_35, %c0_36] : memref<6x6x64xf32, #tpu.memory_space<vmem>>, vector<4x4x64xf32>
    %58 = vector.extract_strided_slice %27 {offsets = [4, 0], sizes = [1, 64], strides = [1, 1]} : vector<9x64xf32> to vector<1x64xf32>
    %59 = vector.shape_cast %58 : vector<1x64xf32> to vector<64xf32>
    %60 = vector.shape_cast %59 : vector<64xf32> to vector<1x1x64xf32>
    %61 = vector.broadcast %60 : vector<1x1x64xf32> to vector<4x4x64xf32>
    %62 = arith.mulf %57, %61 : vector<4x4x64xf32>
    %63 = arith.addf %56, %62 : vector<4x4x64xf32>
    %c1_37 = arith.constant 1 : index
    %c2_38 = arith.constant 2 : index
    %c0_39 = arith.constant 0 : index
    %64 = vector.load %arg10[%c1_37, %c2_38, %c0_39] : memref<6x6x64xf32, #tpu.memory_space<vmem>>, vector<4x4x64xf32>
    %65 = vector.extract_strided_slice %27 {offsets = [5, 0], sizes = [1, 64], strides = [1, 1]} : vector<9x64xf32> to vector<1x64xf32>
    %66 = vector.shape_cast %65 : vector<1x64xf32> to vector<64xf32>
    %67 = vector.shape_cast %66 : vector<64xf32> to vector<1x1x64xf32>
    %68 = vector.broadcast %67 : vector<1x1x64xf32> to vector<4x4x64xf32>
    %69 = arith.mulf %64, %68 : vector<4x4x64xf32>
    %70 = arith.addf %63, %69 : vector<4x4x64xf32>
    %c2_40 = arith.constant 2 : index
    %c0_41 = arith.constant 0 : index
    %c0_42 = arith.constant 0 : index
    %71 = vector.load %arg10[%c2_40, %c0_41, %c0_42] : memref<6x6x64xf32, #tpu.memory_space<vmem>>, vector<4x4x64xf32>
    %72 = vector.extract_strided_slice %27 {offsets = [6, 0], sizes = [1, 64], strides = [1, 1]} : vector<9x64xf32> to vector<1x64xf32>
    %73 = vector.shape_cast %72 : vector<1x64xf32> to vector<64xf32>
    %74 = vector.shape_cast %73 : vector<64xf32> to vector<1x1x64xf32>
    %75 = vector.broadcast %74 : vector<1x1x64xf32> to vector<4x4x64xf32>
    %76 = arith.mulf %71, %75 : vector<4x4x64xf32>
    %77 = arith.addf %70, %76 : vector<4x4x64xf32>
    %c2_43 = arith.constant 2 : index
    %c1_44 = arith.constant 1 : index
    %c0_45 = arith.constant 0 : index
    %78 = vector.load %arg10[%c2_43, %c1_44, %c0_45] : memref<6x6x64xf32, #tpu.memory_space<vmem>>, vector<4x4x64xf32>
    %79 = vector.extract_strided_slice %27 {offsets = [7, 0], sizes = [1, 64], strides = [1, 1]} : vector<9x64xf32> to vector<1x64xf32>
    %80 = vector.shape_cast %79 : vector<1x64xf32> to vector<64xf32>
    %81 = vector.shape_cast %80 : vector<64xf32> to vector<1x1x64xf32>
    %82 = vector.broadcast %81 : vector<1x1x64xf32> to vector<4x4x64xf32>
    %83 = arith.mulf %78, %82 : vector<4x4x64xf32>
    %84 = arith.addf %77, %83 : vector<4x4x64xf32>
    %c2_46 = arith.constant 2 : index
    %c2_47 = arith.constant 2 : index
    %c0_48 = arith.constant 0 : index
    %85 = vector.load %arg10[%c2_46, %c2_47, %c0_48] : memref<6x6x64xf32, #tpu.memory_space<vmem>>, vector<4x4x64xf32>
    %86 = vector.extract_strided_slice %27 {offsets = [8, 0], sizes = [1, 64], strides = [1, 1]} : vector<9x64xf32> to vector<1x64xf32>
    %87 = vector.shape_cast %86 : vector<1x64xf32> to vector<64xf32>
    %88 = vector.shape_cast %87 : vector<64xf32> to vector<1x1x64xf32>
    %89 = vector.broadcast %88 : vector<1x1x64xf32> to vector<4x4x64xf32>
    %90 = arith.mulf %85, %89 : vector<4x4x64xf32>
    %91 = arith.addf %84, %90 : vector<4x4x64xf32>
    %c0_49 = arith.constant 0 : index
    %c0_50 = arith.constant 0 : index
    %92 = vector.load %arg5[%c0_49, %c0_50] : memref<1x64xf32, #tpu.memory_space<vmem>>, vector<1x64xf32>
    %93 = vector.shape_cast %92 : vector<1x64xf32> to vector<1x1x64xf32>
    %94 = vector.broadcast %93 : vector<1x1x64xf32> to vector<4x4x64xf32>
    %95 = arith.addf %91, %94 : vector<4x4x64xf32>
    %c0_51 = arith.constant 0 : index
    %c0_52 = arith.constant 0 : index
    %96 = vector.load %arg6[%c0_51, %c0_52] : memref<64x128xf32, #tpu.memory_space<vmem>>, vector<64x128xf32>
    %c0_53 = arith.constant 0 : index
    %c0_54 = arith.constant 0 : index
    %97 = vector.load %arg7[%c0_53, %c0_54] : memref<1x128xf32, #tpu.memory_space<vmem>>, vector<1x128xf32>
    %c0_55 = arith.constant 0 : index
    %c0_56 = arith.constant 0 : index
    %98 = vector.load %arg8[%c0_55, %c0_56] : memref<1x128xf32, #tpu.memory_space<vmem>>, vector<1x128xf32>
    %cst_57 = arith.constant 0.000000e+00 : f32
    %99 = vector.broadcast %cst_57 : f32 to vector<6x6x128xf32>
    %c0_58 = arith.constant 0 : index
    %c0_59 = arith.constant 0 : index
    %c0_60 = arith.constant 0 : index
    %100 = vector.load %arg11[%c0_58, %c0_59, %c0_60] : memref<6x6x128xf32, #tpu.memory_space<vmem>>, vector<6x6x128xf32>
    tpu.vector_store %arg11[%c0_58, %c0_59, %c0_60], %99 {strides = array<i32>} : memref<6x6x128xf32, #tpu.memory_space<vmem>>, vector<6x6x128xf32>,
    %101 = vector.extract_strided_slice %95 {offsets = [0, 0, 0], sizes = [1, 4, 64], strides = [1, 1, 1]} : vector<4x4x64xf32> to vector<1x4x64xf32>
    %102 = vector.shape_cast %101 : vector<1x4x64xf32> to vector<4x64xf32>
    %cst_61 = arith.constant dense<0.000000e+00> : vector<4x128xf32>
    %103 = tpu.matmul %102, %96, %cst_61 {dimension_numbers = #tpu.dot_dimension_numbers<[1], [0], [0], [1], [0, 0, 1, 1], [], []>} : vector<4x64xf32>, vector<64x128xf32>, vector<4x128xf32> -> vector<4x128xf32>
    %104 = vector.broadcast %97 : vector<1x128xf32> to vector<4x128xf32>
    %105 = arith.addf %103, %104 : vector<4x128xf32>
    %cst_62 = arith.constant 0.000000e+00 : f32
    %106 = vector.broadcast %cst_62 : f32 to vector<4x128xf32>
    %107 = arith.maximumf %105, %106 : vector<4x128xf32>
    %108 = vector.extract_strided_slice %1 {offsets = [0, 0], sizes = [4, 128], strides = [1, 1]} : vector<16x128xf32> to vector<4x128xf32>
    %109 = vector.broadcast %98 : vector<1x128xf32> to vector<4x128xf32>
    %110 = arith.mulf %108, %109 : vector<4x128xf32>
    %111 = arith.addf %107, %110 : vector<4x128xf32>
    %c1_63 = arith.constant 1 : index
    %c1_64 = arith.constant 1 : index
    %c0_65 = arith.constant 0 : index
    %112 = vector.load %arg11[%c1_63, %c1_64, %c0_65] : memref<6x6x128xf32, #tpu.memory_space<vmem>>, vector<1x4x128xf32>
    %113 = vector.shape_cast %112 : vector<1x4x128xf32> to vector<4x128xf32>
    %114 = vector.shape_cast %111 : vector<4x128xf32> to vector<1x4x128xf32>
    tpu.vector_store %arg11[%c1_63, %c1_64, %c0_65], %114 {strides = array<i32>} : memref<6x6x128xf32, #tpu.memory_space<vmem>>, vector<1x4x128xf32>,
    %115 = vector.extract_strided_slice %95 {offsets = [1, 0, 0], sizes = [1, 4, 64], strides = [1, 1, 1]} : vector<4x4x64xf32> to vector<1x4x64xf32>
    %116 = vector.shape_cast %115 : vector<1x4x64xf32> to vector<4x64xf32>
    %cst_66 = arith.constant dense<0.000000e+00> : vector<4x128xf32>
    %117 = tpu.matmul %116, %96, %cst_66 {dimension_numbers = #tpu.dot_dimension_numbers<[1], [0], [0], [1], [0, 0, 1, 1], [], []>} : vector<4x64xf32>, vector<64x128xf32>, vector<4x128xf32> -> vector<4x128xf32>
    %118 = vector.broadcast %97 : vector<1x128xf32> to vector<4x128xf32>
    %119 = arith.addf %117, %118 : vector<4x128xf32>
    %cst_67 = arith.constant 0.000000e+00 : f32
    %120 = vector.broadcast %cst_67 : f32 to vector<4x128xf32>
    %121 = arith.maximumf %119, %120 : vector<4x128xf32>
    %122 = vector.extract_strided_slice %1 {offsets = [4, 0], sizes = [4, 128], strides = [1, 1]} : vector<16x128xf32> to vector<4x128xf32>
    %123 = vector.broadcast %98 : vector<1x128xf32> to vector<4x128xf32>
    %124 = arith.mulf %122, %123 : vector<4x128xf32>
    %125 = arith.addf %121, %124 : vector<4x128xf32>
    %c2_68 = arith.constant 2 : index
    %c1_69 = arith.constant 1 : index
    %c0_70 = arith.constant 0 : index
    %126 = vector.load %arg11[%c2_68, %c1_69, %c0_70] : memref<6x6x128xf32, #tpu.memory_space<vmem>>, vector<1x4x128xf32>
    %127 = vector.shape_cast %126 : vector<1x4x128xf32> to vector<4x128xf32>
    %128 = vector.shape_cast %125 : vector<4x128xf32> to vector<1x4x128xf32>
    tpu.vector_store %arg11[%c2_68, %c1_69, %c0_70], %128 {strides = array<i32>} : memref<6x6x128xf32, #tpu.memory_space<vmem>>, vector<1x4x128xf32>,
    %129 = vector.extract_strided_slice %95 {offsets = [2, 0, 0], sizes = [1, 4, 64], strides = [1, 1, 1]} : vector<4x4x64xf32> to vector<1x4x64xf32>
    %130 = vector.shape_cast %129 : vector<1x4x64xf32> to vector<4x64xf32>
    %cst_71 = arith.constant dense<0.000000e+00> : vector<4x128xf32>
    %131 = tpu.matmul %130, %96, %cst_71 {dimension_numbers = #tpu.dot_dimension_numbers<[1], [0], [0], [1], [0, 0, 1, 1], [], []>} : vector<4x64xf32>, vector<64x128xf32>, vector<4x128xf32> -> vector<4x128xf32>
    %132 = vector.broadcast %97 : vector<1x128xf32> to vector<4x128xf32>
    %133 = arith.addf %131, %132 : vector<4x128xf32>
    %cst_72 = arith.constant 0.000000e+00 : f32
    %134 = vector.broadcast %cst_72 : f32 to vector<4x128xf32>
    %135 = arith.maximumf %133, %134 : vector<4x128xf32>
    %136 = vector.extract_strided_slice %1 {offsets = [8, 0], sizes = [4, 128], strides = [1, 1]} : vector<16x128xf32> to vector<4x128xf32>
    %137 = vector.broadcast %98 : vector<1x128xf32> to vector<4x128xf32>
    %138 = arith.mulf %136, %137 : vector<4x128xf32>
    %139 = arith.addf %135, %138 : vector<4x128xf32>
    %c3_73 = arith.constant 3 : index
    %c1_74 = arith.constant 1 : index
    %c0_75 = arith.constant 0 : index
    %140 = vector.load %arg11[%c3_73, %c1_74, %c0_75] : memref<6x6x128xf32, #tpu.memory_space<vmem>>, vector<1x4x128xf32>
    %141 = vector.shape_cast %140 : vector<1x4x128xf32> to vector<4x128xf32>
    %142 = vector.shape_cast %139 : vector<4x128xf32> to vector<1x4x128xf32>
    tpu.vector_store %arg11[%c3_73, %c1_74, %c0_75], %142 {strides = array<i32>} : memref<6x6x128xf32, #tpu.memory_space<vmem>>, vector<1x4x128xf32>,
    %143 = vector.extract_strided_slice %95 {offsets = [3, 0, 0], sizes = [1, 4, 64], strides = [1, 1, 1]} : vector<4x4x64xf32> to vector<1x4x64xf32>
    %144 = vector.shape_cast %143 : vector<1x4x64xf32> to vector<4x64xf32>
    %cst_76 = arith.constant dense<0.000000e+00> : vector<4x128xf32>
    %145 = tpu.matmul %144, %96, %cst_76 {dimension_numbers = #tpu.dot_dimension_numbers<[1], [0], [0], [1], [0, 0, 1, 1], [], []>} : vector<4x64xf32>, vector<64x128xf32>, vector<4x128xf32> -> vector<4x128xf32>
    %146 = vector.broadcast %97 : vector<1x128xf32> to vector<4x128xf32>
    %147 = arith.addf %145, %146 : vector<4x128xf32>
    %cst_77 = arith.constant 0.000000e+00 : f32
    %148 = vector.broadcast %cst_77 : f32 to vector<4x128xf32>
    %149 = arith.maximumf %147, %148 : vector<4x128xf32>
    %150 = vector.extract_strided_slice %1 {offsets = [12, 0], sizes = [4, 128], strides = [1, 1]} : vector<16x128xf32> to vector<4x128xf32>
    %151 = vector.broadcast %98 : vector<1x128xf32> to vector<4x128xf32>
    %152 = arith.mulf %150, %151 : vector<4x128xf32>
    %153 = arith.addf %149, %152 : vector<4x128xf32>
    %c4_78 = arith.constant 4 : index
    %c1_79 = arith.constant 1 : index
    %c0_80 = arith.constant 0 : index
    %154 = vector.load %arg11[%c4_78, %c1_79, %c0_80] : memref<6x6x128xf32, #tpu.memory_space<vmem>>, vector<1x4x128xf32>
    %155 = vector.shape_cast %154 : vector<1x4x128xf32> to vector<4x128xf32>
    %156 = vector.shape_cast %153 : vector<4x128xf32> to vector<1x4x128xf32>
    tpu.vector_store %arg11[%c4_78, %c1_79, %c0_80], %156 {strides = array<i32>} : memref<6x6x128xf32, #tpu.memory_space<vmem>>, vector<1x4x128xf32>,
    %c0_81 = arith.constant 0 : index
    %c0_82 = arith.constant 0 : index
    %c0_83 = arith.constant 0 : index
    %157 = vector.load %arg11[%c0_81, %c0_82, %c0_83] : memref<6x6x128xf32, #tpu.memory_space<vmem>>, vector<1x6x128xf32>
    %158 = vector.shape_cast %157 : vector<1x6x128xf32> to vector<6x128xf32>
    %c1_84 = arith.constant 1 : index
    %c0_85 = arith.constant 0 : index
    %c0_86 = arith.constant 0 : index
    %159 = vector.load %arg11[%c1_84, %c0_85, %c0_86] : memref<6x6x128xf32, #tpu.memory_space<vmem>>, vector<1x6x128xf32>
    %160 = vector.shape_cast %159 : vector<1x6x128xf32> to vector<6x128xf32>
    %161 = arith.maximumf %158, %160 : vector<6x128xf32>
    %c2_87 = arith.constant 2 : index
    %c0_88 = arith.constant 0 : index
    %c0_89 = arith.constant 0 : index
    %162 = vector.load %arg11[%c2_87, %c0_88, %c0_89] : memref<6x6x128xf32, #tpu.memory_space<vmem>>, vector<1x6x128xf32>
    %163 = vector.shape_cast %162 : vector<1x6x128xf32> to vector<6x128xf32>
    %164 = arith.maximumf %161, %163 : vector<6x128xf32>
    %c0_90 = arith.constant 0 : index
    %c0_91 = arith.constant 0 : index
    %165 = vector.load %arg12[%c0_90, %c0_91] : memref<6x128xf32, #tpu.memory_space<vmem>>, vector<6x128xf32>
    tpu.vector_store %arg12[%c0_90, %c0_91], %164 {strides = array<i32>} : memref<6x128xf32, #tpu.memory_space<vmem>>, vector<6x128xf32>,
    %c0_92 = arith.constant 0 : index
    %c0_93 = arith.constant 0 : index
    %166 = tpu.strided_load %arg12[%c0_92, %c0_93] {strides = array<i32: 2, 1>} : memref<6x128xf32, #tpu.memory_space<vmem>>, vector<2x128xf32>
    %c1_94 = arith.constant 1 : index
    %c0_95 = arith.constant 0 : index
    %167 = tpu.strided_load %arg12[%c1_94, %c0_95] {strides = array<i32: 2, 1>} : memref<6x128xf32, #tpu.memory_space<vmem>>, vector<2x128xf32>
    %168 = arith.maximumf %166, %167 : vector<2x128xf32>
    %c2_96 = arith.constant 2 : index
    %c0_97 = arith.constant 0 : index
    %169 = tpu.strided_load %arg12[%c2_96, %c0_97] {strides = array<i32: 2, 1>} : memref<6x128xf32, #tpu.memory_space<vmem>>, vector<2x128xf32>
    %170 = arith.maximumf %168, %169 : vector<2x128xf32>
    %c0_98 = arith.constant 0 : index
    %c0_99 = arith.constant 0 : index
    %c0_100 = arith.constant 0 : index
    %171 = vector.load %arg9[%c0_98, %c0_99, %c0_100] : memref<1x4x128xf32, #tpu.memory_space<vmem>>, vector<1x2x128xf32>
    %172 = vector.shape_cast %171 : vector<1x2x128xf32> to vector<2x128xf32>
    %173 = vector.shape_cast %170 : vector<2x128xf32> to vector<1x2x128xf32>
    tpu.vector_store %arg9[%c0_98, %c0_99, %c0_100], %173 {strides = array<i32>} : memref<1x4x128xf32, #tpu.memory_space<vmem>>, vector<1x2x128xf32>,
    %c2_101 = arith.constant 2 : index
    %c0_102 = arith.constant 0 : index
    %c0_103 = arith.constant 0 : index
    %174 = vector.load %arg11[%c2_101, %c0_102, %c0_103] : memref<6x6x128xf32, #tpu.memory_space<vmem>>, vector<1x6x128xf32>
    %175 = vector.shape_cast %174 : vector<1x6x128xf32> to vector<6x128xf32>
    %c3_104 = arith.constant 3 : index
    %c0_105 = arith.constant 0 : index
    %c0_106 = arith.constant 0 : index
    %176 = vector.load %arg11[%c3_104, %c0_105, %c0_106] : memref<6x6x128xf32, #tpu.memory_space<vmem>>, vector<1x6x128xf32>
    %177 = vector.shape_cast %176 : vector<1x6x128xf32> to vector<6x128xf32>
    %178 = arith.maximumf %175, %177 : vector<6x128xf32>
    %c4_107 = arith.constant 4 : index
    %c0_108 = arith.constant 0 : index
    %c0_109 = arith.constant 0 : index
    %179 = vector.load %arg11[%c4_107, %c0_108, %c0_109] : memref<6x6x128xf32, #tpu.memory_space<vmem>>, vector<1x6x128xf32>
    %180 = vector.shape_cast %179 : vector<1x6x128xf32> to vector<6x128xf32>
    %181 = arith.maximumf %178, %180 : vector<6x128xf32>
    %c0_110 = arith.constant 0 : index
    %c0_111 = arith.constant 0 : index
    %182 = vector.load %arg12[%c0_110, %c0_111] : memref<6x128xf32, #tpu.memory_space<vmem>>, vector<6x128xf32>
    tpu.vector_store %arg12[%c0_110, %c0_111], %181 {strides = array<i32>} : memref<6x128xf32, #tpu.memory_space<vmem>>, vector<6x128xf32>,
    %c0_112 = arith.constant 0 : index
    %c0_113 = arith.constant 0 : index
    %183 = tpu.strided_load %arg12[%c0_112, %c0_113] {strides = array<i32: 2, 1>} : memref<6x128xf32, #tpu.memory_space<vmem>>, vector<2x128xf32>
    %c1_114 = arith.constant 1 : index
    %c0_115 = arith.constant 0 : index
    %184 = tpu.strided_load %arg12[%c1_114, %c0_115] {strides = array<i32: 2, 1>} : memref<6x128xf32, #tpu.memory_space<vmem>>, vector<2x128xf32>
    %185 = arith.maximumf %183, %184 : vector<2x128xf32>
    %c2_116 = arith.constant 2 : index
    %c0_117 = arith.constant 0 : index
    %186 = tpu.strided_load %arg12[%c2_116, %c0_117] {strides = array<i32: 2, 1>} : memref<6x128xf32, #tpu.memory_space<vmem>>, vector<2x128xf32>
    %187 = arith.maximumf %185, %186 : vector<2x128xf32>
    %c0_118 = arith.constant 0 : index
    %c2_119 = arith.constant 2 : index
    %c0_120 = arith.constant 0 : index
    %188 = vector.load %arg9[%c0_118, %c2_119, %c0_120] : memref<1x4x128xf32, #tpu.memory_space<vmem>>, vector<1x2x128xf32>
    %189 = vector.shape_cast %188 : vector<1x2x128xf32> to vector<2x128xf32>
    %190 = vector.shape_cast %187 : vector<2x128xf32> to vector<1x2x128xf32>
    tpu.vector_store %arg9[%c0_118, %c2_119, %c0_120], %190 {strides = array<i32>} : memref<1x4x128xf32, #tpu.memory_space<vmem>>, vector<1x2x128xf32>,
    return
  }
  func.func @transform_0(%arg0: i32) -> (i32, i32, i32) {
    %c0_i32 = arith.constant 0 : i32
    %c0_i32_0 = arith.constant 0 : i32
    %c0_i32_1 = arith.constant 0 : i32
    return %arg0, %c0_i32, %c0_i32_0 : i32, i32, i32
  }
  func.func @transform_1(%arg0: i32) -> (i32, i32) {
    %c0_i32 = arith.constant 0 : i32
    %c0_i32_0 = arith.constant 0 : i32
    %c0_i32_1 = arith.constant 0 : i32
    return %c0_i32, %c0_i32_0 : i32, i32
  }
  func.func @transform_2(%arg0: i32) -> (i32, i32) {
    %c0_i32 = arith.constant 0 : i32
    %c0_i32_0 = arith.constant 0 : i32
    %c0_i32_1 = arith.constant 0 : i32
    return %c0_i32, %c0_i32_0 : i32, i32
  }
  func.func @transform_3(%arg0: i32) -> (i32, i32) {
    %c0_i32 = arith.constant 0 : i32
    %c0_i32_0 = arith.constant 0 : i32
    %c0_i32_1 = arith.constant 0 : i32
    return %c0_i32, %c0_i32_0 : i32, i32
  }
  func.func @transform_4(%arg0: i32) -> (i32, i32) {
    %c0_i32 = arith.constant 0 : i32
    %c0_i32_0 = arith.constant 0 : i32
    %c0_i32_1 = arith.constant 0 : i32
    return %c0_i32, %c0_i32_0 : i32, i32
  }
  func.func @transform_5(%arg0: i32) -> (i32, i32) {
    %c0_i32 = arith.constant 0 : i32
    %c0_i32_0 = arith.constant 0 : i32
    %c0_i32_1 = arith.constant 0 : i32
    return %c0_i32, %c0_i32_0 : i32, i32
  }
  func.func @transform_6(%arg0: i32) -> (i32, i32) {
    %c0_i32 = arith.constant 0 : i32
    %c0_i32_0 = arith.constant 0 : i32
    %c0_i32_1 = arith.constant 0 : i32
    return %c0_i32, %c0_i32_0 : i32, i32
  }
  func.func @transform_7(%arg0: i32) -> (i32, i32) {
    %c0_i32 = arith.constant 0 : i32
    %c0_i32_0 = arith.constant 0 : i32
    %c0_i32_1 = arith.constant 0 : i32
    return %c0_i32, %c0_i32_0 : i32, i32
  }
  func.func @transform_8(%arg0: i32) -> (i32, i32, i32) {
    %c0_i32 = arith.constant 0 : i32
    %c0_i32_0 = arith.constant 0 : i32
    %c0_i32_1 = arith.constant 0 : i32
    return %arg0, %c0_i32, %c0_i32_0 : i32, i32, i32
  }
}

module attributes {stable_mosaic.version = 11 : i64} {
  func.func @_layer_kernel(%arg0: i32, %arg1: memref<1x64x128xf32, #tpu.memory_space<vmem>>, %arg2: memref<128x64xf32, #tpu.memory_space<vmem>>, %arg3: memref<1x64xf32, #tpu.memory_space<vmem>>, %arg4: memref<9x64xf32, #tpu.memory_space<vmem>>, %arg5: memref<1x64xf32, #tpu.memory_space<vmem>>, %arg6: memref<64x128xf32, #tpu.memory_space<vmem>>, %arg7: memref<1x128xf32, #tpu.memory_space<vmem>>, %arg8: memref<1x128xf32, #tpu.memory_space<vmem>>, %arg9: memref<1x16x128xf32, #tpu.memory_space<vmem>>, %arg10: memref<10x10x64xf32, #tpu.memory_space<vmem>>, %arg11: memref<10x10x128xf32, #tpu.memory_space<vmem>>, %arg12: memref<10x128xf32, #tpu.memory_space<vmem>>) attributes {dimension_semantics = [#tpu.dimension_semantics<parallel>], iteration_bounds = array<i64: 2>, scalar_prefetch = 0 : i64, scratch_operands = 3 : i64, tpu.core_type = #tpu.core_type<tc>, window_params = [{transform_indices = @transform_0, window_bounds = array<i64: 1, 64, 128>}, {pipeline_mode = #tpu.pipeline_mode<synchronous>, transform_indices = @transform_1, window_bounds = array<i64: 128, 64>}, {pipeline_mode = #tpu.pipeline_mode<synchronous>, transform_indices = @transform_2, window_bounds = array<i64: 1, 64>}, {pipeline_mode = #tpu.pipeline_mode<synchronous>, transform_indices = @transform_3, window_bounds = array<i64: 9, 64>}, {pipeline_mode = #tpu.pipeline_mode<synchronous>, transform_indices = @transform_4, window_bounds = array<i64: 1, 64>}, {pipeline_mode = #tpu.pipeline_mode<synchronous>, transform_indices = @transform_5, window_bounds = array<i64: 64, 128>}, {pipeline_mode = #tpu.pipeline_mode<synchronous>, transform_indices = @transform_6, window_bounds = array<i64: 1, 128>}, {pipeline_mode = #tpu.pipeline_mode<synchronous>, transform_indices = @transform_7, window_bounds = array<i64: 1, 128>}, {transform_indices = @transform_8, window_bounds = array<i64: 1, 16, 128>}]} {
    %c0 = arith.constant 0 : index
    %c0_0 = arith.constant 0 : index
    %c0_1 = arith.constant 0 : index
    %0 = vector.load %arg1[%c0, %c0_0, %c0_1] : memref<1x64x128xf32, #tpu.memory_space<vmem>>, vector<1x64x128xf32>
    %1 = vector.shape_cast %0 : vector<1x64x128xf32> to vector<64x128xf32>
    %c0_2 = arith.constant 0 : index
    %c0_3 = arith.constant 0 : index
    %2 = vector.load %arg2[%c0_2, %c0_3] : memref<128x64xf32, #tpu.memory_space<vmem>>, vector<128x64xf32>
    %cst = arith.constant dense<0.000000e+00> : vector<64x64xf32>
    %3 = tpu.matmul %1, %2, %cst {dimension_numbers = #tpu.dot_dimension_numbers<[1], [0], [0], [1], [0, 0, 1, 1], [], []>} : vector<64x128xf32>, vector<128x64xf32>, vector<64x64xf32> -> vector<64x64xf32>
    %c0_4 = arith.constant 0 : index
    %c0_5 = arith.constant 0 : index
    %4 = vector.load %arg3[%c0_4, %c0_5] : memref<1x64xf32, #tpu.memory_space<vmem>>, vector<1x64xf32>
    %5 = vector.broadcast %4 : vector<1x64xf32> to vector<64x64xf32>
    %6 = arith.addf %3, %5 : vector<64x64xf32>
    %cst_6 = arith.constant 0.000000e+00 : f32
    %7 = vector.broadcast %cst_6 : f32 to vector<64x64xf32>
    %8 = arith.maximumf %6, %7 : vector<64x64xf32>
    %cst_7 = arith.constant 0.000000e+00 : f32
    %9 = vector.broadcast %cst_7 : f32 to vector<10x10x64xf32>
    %c0_8 = arith.constant 0 : index
    %c0_9 = arith.constant 0 : index
    %c0_10 = arith.constant 0 : index
    %10 = vector.load %arg10[%c0_8, %c0_9, %c0_10] : memref<10x10x64xf32, #tpu.memory_space<vmem>>, vector<10x10x64xf32>
    tpu.vector_store %arg10[%c0_8, %c0_9, %c0_10], %9 {strides = array<i32>} : memref<10x10x64xf32, #tpu.memory_space<vmem>>, vector<10x10x64xf32>,
    %11 = vector.extract_strided_slice %8 {offsets = [0, 0], sizes = [8, 64], strides = [1, 1]} : vector<64x64xf32> to vector<8x64xf32>
    %c1 = arith.constant 1 : index
    %c1_11 = arith.constant 1 : index
    %c0_12 = arith.constant 0 : index
    %12 = vector.load %arg10[%c1, %c1_11, %c0_12] : memref<10x10x64xf32, #tpu.memory_space<vmem>>, vector<1x8x64xf32>
    %13 = vector.shape_cast %12 : vector<1x8x64xf32> to vector<8x64xf32>
    %14 = vector.shape_cast %11 : vector<8x64xf32> to vector<1x8x64xf32>
    tpu.vector_store %arg10[%c1, %c1_11, %c0_12], %14 {strides = array<i32>} : memref<10x10x64xf32, #tpu.memory_space<vmem>>, vector<1x8x64xf32>,
    %15 = vector.extract_strided_slice %8 {offsets = [8, 0], sizes = [8, 64], strides = [1, 1]} : vector<64x64xf32> to vector<8x64xf32>
    %c2 = arith.constant 2 : index
    %c1_13 = arith.constant 1 : index
    %c0_14 = arith.constant 0 : index
    %16 = vector.load %arg10[%c2, %c1_13, %c0_14] : memref<10x10x64xf32, #tpu.memory_space<vmem>>, vector<1x8x64xf32>
    %17 = vector.shape_cast %16 : vector<1x8x64xf32> to vector<8x64xf32>
    %18 = vector.shape_cast %15 : vector<8x64xf32> to vector<1x8x64xf32>
    tpu.vector_store %arg10[%c2, %c1_13, %c0_14], %18 {strides = array<i32>} : memref<10x10x64xf32, #tpu.memory_space<vmem>>, vector<1x8x64xf32>,
    %19 = vector.extract_strided_slice %8 {offsets = [16, 0], sizes = [8, 64], strides = [1, 1]} : vector<64x64xf32> to vector<8x64xf32>
    %c3 = arith.constant 3 : index
    %c1_15 = arith.constant 1 : index
    %c0_16 = arith.constant 0 : index
    %20 = vector.load %arg10[%c3, %c1_15, %c0_16] : memref<10x10x64xf32, #tpu.memory_space<vmem>>, vector<1x8x64xf32>
    %21 = vector.shape_cast %20 : vector<1x8x64xf32> to vector<8x64xf32>
    %22 = vector.shape_cast %19 : vector<8x64xf32> to vector<1x8x64xf32>
    tpu.vector_store %arg10[%c3, %c1_15, %c0_16], %22 {strides = array<i32>} : memref<10x10x64xf32, #tpu.memory_space<vmem>>, vector<1x8x64xf32>,
    %23 = vector.extract_strided_slice %8 {offsets = [24, 0], sizes = [8, 64], strides = [1, 1]} : vector<64x64xf32> to vector<8x64xf32>
    %c4 = arith.constant 4 : index
    %c1_17 = arith.constant 1 : index
    %c0_18 = arith.constant 0 : index
    %24 = vector.load %arg10[%c4, %c1_17, %c0_18] : memref<10x10x64xf32, #tpu.memory_space<vmem>>, vector<1x8x64xf32>
    %25 = vector.shape_cast %24 : vector<1x8x64xf32> to vector<8x64xf32>
    %26 = vector.shape_cast %23 : vector<8x64xf32> to vector<1x8x64xf32>
    tpu.vector_store %arg10[%c4, %c1_17, %c0_18], %26 {strides = array<i32>} : memref<10x10x64xf32, #tpu.memory_space<vmem>>, vector<1x8x64xf32>,
    %27 = vector.extract_strided_slice %8 {offsets = [32, 0], sizes = [8, 64], strides = [1, 1]} : vector<64x64xf32> to vector<8x64xf32>
    %c5 = arith.constant 5 : index
    %c1_19 = arith.constant 1 : index
    %c0_20 = arith.constant 0 : index
    %28 = vector.load %arg10[%c5, %c1_19, %c0_20] : memref<10x10x64xf32, #tpu.memory_space<vmem>>, vector<1x8x64xf32>
    %29 = vector.shape_cast %28 : vector<1x8x64xf32> to vector<8x64xf32>
    %30 = vector.shape_cast %27 : vector<8x64xf32> to vector<1x8x64xf32>
    tpu.vector_store %arg10[%c5, %c1_19, %c0_20], %30 {strides = array<i32>} : memref<10x10x64xf32, #tpu.memory_space<vmem>>, vector<1x8x64xf32>,
    %31 = vector.extract_strided_slice %8 {offsets = [40, 0], sizes = [8, 64], strides = [1, 1]} : vector<64x64xf32> to vector<8x64xf32>
    %c6 = arith.constant 6 : index
    %c1_21 = arith.constant 1 : index
    %c0_22 = arith.constant 0 : index
    %32 = vector.load %arg10[%c6, %c1_21, %c0_22] : memref<10x10x64xf32, #tpu.memory_space<vmem>>, vector<1x8x64xf32>
    %33 = vector.shape_cast %32 : vector<1x8x64xf32> to vector<8x64xf32>
    %34 = vector.shape_cast %31 : vector<8x64xf32> to vector<1x8x64xf32>
    tpu.vector_store %arg10[%c6, %c1_21, %c0_22], %34 {strides = array<i32>} : memref<10x10x64xf32, #tpu.memory_space<vmem>>, vector<1x8x64xf32>,
    %35 = vector.extract_strided_slice %8 {offsets = [48, 0], sizes = [8, 64], strides = [1, 1]} : vector<64x64xf32> to vector<8x64xf32>
    %c7 = arith.constant 7 : index
    %c1_23 = arith.constant 1 : index
    %c0_24 = arith.constant 0 : index
    %36 = vector.load %arg10[%c7, %c1_23, %c0_24] : memref<10x10x64xf32, #tpu.memory_space<vmem>>, vector<1x8x64xf32>
    %37 = vector.shape_cast %36 : vector<1x8x64xf32> to vector<8x64xf32>
    %38 = vector.shape_cast %35 : vector<8x64xf32> to vector<1x8x64xf32>
    tpu.vector_store %arg10[%c7, %c1_23, %c0_24], %38 {strides = array<i32>} : memref<10x10x64xf32, #tpu.memory_space<vmem>>, vector<1x8x64xf32>,
    %39 = vector.extract_strided_slice %8 {offsets = [56, 0], sizes = [8, 64], strides = [1, 1]} : vector<64x64xf32> to vector<8x64xf32>
    %c8 = arith.constant 8 : index
    %c1_25 = arith.constant 1 : index
    %c0_26 = arith.constant 0 : index
    %40 = vector.load %arg10[%c8, %c1_25, %c0_26] : memref<10x10x64xf32, #tpu.memory_space<vmem>>, vector<1x8x64xf32>
    %41 = vector.shape_cast %40 : vector<1x8x64xf32> to vector<8x64xf32>
    %42 = vector.shape_cast %39 : vector<8x64xf32> to vector<1x8x64xf32>
    tpu.vector_store %arg10[%c8, %c1_25, %c0_26], %42 {strides = array<i32>} : memref<10x10x64xf32, #tpu.memory_space<vmem>>, vector<1x8x64xf32>,
    %c0_27 = arith.constant 0 : index
    %c0_28 = arith.constant 0 : index
    %43 = vector.load %arg4[%c0_27, %c0_28] : memref<9x64xf32, #tpu.memory_space<vmem>>, vector<9x64xf32>
    %cst_29 = arith.constant 0.000000e+00 : f32
    %44 = vector.broadcast %cst_29 : f32 to vector<8x8x64xf32>
    %c0_30 = arith.constant 0 : index
    %c0_31 = arith.constant 0 : index
    %c0_32 = arith.constant 0 : index
    %45 = vector.load %arg10[%c0_30, %c0_31, %c0_32] : memref<10x10x64xf32, #tpu.memory_space<vmem>>, vector<8x8x64xf32>
    %46 = vector.extract_strided_slice %43 {offsets = [0, 0], sizes = [1, 64], strides = [1, 1]} : vector<9x64xf32> to vector<1x64xf32>
    %47 = vector.shape_cast %46 : vector<1x64xf32> to vector<64xf32>
    %48 = vector.shape_cast %47 : vector<64xf32> to vector<1x1x64xf32>
    %49 = vector.broadcast %48 : vector<1x1x64xf32> to vector<8x8x64xf32>
    %50 = arith.mulf %45, %49 : vector<8x8x64xf32>
    %51 = arith.addf %44, %50 : vector<8x8x64xf32>
    %c0_33 = arith.constant 0 : index
    %c1_34 = arith.constant 1 : index
    %c0_35 = arith.constant 0 : index
    %52 = vector.load %arg10[%c0_33, %c1_34, %c0_35] : memref<10x10x64xf32, #tpu.memory_space<vmem>>, vector<8x8x64xf32>
    %53 = vector.extract_strided_slice %43 {offsets = [1, 0], sizes = [1, 64], strides = [1, 1]} : vector<9x64xf32> to vector<1x64xf32>
    %54 = vector.shape_cast %53 : vector<1x64xf32> to vector<64xf32>
    %55 = vector.shape_cast %54 : vector<64xf32> to vector<1x1x64xf32>
    %56 = vector.broadcast %55 : vector<1x1x64xf32> to vector<8x8x64xf32>
    %57 = arith.mulf %52, %56 : vector<8x8x64xf32>
    %58 = arith.addf %51, %57 : vector<8x8x64xf32>
    %c0_36 = arith.constant 0 : index
    %c2_37 = arith.constant 2 : index
    %c0_38 = arith.constant 0 : index
    %59 = vector.load %arg10[%c0_36, %c2_37, %c0_38] : memref<10x10x64xf32, #tpu.memory_space<vmem>>, vector<8x8x64xf32>
    %60 = vector.extract_strided_slice %43 {offsets = [2, 0], sizes = [1, 64], strides = [1, 1]} : vector<9x64xf32> to vector<1x64xf32>
    %61 = vector.shape_cast %60 : vector<1x64xf32> to vector<64xf32>
    %62 = vector.shape_cast %61 : vector<64xf32> to vector<1x1x64xf32>
    %63 = vector.broadcast %62 : vector<1x1x64xf32> to vector<8x8x64xf32>
    %64 = arith.mulf %59, %63 : vector<8x8x64xf32>
    %65 = arith.addf %58, %64 : vector<8x8x64xf32>
    %c1_39 = arith.constant 1 : index
    %c0_40 = arith.constant 0 : index
    %c0_41 = arith.constant 0 : index
    %66 = vector.load %arg10[%c1_39, %c0_40, %c0_41] : memref<10x10x64xf32, #tpu.memory_space<vmem>>, vector<8x8x64xf32>
    %67 = vector.extract_strided_slice %43 {offsets = [3, 0], sizes = [1, 64], strides = [1, 1]} : vector<9x64xf32> to vector<1x64xf32>
    %68 = vector.shape_cast %67 : vector<1x64xf32> to vector<64xf32>
    %69 = vector.shape_cast %68 : vector<64xf32> to vector<1x1x64xf32>
    %70 = vector.broadcast %69 : vector<1x1x64xf32> to vector<8x8x64xf32>
    %71 = arith.mulf %66, %70 : vector<8x8x64xf32>
    %72 = arith.addf %65, %71 : vector<8x8x64xf32>
    %c1_42 = arith.constant 1 : index
    %c1_43 = arith.constant 1 : index
    %c0_44 = arith.constant 0 : index
    %73 = vector.load %arg10[%c1_42, %c1_43, %c0_44] : memref<10x10x64xf32, #tpu.memory_space<vmem>>, vector<8x8x64xf32>
    %74 = vector.extract_strided_slice %43 {offsets = [4, 0], sizes = [1, 64], strides = [1, 1]} : vector<9x64xf32> to vector<1x64xf32>
    %75 = vector.shape_cast %74 : vector<1x64xf32> to vector<64xf32>
    %76 = vector.shape_cast %75 : vector<64xf32> to vector<1x1x64xf32>
    %77 = vector.broadcast %76 : vector<1x1x64xf32> to vector<8x8x64xf32>
    %78 = arith.mulf %73, %77 : vector<8x8x64xf32>
    %79 = arith.addf %72, %78 : vector<8x8x64xf32>
    %c1_45 = arith.constant 1 : index
    %c2_46 = arith.constant 2 : index
    %c0_47 = arith.constant 0 : index
    %80 = vector.load %arg10[%c1_45, %c2_46, %c0_47] : memref<10x10x64xf32, #tpu.memory_space<vmem>>, vector<8x8x64xf32>
    %81 = vector.extract_strided_slice %43 {offsets = [5, 0], sizes = [1, 64], strides = [1, 1]} : vector<9x64xf32> to vector<1x64xf32>
    %82 = vector.shape_cast %81 : vector<1x64xf32> to vector<64xf32>
    %83 = vector.shape_cast %82 : vector<64xf32> to vector<1x1x64xf32>
    %84 = vector.broadcast %83 : vector<1x1x64xf32> to vector<8x8x64xf32>
    %85 = arith.mulf %80, %84 : vector<8x8x64xf32>
    %86 = arith.addf %79, %85 : vector<8x8x64xf32>
    %c2_48 = arith.constant 2 : index
    %c0_49 = arith.constant 0 : index
    %c0_50 = arith.constant 0 : index
    %87 = vector.load %arg10[%c2_48, %c0_49, %c0_50] : memref<10x10x64xf32, #tpu.memory_space<vmem>>, vector<8x8x64xf32>
    %88 = vector.extract_strided_slice %43 {offsets = [6, 0], sizes = [1, 64], strides = [1, 1]} : vector<9x64xf32> to vector<1x64xf32>
    %89 = vector.shape_cast %88 : vector<1x64xf32> to vector<64xf32>
    %90 = vector.shape_cast %89 : vector<64xf32> to vector<1x1x64xf32>
    %91 = vector.broadcast %90 : vector<1x1x64xf32> to vector<8x8x64xf32>
    %92 = arith.mulf %87, %91 : vector<8x8x64xf32>
    %93 = arith.addf %86, %92 : vector<8x8x64xf32>
    %c2_51 = arith.constant 2 : index
    %c1_52 = arith.constant 1 : index
    %c0_53 = arith.constant 0 : index
    %94 = vector.load %arg10[%c2_51, %c1_52, %c0_53] : memref<10x10x64xf32, #tpu.memory_space<vmem>>, vector<8x8x64xf32>
    %95 = vector.extract_strided_slice %43 {offsets = [7, 0], sizes = [1, 64], strides = [1, 1]} : vector<9x64xf32> to vector<1x64xf32>
    %96 = vector.shape_cast %95 : vector<1x64xf32> to vector<64xf32>
    %97 = vector.shape_cast %96 : vector<64xf32> to vector<1x1x64xf32>
    %98 = vector.broadcast %97 : vector<1x1x64xf32> to vector<8x8x64xf32>
    %99 = arith.mulf %94, %98 : vector<8x8x64xf32>
    %100 = arith.addf %93, %99 : vector<8x8x64xf32>
    %c2_54 = arith.constant 2 : index
    %c2_55 = arith.constant 2 : index
    %c0_56 = arith.constant 0 : index
    %101 = vector.load %arg10[%c2_54, %c2_55, %c0_56] : memref<10x10x64xf32, #tpu.memory_space<vmem>>, vector<8x8x64xf32>
    %102 = vector.extract_strided_slice %43 {offsets = [8, 0], sizes = [1, 64], strides = [1, 1]} : vector<9x64xf32> to vector<1x64xf32>
    %103 = vector.shape_cast %102 : vector<1x64xf32> to vector<64xf32>
    %104 = vector.shape_cast %103 : vector<64xf32> to vector<1x1x64xf32>
    %105 = vector.broadcast %104 : vector<1x1x64xf32> to vector<8x8x64xf32>
    %106 = arith.mulf %101, %105 : vector<8x8x64xf32>
    %107 = arith.addf %100, %106 : vector<8x8x64xf32>
    %c0_57 = arith.constant 0 : index
    %c0_58 = arith.constant 0 : index
    %108 = vector.load %arg5[%c0_57, %c0_58] : memref<1x64xf32, #tpu.memory_space<vmem>>, vector<1x64xf32>
    %109 = vector.shape_cast %108 : vector<1x64xf32> to vector<1x1x64xf32>
    %110 = vector.broadcast %109 : vector<1x1x64xf32> to vector<8x8x64xf32>
    %111 = arith.addf %107, %110 : vector<8x8x64xf32>
    %c0_59 = arith.constant 0 : index
    %c0_60 = arith.constant 0 : index
    %112 = vector.load %arg6[%c0_59, %c0_60] : memref<64x128xf32, #tpu.memory_space<vmem>>, vector<64x128xf32>
    %c0_61 = arith.constant 0 : index
    %c0_62 = arith.constant 0 : index
    %113 = vector.load %arg7[%c0_61, %c0_62] : memref<1x128xf32, #tpu.memory_space<vmem>>, vector<1x128xf32>
    %c0_63 = arith.constant 0 : index
    %c0_64 = arith.constant 0 : index
    %114 = vector.load %arg8[%c0_63, %c0_64] : memref<1x128xf32, #tpu.memory_space<vmem>>, vector<1x128xf32>
    %cst_65 = arith.constant 0.000000e+00 : f32
    %115 = vector.broadcast %cst_65 : f32 to vector<10x10x128xf32>
    %c0_66 = arith.constant 0 : index
    %c0_67 = arith.constant 0 : index
    %c0_68 = arith.constant 0 : index
    %116 = vector.load %arg11[%c0_66, %c0_67, %c0_68] : memref<10x10x128xf32, #tpu.memory_space<vmem>>, vector<10x10x128xf32>
    tpu.vector_store %arg11[%c0_66, %c0_67, %c0_68], %115 {strides = array<i32>} : memref<10x10x128xf32, #tpu.memory_space<vmem>>, vector<10x10x128xf32>,
    %117 = vector.extract_strided_slice %111 {offsets = [0, 0, 0], sizes = [1, 8, 64], strides = [1, 1, 1]} : vector<8x8x64xf32> to vector<1x8x64xf32>
    %118 = vector.shape_cast %117 : vector<1x8x64xf32> to vector<8x64xf32>
    %cst_69 = arith.constant dense<0.000000e+00> : vector<8x128xf32>
    %119 = tpu.matmul %118, %112, %cst_69 {dimension_numbers = #tpu.dot_dimension_numbers<[1], [0], [0], [1], [0, 0, 1, 1], [], []>} : vector<8x64xf32>, vector<64x128xf32>, vector<8x128xf32> -> vector<8x128xf32>
    %120 = vector.broadcast %113 : vector<1x128xf32> to vector<8x128xf32>
    %121 = arith.addf %119, %120 : vector<8x128xf32>
    %cst_70 = arith.constant 0.000000e+00 : f32
    %122 = vector.broadcast %cst_70 : f32 to vector<8x128xf32>
    %123 = arith.maximumf %121, %122 : vector<8x128xf32>
    %124 = vector.extract_strided_slice %1 {offsets = [0, 0], sizes = [8, 128], strides = [1, 1]} : vector<64x128xf32> to vector<8x128xf32>
    %125 = vector.broadcast %114 : vector<1x128xf32> to vector<8x128xf32>
    %126 = arith.mulf %124, %125 : vector<8x128xf32>
    %127 = arith.addf %123, %126 : vector<8x128xf32>
    %c1_71 = arith.constant 1 : index
    %c1_72 = arith.constant 1 : index
    %c0_73 = arith.constant 0 : index
    %128 = vector.load %arg11[%c1_71, %c1_72, %c0_73] : memref<10x10x128xf32, #tpu.memory_space<vmem>>, vector<1x8x128xf32>
    %129 = vector.shape_cast %128 : vector<1x8x128xf32> to vector<8x128xf32>
    %130 = vector.shape_cast %127 : vector<8x128xf32> to vector<1x8x128xf32>
    tpu.vector_store %arg11[%c1_71, %c1_72, %c0_73], %130 {strides = array<i32>} : memref<10x10x128xf32, #tpu.memory_space<vmem>>, vector<1x8x128xf32>,
    %131 = vector.extract_strided_slice %111 {offsets = [1, 0, 0], sizes = [1, 8, 64], strides = [1, 1, 1]} : vector<8x8x64xf32> to vector<1x8x64xf32>
    %132 = vector.shape_cast %131 : vector<1x8x64xf32> to vector<8x64xf32>
    %cst_74 = arith.constant dense<0.000000e+00> : vector<8x128xf32>
    %133 = tpu.matmul %132, %112, %cst_74 {dimension_numbers = #tpu.dot_dimension_numbers<[1], [0], [0], [1], [0, 0, 1, 1], [], []>} : vector<8x64xf32>, vector<64x128xf32>, vector<8x128xf32> -> vector<8x128xf32>
    %134 = vector.broadcast %113 : vector<1x128xf32> to vector<8x128xf32>
    %135 = arith.addf %133, %134 : vector<8x128xf32>
    %cst_75 = arith.constant 0.000000e+00 : f32
    %136 = vector.broadcast %cst_75 : f32 to vector<8x128xf32>
    %137 = arith.maximumf %135, %136 : vector<8x128xf32>
    %138 = vector.extract_strided_slice %1 {offsets = [8, 0], sizes = [8, 128], strides = [1, 1]} : vector<64x128xf32> to vector<8x128xf32>
    %139 = vector.broadcast %114 : vector<1x128xf32> to vector<8x128xf32>
    %140 = arith.mulf %138, %139 : vector<8x128xf32>
    %141 = arith.addf %137, %140 : vector<8x128xf32>
    %c2_76 = arith.constant 2 : index
    %c1_77 = arith.constant 1 : index
    %c0_78 = arith.constant 0 : index
    %142 = vector.load %arg11[%c2_76, %c1_77, %c0_78] : memref<10x10x128xf32, #tpu.memory_space<vmem>>, vector<1x8x128xf32>
    %143 = vector.shape_cast %142 : vector<1x8x128xf32> to vector<8x128xf32>
    %144 = vector.shape_cast %141 : vector<8x128xf32> to vector<1x8x128xf32>
    tpu.vector_store %arg11[%c2_76, %c1_77, %c0_78], %144 {strides = array<i32>} : memref<10x10x128xf32, #tpu.memory_space<vmem>>, vector<1x8x128xf32>,
    %145 = vector.extract_strided_slice %111 {offsets = [2, 0, 0], sizes = [1, 8, 64], strides = [1, 1, 1]} : vector<8x8x64xf32> to vector<1x8x64xf32>
    %146 = vector.shape_cast %145 : vector<1x8x64xf32> to vector<8x64xf32>
    %cst_79 = arith.constant dense<0.000000e+00> : vector<8x128xf32>
    %147 = tpu.matmul %146, %112, %cst_79 {dimension_numbers = #tpu.dot_dimension_numbers<[1], [0], [0], [1], [0, 0, 1, 1], [], []>} : vector<8x64xf32>, vector<64x128xf32>, vector<8x128xf32> -> vector<8x128xf32>
    %148 = vector.broadcast %113 : vector<1x128xf32> to vector<8x128xf32>
    %149 = arith.addf %147, %148 : vector<8x128xf32>
    %cst_80 = arith.constant 0.000000e+00 : f32
    %150 = vector.broadcast %cst_80 : f32 to vector<8x128xf32>
    %151 = arith.maximumf %149, %150 : vector<8x128xf32>
    %152 = vector.extract_strided_slice %1 {offsets = [16, 0], sizes = [8, 128], strides = [1, 1]} : vector<64x128xf32> to vector<8x128xf32>
    %153 = vector.broadcast %114 : vector<1x128xf32> to vector<8x128xf32>
    %154 = arith.mulf %152, %153 : vector<8x128xf32>
    %155 = arith.addf %151, %154 : vector<8x128xf32>
    %c3_81 = arith.constant 3 : index
    %c1_82 = arith.constant 1 : index
    %c0_83 = arith.constant 0 : index
    %156 = vector.load %arg11[%c3_81, %c1_82, %c0_83] : memref<10x10x128xf32, #tpu.memory_space<vmem>>, vector<1x8x128xf32>
    %157 = vector.shape_cast %156 : vector<1x8x128xf32> to vector<8x128xf32>
    %158 = vector.shape_cast %155 : vector<8x128xf32> to vector<1x8x128xf32>
    tpu.vector_store %arg11[%c3_81, %c1_82, %c0_83], %158 {strides = array<i32>} : memref<10x10x128xf32, #tpu.memory_space<vmem>>, vector<1x8x128xf32>,
    %159 = vector.extract_strided_slice %111 {offsets = [3, 0, 0], sizes = [1, 8, 64], strides = [1, 1, 1]} : vector<8x8x64xf32> to vector<1x8x64xf32>
    %160 = vector.shape_cast %159 : vector<1x8x64xf32> to vector<8x64xf32>
    %cst_84 = arith.constant dense<0.000000e+00> : vector<8x128xf32>
    %161 = tpu.matmul %160, %112, %cst_84 {dimension_numbers = #tpu.dot_dimension_numbers<[1], [0], [0], [1], [0, 0, 1, 1], [], []>} : vector<8x64xf32>, vector<64x128xf32>, vector<8x128xf32> -> vector<8x128xf32>
    %162 = vector.broadcast %113 : vector<1x128xf32> to vector<8x128xf32>
    %163 = arith.addf %161, %162 : vector<8x128xf32>
    %cst_85 = arith.constant 0.000000e+00 : f32
    %164 = vector.broadcast %cst_85 : f32 to vector<8x128xf32>
    %165 = arith.maximumf %163, %164 : vector<8x128xf32>
    %166 = vector.extract_strided_slice %1 {offsets = [24, 0], sizes = [8, 128], strides = [1, 1]} : vector<64x128xf32> to vector<8x128xf32>
    %167 = vector.broadcast %114 : vector<1x128xf32> to vector<8x128xf32>
    %168 = arith.mulf %166, %167 : vector<8x128xf32>
    %169 = arith.addf %165, %168 : vector<8x128xf32>
    %c4_86 = arith.constant 4 : index
    %c1_87 = arith.constant 1 : index
    %c0_88 = arith.constant 0 : index
    %170 = vector.load %arg11[%c4_86, %c1_87, %c0_88] : memref<10x10x128xf32, #tpu.memory_space<vmem>>, vector<1x8x128xf32>
    %171 = vector.shape_cast %170 : vector<1x8x128xf32> to vector<8x128xf32>
    %172 = vector.shape_cast %169 : vector<8x128xf32> to vector<1x8x128xf32>
    tpu.vector_store %arg11[%c4_86, %c1_87, %c0_88], %172 {strides = array<i32>} : memref<10x10x128xf32, #tpu.memory_space<vmem>>, vector<1x8x128xf32>,
    %173 = vector.extract_strided_slice %111 {offsets = [4, 0, 0], sizes = [1, 8, 64], strides = [1, 1, 1]} : vector<8x8x64xf32> to vector<1x8x64xf32>
    %174 = vector.shape_cast %173 : vector<1x8x64xf32> to vector<8x64xf32>
    %cst_89 = arith.constant dense<0.000000e+00> : vector<8x128xf32>
    %175 = tpu.matmul %174, %112, %cst_89 {dimension_numbers = #tpu.dot_dimension_numbers<[1], [0], [0], [1], [0, 0, 1, 1], [], []>} : vector<8x64xf32>, vector<64x128xf32>, vector<8x128xf32> -> vector<8x128xf32>
    %176 = vector.broadcast %113 : vector<1x128xf32> to vector<8x128xf32>
    %177 = arith.addf %175, %176 : vector<8x128xf32>
    %cst_90 = arith.constant 0.000000e+00 : f32
    %178 = vector.broadcast %cst_90 : f32 to vector<8x128xf32>
    %179 = arith.maximumf %177, %178 : vector<8x128xf32>
    %180 = vector.extract_strided_slice %1 {offsets = [32, 0], sizes = [8, 128], strides = [1, 1]} : vector<64x128xf32> to vector<8x128xf32>
    %181 = vector.broadcast %114 : vector<1x128xf32> to vector<8x128xf32>
    %182 = arith.mulf %180, %181 : vector<8x128xf32>
    %183 = arith.addf %179, %182 : vector<8x128xf32>
    %c5_91 = arith.constant 5 : index
    %c1_92 = arith.constant 1 : index
    %c0_93 = arith.constant 0 : index
    %184 = vector.load %arg11[%c5_91, %c1_92, %c0_93] : memref<10x10x128xf32, #tpu.memory_space<vmem>>, vector<1x8x128xf32>
    %185 = vector.shape_cast %184 : vector<1x8x128xf32> to vector<8x128xf32>
    %186 = vector.shape_cast %183 : vector<8x128xf32> to vector<1x8x128xf32>
    tpu.vector_store %arg11[%c5_91, %c1_92, %c0_93], %186 {strides = array<i32>} : memref<10x10x128xf32, #tpu.memory_space<vmem>>, vector<1x8x128xf32>,
    %187 = vector.extract_strided_slice %111 {offsets = [5, 0, 0], sizes = [1, 8, 64], strides = [1, 1, 1]} : vector<8x8x64xf32> to vector<1x8x64xf32>
    %188 = vector.shape_cast %187 : vector<1x8x64xf32> to vector<8x64xf32>
    %cst_94 = arith.constant dense<0.000000e+00> : vector<8x128xf32>
    %189 = tpu.matmul %188, %112, %cst_94 {dimension_numbers = #tpu.dot_dimension_numbers<[1], [0], [0], [1], [0, 0, 1, 1], [], []>} : vector<8x64xf32>, vector<64x128xf32>, vector<8x128xf32> -> vector<8x128xf32>
    %190 = vector.broadcast %113 : vector<1x128xf32> to vector<8x128xf32>
    %191 = arith.addf %189, %190 : vector<8x128xf32>
    %cst_95 = arith.constant 0.000000e+00 : f32
    %192 = vector.broadcast %cst_95 : f32 to vector<8x128xf32>
    %193 = arith.maximumf %191, %192 : vector<8x128xf32>
    %194 = vector.extract_strided_slice %1 {offsets = [40, 0], sizes = [8, 128], strides = [1, 1]} : vector<64x128xf32> to vector<8x128xf32>
    %195 = vector.broadcast %114 : vector<1x128xf32> to vector<8x128xf32>
    %196 = arith.mulf %194, %195 : vector<8x128xf32>
    %197 = arith.addf %193, %196 : vector<8x128xf32>
    %c6_96 = arith.constant 6 : index
    %c1_97 = arith.constant 1 : index
    %c0_98 = arith.constant 0 : index
    %198 = vector.load %arg11[%c6_96, %c1_97, %c0_98] : memref<10x10x128xf32, #tpu.memory_space<vmem>>, vector<1x8x128xf32>
    %199 = vector.shape_cast %198 : vector<1x8x128xf32> to vector<8x128xf32>
    %200 = vector.shape_cast %197 : vector<8x128xf32> to vector<1x8x128xf32>
    tpu.vector_store %arg11[%c6_96, %c1_97, %c0_98], %200 {strides = array<i32>} : memref<10x10x128xf32, #tpu.memory_space<vmem>>, vector<1x8x128xf32>,
    %201 = vector.extract_strided_slice %111 {offsets = [6, 0, 0], sizes = [1, 8, 64], strides = [1, 1, 1]} : vector<8x8x64xf32> to vector<1x8x64xf32>
    %202 = vector.shape_cast %201 : vector<1x8x64xf32> to vector<8x64xf32>
    %cst_99 = arith.constant dense<0.000000e+00> : vector<8x128xf32>
    %203 = tpu.matmul %202, %112, %cst_99 {dimension_numbers = #tpu.dot_dimension_numbers<[1], [0], [0], [1], [0, 0, 1, 1], [], []>} : vector<8x64xf32>, vector<64x128xf32>, vector<8x128xf32> -> vector<8x128xf32>
    %204 = vector.broadcast %113 : vector<1x128xf32> to vector<8x128xf32>
    %205 = arith.addf %203, %204 : vector<8x128xf32>
    %cst_100 = arith.constant 0.000000e+00 : f32
    %206 = vector.broadcast %cst_100 : f32 to vector<8x128xf32>
    %207 = arith.maximumf %205, %206 : vector<8x128xf32>
    %208 = vector.extract_strided_slice %1 {offsets = [48, 0], sizes = [8, 128], strides = [1, 1]} : vector<64x128xf32> to vector<8x128xf32>
    %209 = vector.broadcast %114 : vector<1x128xf32> to vector<8x128xf32>
    %210 = arith.mulf %208, %209 : vector<8x128xf32>
    %211 = arith.addf %207, %210 : vector<8x128xf32>
    %c7_101 = arith.constant 7 : index
    %c1_102 = arith.constant 1 : index
    %c0_103 = arith.constant 0 : index
    %212 = vector.load %arg11[%c7_101, %c1_102, %c0_103] : memref<10x10x128xf32, #tpu.memory_space<vmem>>, vector<1x8x128xf32>
    %213 = vector.shape_cast %212 : vector<1x8x128xf32> to vector<8x128xf32>
    %214 = vector.shape_cast %211 : vector<8x128xf32> to vector<1x8x128xf32>
    tpu.vector_store %arg11[%c7_101, %c1_102, %c0_103], %214 {strides = array<i32>} : memref<10x10x128xf32, #tpu.memory_space<vmem>>, vector<1x8x128xf32>,
    %215 = vector.extract_strided_slice %111 {offsets = [7, 0, 0], sizes = [1, 8, 64], strides = [1, 1, 1]} : vector<8x8x64xf32> to vector<1x8x64xf32>
    %216 = vector.shape_cast %215 : vector<1x8x64xf32> to vector<8x64xf32>
    %cst_104 = arith.constant dense<0.000000e+00> : vector<8x128xf32>
    %217 = tpu.matmul %216, %112, %cst_104 {dimension_numbers = #tpu.dot_dimension_numbers<[1], [0], [0], [1], [0, 0, 1, 1], [], []>} : vector<8x64xf32>, vector<64x128xf32>, vector<8x128xf32> -> vector<8x128xf32>
    %218 = vector.broadcast %113 : vector<1x128xf32> to vector<8x128xf32>
    %219 = arith.addf %217, %218 : vector<8x128xf32>
    %cst_105 = arith.constant 0.000000e+00 : f32
    %220 = vector.broadcast %cst_105 : f32 to vector<8x128xf32>
    %221 = arith.maximumf %219, %220 : vector<8x128xf32>
    %222 = vector.extract_strided_slice %1 {offsets = [56, 0], sizes = [8, 128], strides = [1, 1]} : vector<64x128xf32> to vector<8x128xf32>
    %223 = vector.broadcast %114 : vector<1x128xf32> to vector<8x128xf32>
    %224 = arith.mulf %222, %223 : vector<8x128xf32>
    %225 = arith.addf %221, %224 : vector<8x128xf32>
    %c8_106 = arith.constant 8 : index
    %c1_107 = arith.constant 1 : index
    %c0_108 = arith.constant 0 : index
    %226 = vector.load %arg11[%c8_106, %c1_107, %c0_108] : memref<10x10x128xf32, #tpu.memory_space<vmem>>, vector<1x8x128xf32>
    %227 = vector.shape_cast %226 : vector<1x8x128xf32> to vector<8x128xf32>
    %228 = vector.shape_cast %225 : vector<8x128xf32> to vector<1x8x128xf32>
    tpu.vector_store %arg11[%c8_106, %c1_107, %c0_108], %228 {strides = array<i32>} : memref<10x10x128xf32, #tpu.memory_space<vmem>>, vector<1x8x128xf32>,
    %c0_109 = arith.constant 0 : index
    %c0_110 = arith.constant 0 : index
    %c0_111 = arith.constant 0 : index
    %229 = vector.load %arg11[%c0_109, %c0_110, %c0_111] : memref<10x10x128xf32, #tpu.memory_space<vmem>>, vector<1x10x128xf32>
    %230 = vector.shape_cast %229 : vector<1x10x128xf32> to vector<10x128xf32>
    %c1_112 = arith.constant 1 : index
    %c0_113 = arith.constant 0 : index
    %c0_114 = arith.constant 0 : index
    %231 = vector.load %arg11[%c1_112, %c0_113, %c0_114] : memref<10x10x128xf32, #tpu.memory_space<vmem>>, vector<1x10x128xf32>
    %232 = vector.shape_cast %231 : vector<1x10x128xf32> to vector<10x128xf32>
    %233 = arith.maximumf %230, %232 : vector<10x128xf32>
    %c2_115 = arith.constant 2 : index
    %c0_116 = arith.constant 0 : index
    %c0_117 = arith.constant 0 : index
    %234 = vector.load %arg11[%c2_115, %c0_116, %c0_117] : memref<10x10x128xf32, #tpu.memory_space<vmem>>, vector<1x10x128xf32>
    %235 = vector.shape_cast %234 : vector<1x10x128xf32> to vector<10x128xf32>
    %236 = arith.maximumf %233, %235 : vector<10x128xf32>
    %c0_118 = arith.constant 0 : index
    %c0_119 = arith.constant 0 : index
    %237 = vector.load %arg12[%c0_118, %c0_119] : memref<10x128xf32, #tpu.memory_space<vmem>>, vector<10x128xf32>
    tpu.vector_store %arg12[%c0_118, %c0_119], %236 {strides = array<i32>} : memref<10x128xf32, #tpu.memory_space<vmem>>, vector<10x128xf32>,
    %c0_120 = arith.constant 0 : index
    %c0_121 = arith.constant 0 : index
    %238 = tpu.strided_load %arg12[%c0_120, %c0_121] {strides = array<i32: 2, 1>} : memref<10x128xf32, #tpu.memory_space<vmem>>, vector<4x128xf32>
    %c1_122 = arith.constant 1 : index
    %c0_123 = arith.constant 0 : index
    %239 = tpu.strided_load %arg12[%c1_122, %c0_123] {strides = array<i32: 2, 1>} : memref<10x128xf32, #tpu.memory_space<vmem>>, vector<4x128xf32>
    %240 = arith.maximumf %238, %239 : vector<4x128xf32>
    %c2_124 = arith.constant 2 : index
    %c0_125 = arith.constant 0 : index
    %241 = tpu.strided_load %arg12[%c2_124, %c0_125] {strides = array<i32: 2, 1>} : memref<10x128xf32, #tpu.memory_space<vmem>>, vector<4x128xf32>
    %242 = arith.maximumf %240, %241 : vector<4x128xf32>
    %c0_126 = arith.constant 0 : index
    %c0_127 = arith.constant 0 : index
    %c0_128 = arith.constant 0 : index
    %243 = vector.load %arg9[%c0_126, %c0_127, %c0_128] : memref<1x16x128xf32, #tpu.memory_space<vmem>>, vector<1x4x128xf32>
    %244 = vector.shape_cast %243 : vector<1x4x128xf32> to vector<4x128xf32>
    %245 = vector.shape_cast %242 : vector<4x128xf32> to vector<1x4x128xf32>
    tpu.vector_store %arg9[%c0_126, %c0_127, %c0_128], %245 {strides = array<i32>} : memref<1x16x128xf32, #tpu.memory_space<vmem>>, vector<1x4x128xf32>,
    %c2_129 = arith.constant 2 : index
    %c0_130 = arith.constant 0 : index
    %c0_131 = arith.constant 0 : index
    %246 = vector.load %arg11[%c2_129, %c0_130, %c0_131] : memref<10x10x128xf32, #tpu.memory_space<vmem>>, vector<1x10x128xf32>
    %247 = vector.shape_cast %246 : vector<1x10x128xf32> to vector<10x128xf32>
    %c3_132 = arith.constant 3 : index
    %c0_133 = arith.constant 0 : index
    %c0_134 = arith.constant 0 : index
    %248 = vector.load %arg11[%c3_132, %c0_133, %c0_134] : memref<10x10x128xf32, #tpu.memory_space<vmem>>, vector<1x10x128xf32>
    %249 = vector.shape_cast %248 : vector<1x10x128xf32> to vector<10x128xf32>
    %250 = arith.maximumf %247, %249 : vector<10x128xf32>
    %c4_135 = arith.constant 4 : index
    %c0_136 = arith.constant 0 : index
    %c0_137 = arith.constant 0 : index
    %251 = vector.load %arg11[%c4_135, %c0_136, %c0_137] : memref<10x10x128xf32, #tpu.memory_space<vmem>>, vector<1x10x128xf32>
    %252 = vector.shape_cast %251 : vector<1x10x128xf32> to vector<10x128xf32>
    %253 = arith.maximumf %250, %252 : vector<10x128xf32>
    %c0_138 = arith.constant 0 : index
    %c0_139 = arith.constant 0 : index
    %254 = vector.load %arg12[%c0_138, %c0_139] : memref<10x128xf32, #tpu.memory_space<vmem>>, vector<10x128xf32>
    tpu.vector_store %arg12[%c0_138, %c0_139], %253 {strides = array<i32>} : memref<10x128xf32, #tpu.memory_space<vmem>>, vector<10x128xf32>,
    %c0_140 = arith.constant 0 : index
    %c0_141 = arith.constant 0 : index
    %255 = tpu.strided_load %arg12[%c0_140, %c0_141] {strides = array<i32: 2, 1>} : memref<10x128xf32, #tpu.memory_space<vmem>>, vector<4x128xf32>
    %c1_142 = arith.constant 1 : index
    %c0_143 = arith.constant 0 : index
    %256 = tpu.strided_load %arg12[%c1_142, %c0_143] {strides = array<i32: 2, 1>} : memref<10x128xf32, #tpu.memory_space<vmem>>, vector<4x128xf32>
    %257 = arith.maximumf %255, %256 : vector<4x128xf32>
    %c2_144 = arith.constant 2 : index
    %c0_145 = arith.constant 0 : index
    %258 = tpu.strided_load %arg12[%c2_144, %c0_145] {strides = array<i32: 2, 1>} : memref<10x128xf32, #tpu.memory_space<vmem>>, vector<4x128xf32>
    %259 = arith.maximumf %257, %258 : vector<4x128xf32>
    %c0_146 = arith.constant 0 : index
    %c4_147 = arith.constant 4 : index
    %c0_148 = arith.constant 0 : index
    %260 = vector.load %arg9[%c0_146, %c4_147, %c0_148] : memref<1x16x128xf32, #tpu.memory_space<vmem>>, vector<1x4x128xf32>
    %261 = vector.shape_cast %260 : vector<1x4x128xf32> to vector<4x128xf32>
    %262 = vector.shape_cast %259 : vector<4x128xf32> to vector<1x4x128xf32>
    tpu.vector_store %arg9[%c0_146, %c4_147, %c0_148], %262 {strides = array<i32>} : memref<1x16x128xf32, #tpu.memory_space<vmem>>, vector<1x4x128xf32>,
    %c4_149 = arith.constant 4 : index
    %c0_150 = arith.constant 0 : index
    %c0_151 = arith.constant 0 : index
    %263 = vector.load %arg11[%c4_149, %c0_150, %c0_151] : memref<10x10x128xf32, #tpu.memory_space<vmem>>, vector<1x10x128xf32>
    %264 = vector.shape_cast %263 : vector<1x10x128xf32> to vector<10x128xf32>
    %c5_152 = arith.constant 5 : index
    %c0_153 = arith.constant 0 : index
    %c0_154 = arith.constant 0 : index
    %265 = vector.load %arg11[%c5_152, %c0_153, %c0_154] : memref<10x10x128xf32, #tpu.memory_space<vmem>>, vector<1x10x128xf32>
    %266 = vector.shape_cast %265 : vector<1x10x128xf32> to vector<10x128xf32>
    %267 = arith.maximumf %264, %266 : vector<10x128xf32>
    %c6_155 = arith.constant 6 : index
    %c0_156 = arith.constant 0 : index
    %c0_157 = arith.constant 0 : index
    %268 = vector.load %arg11[%c6_155, %c0_156, %c0_157] : memref<10x10x128xf32, #tpu.memory_space<vmem>>, vector<1x10x128xf32>
    %269 = vector.shape_cast %268 : vector<1x10x128xf32> to vector<10x128xf32>
    %270 = arith.maximumf %267, %269 : vector<10x128xf32>
    %c0_158 = arith.constant 0 : index
    %c0_159 = arith.constant 0 : index
    %271 = vector.load %arg12[%c0_158, %c0_159] : memref<10x128xf32, #tpu.memory_space<vmem>>, vector<10x128xf32>
    tpu.vector_store %arg12[%c0_158, %c0_159], %270 {strides = array<i32>} : memref<10x128xf32, #tpu.memory_space<vmem>>, vector<10x128xf32>,
    %c0_160 = arith.constant 0 : index
    %c0_161 = arith.constant 0 : index
    %272 = tpu.strided_load %arg12[%c0_160, %c0_161] {strides = array<i32: 2, 1>} : memref<10x128xf32, #tpu.memory_space<vmem>>, vector<4x128xf32>
    %c1_162 = arith.constant 1 : index
    %c0_163 = arith.constant 0 : index
    %273 = tpu.strided_load %arg12[%c1_162, %c0_163] {strides = array<i32: 2, 1>} : memref<10x128xf32, #tpu.memory_space<vmem>>, vector<4x128xf32>
    %274 = arith.maximumf %272, %273 : vector<4x128xf32>
    %c2_164 = arith.constant 2 : index
    %c0_165 = arith.constant 0 : index
    %275 = tpu.strided_load %arg12[%c2_164, %c0_165] {strides = array<i32: 2, 1>} : memref<10x128xf32, #tpu.memory_space<vmem>>, vector<4x128xf32>
    %276 = arith.maximumf %274, %275 : vector<4x128xf32>
    %c0_166 = arith.constant 0 : index
    %c8_167 = arith.constant 8 : index
    %c0_168 = arith.constant 0 : index
    %277 = vector.load %arg9[%c0_166, %c8_167, %c0_168] : memref<1x16x128xf32, #tpu.memory_space<vmem>>, vector<1x4x128xf32>
    %278 = vector.shape_cast %277 : vector<1x4x128xf32> to vector<4x128xf32>
    %279 = vector.shape_cast %276 : vector<4x128xf32> to vector<1x4x128xf32>
    tpu.vector_store %arg9[%c0_166, %c8_167, %c0_168], %279 {strides = array<i32>} : memref<1x16x128xf32, #tpu.memory_space<vmem>>, vector<1x4x128xf32>,
    %c6_169 = arith.constant 6 : index
    %c0_170 = arith.constant 0 : index
    %c0_171 = arith.constant 0 : index
    %280 = vector.load %arg11[%c6_169, %c0_170, %c0_171] : memref<10x10x128xf32, #tpu.memory_space<vmem>>, vector<1x10x128xf32>
    %281 = vector.shape_cast %280 : vector<1x10x128xf32> to vector<10x128xf32>
    %c7_172 = arith.constant 7 : index
    %c0_173 = arith.constant 0 : index
    %c0_174 = arith.constant 0 : index
    %282 = vector.load %arg11[%c7_172, %c0_173, %c0_174] : memref<10x10x128xf32, #tpu.memory_space<vmem>>, vector<1x10x128xf32>
    %283 = vector.shape_cast %282 : vector<1x10x128xf32> to vector<10x128xf32>
    %284 = arith.maximumf %281, %283 : vector<10x128xf32>
    %c8_175 = arith.constant 8 : index
    %c0_176 = arith.constant 0 : index
    %c0_177 = arith.constant 0 : index
    %285 = vector.load %arg11[%c8_175, %c0_176, %c0_177] : memref<10x10x128xf32, #tpu.memory_space<vmem>>, vector<1x10x128xf32>
    %286 = vector.shape_cast %285 : vector<1x10x128xf32> to vector<10x128xf32>
    %287 = arith.maximumf %284, %286 : vector<10x128xf32>
    %c0_178 = arith.constant 0 : index
    %c0_179 = arith.constant 0 : index
    %288 = vector.load %arg12[%c0_178, %c0_179] : memref<10x128xf32, #tpu.memory_space<vmem>>, vector<10x128xf32>
    tpu.vector_store %arg12[%c0_178, %c0_179], %287 {strides = array<i32>} : memref<10x128xf32, #tpu.memory_space<vmem>>, vector<10x128xf32>,
    %c0_180 = arith.constant 0 : index
    %c0_181 = arith.constant 0 : index
    %289 = tpu.strided_load %arg12[%c0_180, %c0_181] {strides = array<i32: 2, 1>} : memref<10x128xf32, #tpu.memory_space<vmem>>, vector<4x128xf32>
    %c1_182 = arith.constant 1 : index
    %c0_183 = arith.constant 0 : index
    %290 = tpu.strided_load %arg12[%c1_182, %c0_183] {strides = array<i32: 2, 1>} : memref<10x128xf32, #tpu.memory_space<vmem>>, vector<4x128xf32>
    %291 = arith.maximumf %289, %290 : vector<4x128xf32>
    %c2_184 = arith.constant 2 : index
    %c0_185 = arith.constant 0 : index
    %292 = tpu.strided_load %arg12[%c2_184, %c0_185] {strides = array<i32: 2, 1>} : memref<10x128xf32, #tpu.memory_space<vmem>>, vector<4x128xf32>
    %293 = arith.maximumf %291, %292 : vector<4x128xf32>
    %c0_186 = arith.constant 0 : index
    %c12 = arith.constant 12 : index
    %c0_187 = arith.constant 0 : index
    %294 = vector.load %arg9[%c0_186, %c12, %c0_187] : memref<1x16x128xf32, #tpu.memory_space<vmem>>, vector<1x4x128xf32>
    %295 = vector.shape_cast %294 : vector<1x4x128xf32> to vector<4x128xf32>
    %296 = vector.shape_cast %293 : vector<4x128xf32> to vector<1x4x128xf32>
    tpu.vector_store %arg9[%c0_186, %c12, %c0_187], %296 {strides = array<i32>} : memref<1x16x128xf32, #tpu.memory_space<vmem>>, vector<1x4x128xf32>,
    return
  }
  func.func @transform_0(%arg0: i32) -> (i32, i32, i32) {
    %c0_i32 = arith.constant 0 : i32
    %c0_i32_0 = arith.constant 0 : i32
    %c0_i32_1 = arith.constant 0 : i32
    return %arg0, %c0_i32, %c0_i32_0 : i32, i32, i32
  }
  func.func @transform_1(%arg0: i32) -> (i32, i32) {
    %c0_i32 = arith.constant 0 : i32
    %c0_i32_0 = arith.constant 0 : i32
    %c0_i32_1 = arith.constant 0 : i32
    return %c0_i32, %c0_i32_0 : i32, i32
  }
  func.func @transform_2(%arg0: i32) -> (i32, i32) {
    %c0_i32 = arith.constant 0 : i32
    %c0_i32_0 = arith.constant 0 : i32
    %c0_i32_1 = arith.constant 0 : i32
    return %c0_i32, %c0_i32_0 : i32, i32
  }
  func.func @transform_3(%arg0: i32) -> (i32, i32) {
    %c0_i32 = arith.constant 0 : i32
    %c0_i32_0 = arith.constant 0 : i32
    %c0_i32_1 = arith.constant 0 : i32
    return %c0_i32, %c0_i32_0 : i32, i32
  }
  func.func @transform_4(%arg0: i32) -> (i32, i32) {
    %c0_i32 = arith.constant 0 : i32
    %c0_i32_0 = arith.constant 0 : i32
    %c0_i32_1 = arith.constant 0 : i32
    return %c0_i32, %c0_i32_0 : i32, i32
  }
  func.func @transform_5(%arg0: i32) -> (i32, i32) {
    %c0_i32 = arith.constant 0 : i32
    %c0_i32_0 = arith.constant 0 : i32
    %c0_i32_1 = arith.constant 0 : i32
    return %c0_i32, %c0_i32_0 : i32, i32
  }
  func.func @transform_6(%arg0: i32) -> (i32, i32) {
    %c0_i32 = arith.constant 0 : i32
    %c0_i32_0 = arith.constant 0 : i32
    %c0_i32_1 = arith.constant 0 : i32
    return %c0_i32, %c0_i32_0 : i32, i32
  }
  func.func @transform_7(%arg0: i32) -> (i32, i32) {
    %c0_i32 = arith.constant 0 : i32
    %c0_i32_0 = arith.constant 0 : i32
    %c0_i32_1 = arith.constant 0 : i32
    return %c0_i32, %c0_i32_0 : i32, i32
  }
  func.func @transform_8(%arg0: i32) -> (i32, i32, i32) {
    %c0_i32 = arith.constant 0 : i32
    %c0_i32_0 = arith.constant 0 : i32
    %c0_i32_1 = arith.constant 0 : i32
    return %arg0, %c0_i32, %c0_i32_0 : i32, i32, i32
  }
}

module attributes {stable_mosaic.version = 11 : i64} {
  func.func @_head_kernel(%arg0: memref<2x4x128xf32, #tpu.memory_space<vmem>>, %arg1: memref<128x20xf32, #tpu.memory_space<vmem>>, %arg2: memref<1x20xf32, #tpu.memory_space<vmem>>, %arg3: memref<20x10xf32, #tpu.memory_space<vmem>>, %arg4: memref<1x10xf32, #tpu.memory_space<vmem>>, %arg5: memref<2x20xf32, #tpu.memory_space<vmem>>, %arg6: memref<2x10xf32, #tpu.memory_space<vmem>>) attributes {dimension_semantics = [], scalar_prefetch = 0 : i64, scratch_operands = 0 : i64, tpu.core_type = #tpu.core_type<tc>} {
    %c0 = arith.constant 0 : index
    %c0_0 = arith.constant 0 : index
    %c0_1 = arith.constant 0 : index
    %0 = vector.load %arg0[%c0, %c0_0, %c0_1] : memref<2x4x128xf32, #tpu.memory_space<vmem>>, vector<2x4x128xf32>
    %cst = arith.constant dense<0.000000e+00> : vector<2x128xf32>
    %1 = vector.multi_reduction <add>, %0, %cst [1] : vector<2x4x128xf32> to vector<2x128xf32>
    %cst_2 = arith.constant 2.500000e-01 : f32
    %2 = vector.broadcast %cst_2 : f32 to vector<2x128xf32>
    %3 = arith.mulf %1, %2 : vector<2x128xf32>
    %c0_3 = arith.constant 0 : index
    %c0_4 = arith.constant 0 : index
    %4 = vector.load %arg1[%c0_3, %c0_4] : memref<128x20xf32, #tpu.memory_space<vmem>>, vector<128x20xf32>
    %cst_5 = arith.constant dense<0.000000e+00> : vector<2x20xf32>
    %5 = tpu.matmul %3, %4, %cst_5 {dimension_numbers = #tpu.dot_dimension_numbers<[1], [0], [0], [1], [0, 0, 1, 1], [], []>} : vector<2x128xf32>, vector<128x20xf32>, vector<2x20xf32> -> vector<2x20xf32>
    %c0_6 = arith.constant 0 : index
    %c0_7 = arith.constant 0 : index
    %6 = vector.load %arg2[%c0_6, %c0_7] : memref<1x20xf32, #tpu.memory_space<vmem>>, vector<1x20xf32>
    %7 = vector.broadcast %6 : vector<1x20xf32> to vector<2x20xf32>
    %8 = arith.addf %5, %7 : vector<2x20xf32>
    %c0_8 = arith.constant 0 : index
    %c0_9 = arith.constant 0 : index
    %9 = vector.load %arg3[%c0_8, %c0_9] : memref<20x10xf32, #tpu.memory_space<vmem>>, vector<20x10xf32>
    %cst_10 = arith.constant dense<0.000000e+00> : vector<2x10xf32>
    %10 = tpu.matmul %8, %9, %cst_10 {dimension_numbers = #tpu.dot_dimension_numbers<[1], [0], [0], [1], [0, 0, 1, 1], [], []>} : vector<2x20xf32>, vector<20x10xf32>, vector<2x10xf32> -> vector<2x10xf32>
    %c0_11 = arith.constant 0 : index
    %c0_12 = arith.constant 0 : index
    %11 = vector.load %arg4[%c0_11, %c0_12] : memref<1x10xf32, #tpu.memory_space<vmem>>, vector<1x10xf32>
    %12 = vector.broadcast %11 : vector<1x10xf32> to vector<2x10xf32>
    %13 = arith.addf %10, %12 : vector<2x10xf32>
    %c0_13 = arith.constant 0 : index
    %c0_14 = arith.constant 0 : index
    %14 = vector.load %arg5[%c0_13, %c0_14] : memref<2x20xf32, #tpu.memory_space<vmem>>, vector<2x20xf32>
    tpu.vector_store %arg5[%c0_13, %c0_14], %8 {strides = array<i32>} : memref<2x20xf32, #tpu.memory_space<vmem>>, vector<2x20xf32>,
    %c0_15 = arith.constant 0 : index
    %c0_16 = arith.constant 0 : index
    %15 = vector.load %arg6[%c0_15, %c0_16] : memref<2x10xf32, #tpu.memory_space<vmem>>, vector<2x10xf32>
    tpu.vector_store %arg6[%c0_15, %c0_16], %13 {strides = array<i32>} : memref<2x10xf32, #tpu.memory_space<vmem>>, vector<2x10xf32>,
    return
  }
}

</mosaic_0001>

<bundles_post_ra>
// kernel: feature_classifier_forward.4
= control target key start
LH: loop header
LB: loop body
LE: loop exit
PB: predicated region body
PF: predicated region fallthrough
CT: control target
= control target key end

     0   :  { %s1102_s12 = smov 0   ;;  %s1242_s0 = inlined_call_operand.vmem [shape: f32[2,256,9], index: 0, kind: input, shape index: {}]   ;;  %s1243_s1 = inlined_call_operand.vmem [shape: f32[9,128], index: 1, kind: input, shape index: {}]   ;;  %s1244_s2 = inlined_call_operand.vmem [shape: f32[1,128], index: 2, kind: input, shape index: {}]   ;;  %s1245_s3 = inlined_call_operand.vmem [shape: f32[2,64,128], index: 3, kind: output, shape index: {}]  }
   0x1 LB: > { %s921_s13 = sadd.s32 4294967295, %s1078_s12   ;;  %p925_p0 = scmp.ge.s32.totalorder %s1078_s12, 1  ;;  %s1078_s12 = sphi %s1102_s12, %s13_s12  }
   0x2   : > { %p137_p1 = scmp.lt.s32.totalorder %s1078_s12, 3 }
   0x4   : > { %p138_p2 = pnand %p925_p0, %p137_p1 }
   0x5   : > { %v203_v0 = vld [vmem:[%s1243_s1] sm:$0xff] (!%p138_p2)  ;;  %v204_v1 = vld [vmem:[%s1243_s1 + $0x8] sm:$0x1] (!%p138_p2)  ;;  %vm309_vm0 = vcmask (!%p138_p2), 1040384   ;;  %p161_p3 = scmp.lt.s32.totalorder (!%p138_p2), %s921_s13, 1  ;;  %vm1080_vm1 = vmmov (!%p138_p2), 1  }
   0x6   : > { %141 = sbr.rel (%p138_p2) target bundleno = 332 (0x14c), region = 32  ;;  %v1054_v2 = vpack.c.bf16 (!%p138_p2), %v204_v1, %v203_v0  ;;  %vm1055_vm2 = vmpackc.low (!%p138_p2), %vm309_vm0, %vm1080_vm1  ;;  %vm212_vm3 = vcmask (!%p138_p2), 72704   ;;  %v1081_v35 = vmov (!%p138_p2), 0.0   ;;  %v1191_v36 = vld [vmem:[%s1244_s2] ss:$0 sm:$0xff] (!%p138_p2) }
   0x7   : > { %572 = vst [vmem:[#allocation2 + $0x10] sm:$0x3] (!%p138_p2), %v1081_v35  ;;  %574 = vst [vmem:[#allocation2 + $0x20] sm:$0xff] (!%p138_p2), %v1081_v35 }
   0x8   : > { %1056 = vmatprep.subr.msk.bf16.mxu0 (!%p138_p2), %vm1055_vm2, %v1054_v2  ;;  %1060 = vmatprep.subr.msk.bf16.mxu1 (!%p138_p2), %vm1055_vm2, %v1054_v2  ;;  %575 = vst [vmem:[#allocation2 + $0x28] sm:$0x3] (!%p138_p2), %v1081_v35  ;;  %573 = vst [vmem:[#allocation2 + $0x18] sm:$0xff] (!%p138_p2), %v1081_v35 }
   0x9   : > { %1059 = vmatpush3.bf16.msk.msra.mxu0 (!%p138_p2), %vm1055_vm2, %v1054_v2  ;;  %1061 = vmatpush3.bf16.msk.msra.mxu1 (!%p138_p2), %vm1055_vm2, %v1054_v2  ;;  %576 = vst [vmem:[#allocation2 + $0x30] sm:$0xff] (!%p138_p2), %v1081_v35  ;;  %577 = vst [vmem:[#allocation2 + $0x38] sm:$0xff] (!%p138_p2), %v1081_v35 }
   0xa   : > { %578 = vst [vmem:[#allocation2 + $0x40] sm:$0x3] (!%p138_p2), %v1081_v35  ;;  %579 = vst [vmem:[#allocation2 + $0x48] sm:$0xff] (!%p138_p2), %v1081_v35 }
   0xb   : > { %580 = vst [vmem:[#allocation2 + $0x50] sm:$0xff] (!%p138_p2), %v1081_v35  ;;  %581 = vst [vmem:[#allocation2 + $0x58] sm:$0x3] (!%p138_p2), %v1081_v35 }
   0xc   : > { %582 = vst [vmem:[#allocation2 + $0x60] sm:$0xff] (!%p138_p2), %v1081_v35  ;;  %583 = vst [vmem:[#allocation2 + $0x68] sm:$0xff] (!%p138_p2), %v1081_v35 }
   0xd   : > { %s1247_s13 = smov (!%p161_p3, %s921_s13), 1  ;;  %584 = vst [vmem:[#allocation2 + $0x70] sm:$0x3] %v1081_v35  ;;  %585 = vst [vmem:[#allocation2 + $0x78] sm:$0xff] %v1081_v35 }
   0xe   : > { %s966_s18 = sshll.u32 %s1247_s13, 8  ;;  %586 = vst [vmem:[#allocation2 + $0x80] sm:$0xff] %v1081_v35  ;;  %587 = vst [vmem:[#allocation2 + $0x88] sm:$0x3] %v1081_v35  ;;  %v674_v63 = vld [vmem:[#allocation2 + $0x10] sm:$0x3] }
   0xf   : > { %s1122_s21 = scalar_lea.vmem %s1242_s0, %s966_s18  ;;  %588 = vst [vmem:[#allocation2 + $0x90] sm:$0xff] %v1081_v35  ;;  %589 = vst [vmem:[#allocation2 + $0x98] sm:$0xff] %v1081_v35  ;;  %s967_s24 = sshll.u32 %s1247_s13, 6 }
  0x10   : > { %v171_v3 = vld [vmem:[%s1122_s21] sm:$0xff]  ;;  %v172_v4 = vld [vmem:[%s1122_s21 + $0x8] sm:$0xff]  ;;  %v173_v5 = vld [vmem:[%s1122_s21 + $0x10] sm:$0xff]  ;;  %590 = vst [vmem:[#allocation2 + $0xa0] sm:$0x3] %v1081_v35  ;;  %s1223_s27 = scalar_lea.vmem %s1245_s3, %s967_s24 }
  0x11   : > { %1006 = vmatprep.mubr.msk.f32.mxu0 %vm212_vm3, %v171_v3  ;;  %v174_v6 = vld [vmem:[%s1122_s21 + $0x18] sm:$0xff]  ;;  %v175_v7 = vld [vmem:[%s1122_s21 + $0x20] sm:$0xff]  ;;  %v188_v9 = vld [vmem:[%s1122_s21 + $0x88] sm:$0xff]  ;;  %591 = vst [vmem:[#allocation2 + $0xa8] sm:$0xff] %v1081_v35 }
  0x12   : > { %1007 = vmatmul.mubr.msk.f32.vlgmr.msra.gmra.mrb[0].mxu0 %vm212_vm3, %v172_v4  ;;  %v187_v8 = vld [vmem:[%s1122_s21 + $0x80] sm:$0xff]  ;;  %v189_v10 = vld [vmem:[%s1122_s21 + $0x90] sm:$0xff]  ;;  %v176_v11 = vld [vmem:[%s1122_s21 + $0x28] sm:$0xff]  ;;  %592 = vst [vmem:[#allocation2 + $0xb0] sm:$0xff] %v1081_v35 }
  0x13   : > { %1009 = vmatprep.mubr.msk.f32.mxu0 %vm212_vm3, %v173_v5  ;;  %1030 = vmatprep.mubr.msk.f32.mxu1 %vm212_vm3, %v187_v8  ;;  %v190_v12 = vld [vmem:[%s1122_s21 + $0x98] sm:$0xff]  ;;  %v177_v13 = vld [vmem:[%s1122_s21 + $0x30] sm:$0xff]  ;;  %v191_v14 = vld [vmem:[%s1122_s21 + $0xa0] sm:$0xff]  ;;  %593 = vst [vmem:[#allocation2 + $0xb8] sm:$0x3] %v1081_v35 }
  0x14   : > { %1031 = vmatmul.mubr.msk.f32.vlgmr.msra.gmra.mrb[0].mxu1 %vm212_vm3, %v188_v9  ;;  %v178_v15 = vld [vmem:[%s1122_s21 + $0x38] sm:$0xff]  ;;  %v192_v16 = vld [vmem:[%s1122_s21 + $0xa8] sm:$0xff]  ;;  %v179_v17 = vld [vmem:[%s1122_s21 + $0x40] sm:$0xff]  ;;  %594 = vst [vmem:[#allocation2 + $0xc0] sm:$0xff] %v1081_v35 }
  0x15   : > { %1033 = vmatprep.mubr.msk.f32.mxu1 %vm212_vm3, %v189_v10  ;;  %v193_v18 = vld [vmem:[%s1122_s21 + $0xb0] sm:$0xff]  ;;  %v180_v19 = vld [vmem:[%s1122_s21 + $0x48] sm:$0xff]  ;;  %v194_v20 = vld [vmem:[%s1122_s21 + $0xb8] sm:$0xff]  ;;  %595 = vst [vmem:[#allocation2 + $0xc8] sm:$0xff] %v1081_v35 }
  0x16   : > { %1010 = vmatmul.mubr.msk.f32.gmra.mrb[2].mxu0 %vm212_vm3, %v174_v6  ;;  %v181_v21 = vld [vmem:[%s1122_s21 + $0x50] sm:$0xff]  ;;  %v195_v22 = vld [vmem:[%s1122_s21 + $0xc0] sm:$0xff]  ;;  %v182_v23 = vld [vmem:[%s1122_s21 + $0x58] sm:$0xff]  ;;  %596 = vst [vmem:[#allocation2 + $0xd0] sm:$0x3] %v1081_v35 }
  0x17   : > { %1012 = vmatprep.mubr.msk.f32.mxu0 %vm212_vm3, %v175_v7  ;;  %v196_v24 = vld [vmem:[%s1122_s21 + $0xc8] sm:$0xff]  ;;  %v183_v25 = vld [vmem:[%s1122_s21 + $0x60] sm:$0xff]  ;;  %v197_v26 = vld [vmem:[%s1122_s21 + $0xd0] sm:$0xff]  ;;  %597 = vst [vmem:[#allocation2 + $0xd8] sm:$0xff] %v1081_v35 }
  0x18   : > { %1034 = vmatmul.mubr.msk.f32.gmra.mrb[2].mxu1 %vm212_vm3, %v190_v12  ;;  %v184_v27 = vld [vmem:[%s1122_s21 + $0x68] sm:$0xff]  ;;  %v198_v28 = vld [vmem:[%s1122_s21 + $0xd8] sm:$0xff]  ;;  %v185_v29 = vld [vmem:[%s1122_s21 + $0x70] sm:$0xff]  ;;  %598 = vst [vmem:[#allocation2 + $0xe0] sm:$0xff] %v1081_v35 }
  0x19   : > { %1036 = vmatprep.mubr.msk.f32.mxu1 %vm212_vm3, %v191_v14  ;;  %v199_v30 = vld [vmem:[%s1122_s21 + $0xe0] sm:$0xff]  ;;  %v186_v31 = vld [vmem:[%s1122_s21 + $0x78] sm:$0xff]  ;;  %v200_v32 = vld [vmem:[%s1122_s21 + $0xe8] sm:$0xff]  ;;  %599 = vst [vmem:[#allocation2 + $0xe8] sm:$0x3] %v1081_v35 }
  0x1a   : > { %1013 = vmatmul.mubr.msk.f32.gmra.mrb[4].mxu0 %vm212_vm3, %v176_v11  ;;  %v201_v33 = vld [vmem:[%s1122_s21 + $0xf0] sm:$0xff]  ;;  %v202_v34 = vld [vmem:[%s1122_s21 + $0xf8] sm:$0xff]  ;;  %600 = vst [vmem:[#allocation2 + $0xf0] sm:$0xff] %v1081_v35  ;;  %601 = vst [vmem:[#allocation2 + $0xf8] sm:$0xff] %v1081_v35 }
  0x1b   : > { %1015 = vmatprep.mubr.msk.f32.mxu0 %vm212_vm3, %v177_v13  ;;  %602 = vst [vmem:[#allocation2 + $0x100] sm:$0x3] %v1081_v35  ;;  %603 = vst [vmem:[#allocation2 + $0x108] sm:$0xff] %v1081_v35 }
  0x1c   : > { %1037 = vmatmul.mubr.msk.f32.gmra.mrb[4].mxu1 %vm212_vm3, %v192_v16  ;;  %604 = vst [vmem:[#allocation2 + $0x110] sm:$0xff] %v1081_v35  ;;  %605 = vst [vmem:[#allocation2 + $0x118] sm:$0x3] %v1081_v35 }
  0x1d   : > { %1039 = vmatprep.mubr.msk.f32.mxu1 %vm212_vm3, %v193_v18  ;;  %606 = vst [vmem:[#allocation2 + $0x120] sm:$0xff] %v1081_v35  ;;  %607 = vst [vmem:[#allocation2 + $0x128] sm:$0xff] %v1081_v35 }
  0x1e   : > { %1016 = vmatmul.mubr.msk.f32.gmra.mrb[6].mxu0 %vm212_vm3, %v178_v15  ;;  %608 = vst [vmem:[#allocation2 + $0x130] sm:$0x3] %v1081_v35  ;;  %609 = vst [vmem:[#allocation2 + $0x138] sm:$0xff] %v1081_v35 }
  0x1f   : > { %1018 = vmatprep.mubr.msk.f32.mxu0 %vm212_vm3, %v179_v17  ;;  %610 = vst [vmem:[#allocation2 + $0x140] sm:$0xff] %v1081_v35  ;;  %611 = vst [vmem:[#allocation2 + $0x148] sm:$0x3] %v1081_v35 }
  0x20   : > { %1040 = vmatmul.mubr.msk.f32.gmra.mrb[6].mxu1 %vm212_vm3, %v194_v20  ;;  %612 = vst [vmem:[#allocation2 + $0x150] sm:$0xff] %v1081_v35  ;;  %613 = vst [vmem:[#allocation2 + $0x158] sm:$0xff] %v1081_v35 }
  0x21   : > { %1042 = vmatprep.mubr.msk.f32.mxu1 %vm212_vm3, %v195_v22  ;;  %614 = vst [vmem:[#allocation2 + $0x160] sm:$0x3] %v1081_v35  ;;  %615 = vst [vmem:[#allocation2 + $0x168] sm:$0xff] %v1081_v35 }
  0x22   : > { %1019 = vmatmul.mubr.msk.f32.gmra.mrb[8].mxu0 %vm212_vm3, %v180_v19  ;;  %616 = vst [vmem:[#allocation2 + $0x170] sm:$0xff] %v1081_v35  ;;  %617 = vst [vmem:[#allocation2 + $0x178] sm:$0x3] %v1081_v35 }
  0x23   : > { %1021 = vmatprep.mubr.msk.f32.mxu0 %vm212_vm3, %v181_v21  ;;  %618 = vst [vmem:[#allocation2 + $0x180] sm:$0xff] %v1081_v35  ;;  %619 = vst [vmem:[#allocation2 + $0x188] sm:$0xff] %v1081_v35 }
  0x24   : > { %1043 = vmatmul.mubr.msk.f32.gmra.mrb[8].mxu1 %vm212_vm3, %v196_v24  ;;  %620 = vst [vmem:[#allocation2 + $0x190] sm:$0x3] %v1081_v35 }
  0x25   : > { %1045 = vmatprep.mubr.msk.f32.mxu1 %vm212_vm3, %v197_v26 }
  0x26   : > { %1022 = vmatmul.mubr.msk.f32.gmra.mrb[10].mxu0 %vm212_vm3, %v182_v23 }
  0x27   : > { %1024 = vmatprep.mubr.msk.f32.mxu0 %vm212_vm3, %v183_v25 }
  0x28   : > { %1046 = vmatmul.mubr.msk.f32.gmra.mrb[10].mxu1 %vm212_vm3, %v198_v28 }
  0x29   : > { %1048 = vmatprep.mubr.msk.f32.mxu1 %vm212_vm3, %v199_v30 }
  0x2a   : > { %1025 = vmatmul.mubr.msk.f32.gmra.mrb[12].mxu0 %vm212_vm3, %v184_v27 }
  0x2b   : > { %1027 = vmatprep.mubr.msk.f32.mxu0 %vm212_vm3, %v185_v29 }
  0x2c   : > { %1049 = vmatmul.mubr.msk.f32.gmra.mrb[12].mxu1 %vm212_vm3, %v200_v32 }
  0x2d   : > { %1051 = vmatprep.mubr.msk.f32.mxu1 %vm212_vm3, %v201_v33 }
  0x2e   : > { %1028 = vmatmul.mubr.msk.f32.gmra.mrb[14].mxu0 %vm212_vm3, %v186_v31 }
  0x30   : > { %1052 = vmatmul.mubr.msk.f32.gmra.mrb[14].mxu1 %vm212_vm3, %v202_v34 }
  0xe5   : > { %v1008_v37 = vpop.f32.mrb[0].mxu0 }
  0xe6   : > { %v385_v38 = vadd.f32 %v1008_v37, %v1191_v36  ;;  %v379_v39 = vpop.f32.mrb[1].mxu0 }
  0xe7   : > { %v380_v40 = vadd.f32 %v1191_v36, %v379_v39  ;;  %v1032_v44 = vpop.f32.mrb[0].mxu1 }
  0xe8   : > { %v539_v41 = vmax.f32 %v385_v38, 0.0  ;;  %v465_v47 = vadd.f32 %v1032_v44, %v1191_v36  ;;  %v459_v48 = vpop.f32.mrb[1].mxu1 }
  0xe9   : > { %v538_v42 = vmax.f32 %v380_v40, 0.0  ;;  %v1011_v43 = vpop.f32.mrb[2].mxu0  ;;  %v460_v50 = vadd.f32 %v1191_v36, %v459_v48 }
  0xea   : > { %626 = vst [vmem:[#allocation2 + $0x21] sm:$0xff] %v539_v41  ;;  %v395_v45 = vadd.f32 %v1011_v43, %v1191_v36  ;;  %v389_v46 = vpop.f32.mrb[3].mxu0  ;;  %v555_v52 = vmax.f32 %v465_v47, 0.0 }
  0xeb   : > { %625 = vst [vmem:[#allocation2 + $0x19] sm:$0xff] %v538_v42  ;;  %v390_v49 = vadd.f32 %v1191_v36, %v389_v46  ;;  %v554_v55 = vmax.f32 %v460_v50, 0.0  ;;  %v1035_v56 = vpop.f32.mrb[2].mxu1 }
  0xec   : > { %v541_v51 = vmax.f32 %v395_v45, 0.0  ;;  %650 = vst [vmem:[#allocation2 + $0xe1] sm:$0xff] %v555_v52  ;;  %v475_v59 = vadd.f32 %v1035_v56, %v1191_v36  ;;  %v469_v60 = vpop.f32.mrb[3].mxu1 }
  0xed   : > { %v540_v53 = vmax.f32 %v390_v49, 0.0  ;;  %v1014_v54 = vpop.f32.mrb[4].mxu0  ;;  %649 = vst [vmem:[#allocation2 + $0xd9] sm:$0xff] %v554_v55  ;;  %v470_v62 = vadd.f32 %v1191_v36, %v469_v60 }
  0xee   : > { %629 = vst [vmem:[#allocation2 + $0x39] sm:$0xff] %v541_v51  ;;  %v405_v57 = vadd.f32 %v1014_v54, %v1191_v36  ;;  %v399_v58 = vpop.f32.mrb[5].mxu0  ;;  %v557_v1 = vmax.f32 %v475_v59, 0.0 }
  0xef   : > { %628 = vst [vmem:[#allocation2 + $0x31] sm:$0xff] %v540_v53  ;;  %v400_v61 = vadd.f32 %v1191_v36, %v399_v58  ;;  %v556_v5 = vmax.f32 %v470_v62, 0.0  ;;  %v1038_v6 = vpop.f32.mrb[4].mxu1 }
  0xf0   : > { %v543_v0 = vmax.f32 %v405_v57, 0.0  ;;  %653 = vst [vmem:[#allocation2 + $0xf9] sm:$0xff] %v557_v1  ;;  %v485_v11 = vadd.f32 %v1038_v6, %v1191_v36  ;;  %v479_v12 = vpop.f32.mrb[5].mxu1 }
  0xf1   : > { %v677_v2 = vld [vmem:[#allocation2 + $0x28] sm:$0x3]  ;;  %v542_v3 = vmax.f32 %v400_v61, 0.0  ;;  %v1017_v4 = vpop.f32.mrb[6].mxu0  ;;  %652 = vst [vmem:[#allocation2 + $0xf1] sm:$0xff] %v556_v5  ;;  %v480_v14 = vadd.f32 %v1191_v36, %v479_v12 }
  0xf2   : > { %v675_v7 = vld [vmem:[#allocation2 + $0x18] sm:$0xff]  ;;  %v676_v8 = vld [vmem:[#allocation2 + $0x20] sm:$0xff]  ;;  %632 = vst [vmem:[#allocation2 + $0x51] sm:$0xff] %v543_v0  ;;  %v415_v9 = vadd.f32 %v1017_v4, %v1191_v36  ;;  %v409_v10 = vpop.f32.mrb[7].mxu0  ;;  %v680_v15 = vmax.f32 %v674_v63, %v677_v2  ;;  %v559_v17 = vmax.f32 %v485_v11, 0.0 }
  0xf3   : > { %631 = vst [vmem:[#allocation2 + $0x49] sm:$0xff] %v542_v3  ;;  %v410_v13 = vadd.f32 %v1191_v36, %v409_v10  ;;  %v678_v18 = vmax.f32 %v675_v7, 0.0  ;;  %v679_v19 = vmax.f32 %v676_v8, 0.0  ;;  %v558_v28 = vmax.f32 %v480_v14, 0.0  ;;  %v1041_v32 = vpop.f32.mrb[6].mxu1 }
  0xf4   : > { %v545_v16 = vmax.f32 %v415_v9, 0.0  ;;  %656 = vst [vmem:[#allocation2 + $0x111] sm:$0xff] %v559_v17  ;;  %v495_v34 = vadd.f32 %v1041_v32, %v1191_v36  ;;  %v489_v35 = vpop.f32.mrb[7].mxu1 }
  0xf5   : > { %v683_v20 = vld [vmem:[#allocation2 + $0x40] sm:$0x3]  ;;  %v544_v21 = vmax.f32 %v410_v13, 0.0  ;;  %v1020_v22 = vpop.f32.mrb[8].mxu0  ;;  %655 = vst [vmem:[#allocation2 + $0x109] sm:$0xff] %v558_v28  ;;  %v490_v40 = vadd.f32 %v1191_v36, %v489_v35 }
  0xf6   : > { %v686_v23 = vmax.f32 %v680_v15, %v683_v20  ;;  %v681_v24 = vld [vmem:[#allocation2 + $0x30] sm:$0xff]  ;;  %v682_v25 = vld [vmem:[#allocation2 + $0x38] sm:$0xff]  ;;  %635 = vst [vmem:[#allocation2 + $0x69] sm:$0xff] %v545_v16  ;;  %v425_v26 = vadd.f32 %v1020_v22, %v1191_v36  ;;  %v419_v27 = vpop.f32.mrb[9].mxu0  ;;  %v561_v45 = vmax.f32 %v495_v34, 0.0 }
  0xf7   : > { %v684_v29 = vmax.f32 %v678_v18, %v681_v24  ;;  %v685_v30 = vmax.f32 %v679_v19, %v682_v25  ;;  %634 = vst [vmem:[#allocation2 + $0x61] sm:$0xff] %v544_v21  ;;  %v420_v31 = vadd.f32 %v1191_v36, %v419_v27  ;;  %v700_v46 = vld [vmem:[#allocation2 + $0x40] sm:$0x3]  ;;  %v560_v48 = vmax.f32 %v490_v40, 0.0  ;;  %v1044_v49 = vpop.f32.mrb[8].mxu1 }
  0xf8   : > { %689 = vst [vmem:[#allocation3 + $0x10] sm:$0x3] %v686_v23  ;;  %v547_v33 = vmax.f32 %v425_v26, 0.0  ;;  %659 = vst [vmem:[#allocation2 + $0x129] sm:$0xff] %v561_v45  ;;  %v505_v52 = vadd.f32 %v1044_v49, %v1191_v36  ;;  %v499_v53 = vpop.f32.mrb[9].mxu1 }
  0xf9   : > { %687 = vst [vmem:[#allocation3] sm:$0xff] %v684_v29  ;;  %688 = vst [vmem:[#allocation3 + $0x8] sm:$0xff] %v685_v30  ;;  %v703_v37 = vld [vmem:[#allocation2 + $0x58] sm:$0x3]  ;;  %v546_v38 = vmax.f32 %v420_v31, 0.0  ;;  %v1023_v39 = vpop.f32.mrb[10].mxu0  ;;  %v500_v59 = vadd.f32 %v1191_v36, %v499_v53 }
  0xfa   : > { %v701_v41 = vld [vmem:[#allocation2 + $0x48] sm:$0xff]  ;;  %v702_v42 = vld [vmem:[#allocation2 + $0x50] sm:$0xff]  ;;  %638 = vst [vmem:[#allocation2 + $0x81] sm:$0xff] %v547_v33  ;;  %v435_v43 = vadd.f32 %v1023_v39, %v1191_v36  ;;  %v429_v44 = vpop.f32.mrb[11].mxu0  ;;  %v706_v50 = vmax.f32 %v700_v46, %v703_v37  ;;  %658 = vst [vmem:[#allocation2 + $0x121] sm:$0xff] %v560_v48  ;;  %v563_v1 = vmax.f32 %v505_v52, 0.0 }
  0xfb   : > { %637 = vst [vmem:[#allocation2 + $0x79] sm:$0xff] %v546_v38  ;;  %v430_v47 = vadd.f32 %v1191_v36, %v429_v44  ;;  %v704_v54 = vmax.f32 %v681_v24, %v701_v41  ;;  %v705_v55 = vmax.f32 %v682_v25, %v702_v42  ;;  %v1047_v5 = vpop.f32.mrb[10].mxu1  ;;  %v562_v15 = vmax.f32 %v500_v59, 0.0 }
  0xfc   : > { %v549_v51 = vmax.f32 %v435_v43, 0.0  ;;  %662 = vst [vmem:[#allocation2 + $0x141] sm:$0xff] %v563_v1  ;;  %v515_v9 = vadd.f32 %v1047_v5, %v1191_v36  ;;  %v509_v21 = vpop.f32.mrb[11].mxu1 }
  0xfd   : > { %v709_v56 = vld [vmem:[#allocation2 + $0x70] sm:$0x3]  ;;  %v548_v57 = vmax.f32 %v430_v47, 0.0  ;;  %v1026_v58 = vpop.f32.mrb[12].mxu0  ;;  %661 = vst [vmem:[#allocation2 + $0x139] sm:$0xff] %v562_v15  ;;  %v510_v28 = vadd.f32 %v1191_v36, %v509_v21 }
  0xfe   : > { %v712_v60 = vmax.f32 %v706_v50, %v709_v56  ;;  %v707_v61 = vld [vmem:[#allocation2 + $0x60] sm:$0xff]  ;;  %v708_v62 = vld [vmem:[#allocation2 + $0x68] sm:$0xff]  ;;  %641 = vst [vmem:[#allocation2 + $0x99] sm:$0xff] %v549_v51  ;;  %v445_v63 = vadd.f32 %v1026_v58, %v1191_v36  ;;  %v439_v0 = vpop.f32.mrb[13].mxu0  ;;  %v565_v20 = vmax.f32 %v515_v9, 0.0 }
  0xff   : > { %v710_v2 = vmax.f32 %v704_v54, %v707_v61  ;;  %v711_v3 = vmax.f32 %v705_v55, %v708_v62  ;;  %640 = vst [vmem:[#allocation2 + $0x91] sm:$0xff] %v548_v57  ;;  %v440_v4 = vadd.f32 %v1191_v36, %v439_v0  ;;  %v724_v23 = vld [vmem:[#allocation2 + $0x70] sm:$0x3]  ;;  %v1050_v25 = vpop.f32.mrb[12].mxu1  ;;  %v564_v41 = vmax.f32 %v510_v28, 0.0 }
 0x100   : > { %v690_v6 = vld [vmem:[#allocation3] ss:$2 sm:$0xff]  ;;  %v692_v7 = vld [vmem:[#allocation3 + $0x1] ss:$2 sm:$0xff]  ;;  %v551_v12 = vmax.f32 %v445_v63, 0.0  ;;  %665 = vst [vmem:[#allocation2 + $0x159] sm:$0xff] %v565_v20  ;;  %v525_v29 = vadd.f32 %v1050_v25, %v1191_v36 }
 0x101   : > { %v695_v8 = vld [vmem:[#allocation3 + $0x2] ss:$2 sm:$0xff]  ;;  %v693_v10 = vmax.f32 %v690_v6, %v692_v7  ;;  %v727_v11 = vld [vmem:[#allocation2 + $0x88] sm:$0x3]  ;;  %v550_v13 = vmax.f32 %v440_v4, 0.0  ;;  %v1029_v14 = vpop.f32.mrb[14].mxu0 }
 0x102   : > { %715 = vst [vmem:[#allocation3 + $0x10] sm:$0x3] %v712_v60  ;;  %713 = vst [vmem:[#allocation3] sm:$0xff] %v710_v2  ;;  %v725_v16 = vld [vmem:[#allocation2 + $0x78] sm:$0xff]  ;;  %v726_v17 = vld [vmem:[#allocation2 + $0x80] sm:$0xff]  ;;  %v455_v18 = vadd.f32 %v1029_v14, %v1191_v36  ;;  %v449_v19 = vpop.f32.mrb[15].mxu0  ;;  %v730_v26 = vmax.f32 %v724_v23, %v727_v11 }
 0x103   : > { %714 = vst [vmem:[#allocation3 + $0x8] sm:$0xff] %v711_v3  ;;  %v696_v22 = vmax.f32 %v693_v10, %v695_v8  ;;  %644 = vst [vmem:[#allocation2 + $0xb1] sm:$0xff] %v551_v12  ;;  %v450_v24 = vadd.f32 %v1191_v36, %v449_v19  ;;  %v519_v30 = vpop.f32.mrb[13].mxu1  ;;  %v728_v31 = vmax.f32 %v707_v61, %v725_v16  ;;  %v567_v42 = vmax.f32 %v525_v29, 0.0  ;;  %v775_v0 = vld [vmem:[#allocation2 + $0xe8] sm:$0x3] }
 0x104   : > { %643 = vst [vmem:[#allocation2 + $0xa9] sm:$0xff] %v550_v13  ;;  %v553_v27 = vmax.f32 %v455_v18, 0.0  ;;  %v729_v32 = vmax.f32 %v708_v62, %v726_v17  ;;  %v520_v35 = vadd.f32 %v1191_v36, %v519_v30  ;;  %v1053_v37 = vpop.f32.mrb[14].mxu1  ;;  %664 = vst [vmem:[#allocation2 + $0x151] sm:$0xff] %v564_v41  ;;  %v773_v6 = vld [vmem:[#allocation2 + $0xd8] sm:$0xff]  ;;  %v774_v7 = vld [vmem:[#allocation2 + $0xe0] sm:$0xff] }
 0x105   : > { %v733_v33 = vld [vmem:[#allocation2 + $0xa0] sm:$0x3]  ;;  %v552_v34 = vmax.f32 %v450_v24, 0.0  ;;  %697 = vst [vmem:[%s1223_s27] sm:$0xff] %v696_v22  ;;  %v535_v43 = vadd.f32 %v1053_v37, %v1191_v36  ;;  %v529_v44 = vpop.f32.mrb[15].mxu1  ;;  %668 = vst [vmem:[#allocation2 + $0x171] sm:$0xff] %v567_v42  ;;  %v779_v17 = vld [vmem:[#allocation2 + $0xf0] sm:$0xff] }
 0x106   : > { %v736_v38 = vmax.f32 %v730_v26, %v733_v33  ;;  %v731_v39 = vld [vmem:[#allocation2 + $0x90] sm:$0xff]  ;;  %v732_v40 = vld [vmem:[#allocation2 + $0x98] sm:$0xff]  ;;  %647 = vst [vmem:[#allocation2 + $0xc9] sm:$0xff] %v553_v27  ;;  %v566_v47 = vmax.f32 %v520_v35, 0.0  ;;  %v530_v48 = vadd.f32 %v1191_v36, %v529_v44  ;;  %v748_v59 = vld [vmem:[#allocation2 + $0xa0] sm:$0x3] }
 0x107   : > { %v734_v45 = vmax.f32 %v728_v31, %v731_v39  ;;  %v735_v46 = vmax.f32 %v729_v32, %v732_v40  ;;  %646 = vst [vmem:[#allocation2 + $0xc1] sm:$0xff] %v552_v34  ;;  %v569_v53 = vmax.f32 %v535_v43, 0.0  ;;  %v781_v16 = vld [vmem:[#allocation2 + $0x100] sm:$0x3]  ;;  %v780_v18 = vld [vmem:[#allocation2 + $0xf8] sm:$0xff]  ;;  %v797_v24 = vld [vmem:[#allocation2 + $0x108] sm:$0xff] }
 0x108   : > { %667 = vst [vmem:[#allocation2 + $0x169] sm:$0xff] %v566_v47  ;;  %v568_v54 = vmax.f32 %v530_v48, 0.0  ;;  %v796_v19 = vld [vmem:[#allocation2 + $0x100] sm:$0x3]  ;;  %v799_v23 = vld [vmem:[#allocation2 + $0x118] sm:$0x3]  ;;  %v800_v32 = vmax.f32 %v779_v17, %v797_v24 }
 0x109   : > { %671 = vst [vmem:[#allocation2 + $0x189] sm:$0xff] %v569_v53  ;;  %v798_v25 = vld [vmem:[#allocation2 + $0x110] sm:$0xff]  ;;  %v802_v31 = vmax.f32 %v796_v19, %v799_v23  ;;  %v803_v35 = vld [vmem:[#allocation2 + $0x120] sm:$0xff]  ;;  %v804_v37 = vld [vmem:[#allocation2 + $0x128] sm:$0xff] }
 0x10a   : > { %v716_v49 = vld [vmem:[#allocation3] ss:$2 sm:$0xff]  ;;  %v717_v50 = vld [vmem:[#allocation3 + $0x1] ss:$2 sm:$0xff]  ;;  %670 = vst [vmem:[#allocation2 + $0x181] sm:$0xff] %v568_v54  ;;  %v801_v33 = vmax.f32 %v780_v18, %v798_v25  ;;  %v822_v44 = vld [vmem:[#allocation2 + $0x140] sm:$0xff] }
 0x10b   : > { %v719_v51 = vld [vmem:[#allocation3 + $0x2] ss:$2 sm:$0xff]  ;;  %v718_v52 = vmax.f32 %v716_v49, %v717_v50  ;;  %v749_v56 = vld [vmem:[#allocation2 + $0xa8] sm:$0xff]  ;;  %v805_v34 = vld [vmem:[#allocation2 + $0x130] sm:$0x3] }
 0x10c   : > { %739 = vst [vmem:[#allocation3 + $0x10] sm:$0x3] %v736_v38  ;;  %737 = vst [vmem:[#allocation3] sm:$0xff] %v734_v45  ;;  %v751_v55 = vld [vmem:[#allocation2 + $0xb8] sm:$0x3]  ;;  %v750_v57 = vld [vmem:[#allocation2 + $0xb0] sm:$0xff]  ;;  %v752_v60 = vmax.f32 %v731_v39, %v749_v56  ;;  %v808_v39 = vmax.f32 %v802_v31, %v805_v34  ;;  %v807_v41 = vmax.f32 %v801_v33, %v804_v37 }
 0x10d   : > { %738 = vst [vmem:[#allocation3 + $0x8] sm:$0xff] %v735_v46  ;;  %v720_v58 = vmax.f32 %v718_v52, %v719_v51  ;;  %v754_v36 = vmax.f32 %v748_v59, %v751_v55  ;;  %v753_v61 = vmax.f32 %v732_v40, %v750_v57  ;;  %v757_v62 = vld [vmem:[#allocation2 + $0xd0] sm:$0x3]  ;;  %v806_v40 = vmax.f32 %v800_v32, %v803_v35  ;;  %v823_v42 = vld [vmem:[#allocation2 + $0x148] sm:$0x3]  ;;  %v821_v43 = vld [vmem:[#allocation2 + $0x138] sm:$0xff] }
 0x10e   : > { %v755_v1 = vld [vmem:[#allocation2 + $0xc0] sm:$0xff]  ;;  %v756_v2 = vld [vmem:[#allocation2 + $0xc8] sm:$0xff]  ;;  %v772_v3 = vld [vmem:[#allocation2 + $0xd0] sm:$0x3]  ;;  %v824_v51 = vmax.f32 %v803_v35, %v821_v43  ;;  %v825_v52 = vmax.f32 %v804_v37, %v822_v44 }
 0x10f   : > { %721 = vst [vmem:[%s1223_s27 + $0x8] sm:$0xff] %v720_v58  ;;  %v760_v63 = vmax.f32 %v754_v36, %v757_v62  ;;  %v758_v4 = vmax.f32 %v752_v60, %v755_v1  ;;  %v759_v5 = vmax.f32 %v753_v61, %v756_v2  ;;  %v778_v13 = vmax.f32 %v772_v3, %v775_v0  ;;  %v820_v38 = vld [vmem:[#allocation2 + $0x130] sm:$0x3]  ;;  %v829_v53 = vld [vmem:[#allocation2 + $0x160] sm:$0x3]  ;;  %v828_v55 = vld [vmem:[#allocation2 + $0x158] sm:$0xff] }
 0x110   : > { %v776_v14 = vmax.f32 %v755_v1, %v773_v6  ;;  %v777_v15 = vmax.f32 %v756_v2, %v774_v7  ;;  %v826_v50 = vmax.f32 %v820_v38, %v823_v42  ;;  %v827_v54 = vld [vmem:[#allocation2 + $0x150] sm:$0xff]  ;;  %v844_v56 = vld [vmem:[#allocation2 + $0x160] sm:$0x3]  ;;  %v831_v59 = vmax.f32 %v825_v52, %v828_v55  ;;  %v847_v36 = vld [vmem:[#allocation2 + $0x178] sm:$0x3] }
 0x111   : > { %v784_v20 = vmax.f32 %v778_v13, %v781_v16  ;;  %v830_v58 = vmax.f32 %v824_v51, %v827_v54  ;;  %v845_v60 = vld [vmem:[#allocation2 + $0x168] sm:$0xff]  ;;  %v846_v61 = vld [vmem:[#allocation2 + $0x170] sm:$0xff]  ;;  %v850_v3 = vmax.f32 %v844_v56, %v847_v36  ;;  %v851_v7 = vld [vmem:[#allocation2 + $0x180] sm:$0xff] }
 0x112   : > { %v782_v21 = vmax.f32 %v776_v14, %v779_v17  ;;  %v783_v22 = vmax.f32 %v777_v15, %v780_v18  ;;  %v832_v57 = vmax.f32 %v826_v50, %v829_v53  ;;  %v853_v6 = vld [vmem:[#allocation2 + $0x190] sm:$0x3] }
 0x114   : > { %v740_v8 = vld [vmem:[#allocation3] ss:$2 sm:$0xff]  ;;  %v741_v9 = vld [vmem:[#allocation3 + $0x1] ss:$2 sm:$0xff] }
 0x115   : > { %v743_v10 = vld [vmem:[#allocation3 + $0x2] ss:$2 sm:$0xff]  ;;  %v742_v11 = vmax.f32 %v740_v8, %v741_v9  ;;  %v852_v8 = vld [vmem:[#allocation2 + $0x188] sm:$0xff]  ;;  %v856_v9 = vmax.f32 %v850_v3, %v853_v6 }
 0x116   : > { %763 = vst [vmem:[#allocation3 + $0x10] sm:$0x3] %v760_v63  ;;  %761 = vst [vmem:[#allocation3] sm:$0xff] %v758_v4  ;;  %v848_v4 = vmax.f32 %v827_v54, %v845_v60 }
 0x117   : > { %762 = vst [vmem:[#allocation3 + $0x8] sm:$0xff] %v759_v5  ;;  %v744_v12 = vmax.f32 %v742_v11, %v743_v10  ;;  %v849_v5 = vmax.f32 %v828_v55, %v846_v61 }
 0x118   : > { %v854_v10 = vmax.f32 %v848_v4, %v851_v7 }
 0x119   : > { %745 = vst [vmem:[%s1223_s27 + $0x10] sm:$0xff] %v744_v12  ;;  %v855_v11 = vmax.f32 %v849_v5, %v852_v8 }
 0x11e   : > { %v764_v26 = vld [vmem:[#allocation3] ss:$2 sm:$0xff]  ;;  %v765_v27 = vld [vmem:[#allocation3 + $0x1] ss:$2 sm:$0xff] }
 0x11f   : > { %v767_v28 = vld [vmem:[#allocation3 + $0x2] ss:$2 sm:$0xff]  ;;  %v766_v29 = vmax.f32 %v764_v26, %v765_v27 }
 0x120   : > { %787 = vst [vmem:[#allocation3 + $0x10] sm:$0x3] %v784_v20  ;;  %785 = vst [vmem:[#allocation3] sm:$0xff] %v782_v21 }
 0x121   : > { %786 = vst [vmem:[#allocation3 + $0x8] sm:$0xff] %v783_v22  ;;  %v768_v30 = vmax.f32 %v766_v29, %v767_v28 }
 0x123   : > { %769 = vst [vmem:[%s1223_s27 + $0x18] sm:$0xff] %v768_v30 }
 0x128   : > { %v788_v45 = vld [vmem:[#allocation3] ss:$2 sm:$0xff]  ;;  %v789_v46 = vld [vmem:[#allocation3 + $0x1] ss:$2 sm:$0xff] }
 0x129   : > { %v791_v47 = vld [vmem:[#allocation3 + $0x2] ss:$2 sm:$0xff]  ;;  %v790_v48 = vmax.f32 %v788_v45, %v789_v46 }
 0x12a   : > { %811 = vst [vmem:[#allocation3 + $0x10] sm:$0x3] %v808_v39  ;;  %809 = vst [vmem:[#allocation3] sm:$0xff] %v806_v40 }
 0x12b   : > { %810 = vst [vmem:[#allocation3 + $0x8] sm:$0xff] %v807_v41  ;;  %v792_v49 = vmax.f32 %v790_v48, %v791_v47 }
 0x12d   : > { %793 = vst [vmem:[%s1223_s27 + $0x20] sm:$0xff] %v792_v49 }
 0x132   : > { %v812_v62 = vld [vmem:[#allocation3] ss:$2 sm:$0xff]  ;;  %v813_v63 = vld [vmem:[#allocation3 + $0x1] ss:$2 sm:$0xff] }
 0x133   : > { %v815_v0 = vld [vmem:[#allocation3 + $0x2] ss:$2 sm:$0xff]  ;;  %v814_v1 = vmax.f32 %v812_v62, %v813_v63 }
 0x134   : > { %835 = vst [vmem:[#allocation3 + $0x10] sm:$0x3] %v832_v57  ;;  %833 = vst [vmem:[#allocation3] sm:$0xff] %v830_v58 }
 0x135   : > { %834 = vst [vmem:[#allocation3 + $0x8] sm:$0xff] %v831_v59  ;;  %v816_v2 = vmax.f32 %v814_v1, %v815_v0 }
 0x137   : > { %817 = vst [vmem:[%s1223_s27 + $0x28] sm:$0xff] %v816_v2 }
 0x13c   : > { %v836_v12 = vld [vmem:[#allocation3] ss:$2 sm:$0xff]  ;;  %v837_v13 = vld [vmem:[#allocation3 + $0x1] ss:$2 sm:$0xff] }
 0x13d   : > { %v839_v14 = vld [vmem:[#allocation3 + $0x2] ss:$2 sm:$0xff]  ;;  %v838_v15 = vmax.f32 %v836_v12, %v837_v13 }
 0x13e   : > { %859 = vst [vmem:[#allocation3 + $0x10] sm:$0x3] %v856_v9  ;;  %857 = vst [vmem:[#allocation3] sm:$0xff] %v854_v10 }
 0x13f   : > { %858 = vst [vmem:[#allocation3 + $0x8] sm:$0xff] %v855_v11  ;;  %v840_v16 = vmax.f32 %v838_v15, %v839_v14 }
 0x141   : > { %841 = vst [vmem:[%s1223_s27 + $0x30] sm:$0xff] %v840_v16 }
 0x146   : > { %v860_v17 = vld [vmem:[#allocation3] ss:$2 sm:$0xff]  ;;  %v861_v18 = vld [vmem:[#allocation3 + $0x1] ss:$2 sm:$0xff] }
 0x147   : > { %v862_v19 = vmax.f32 %v860_v17, %v861_v18  ;;  %v863_v20 = vld [vmem:[#allocation3 + $0x2] ss:$2 sm:$0xff] }
 0x149   : > { %v864_v21 = vmax.f32 %v862_v19, %v863_v20 }
 0x14b   : > { %865 = vst [vmem:[%s1223_s27 + $0x38] sm:$0xff] %v864_v21 }
 0x14c PF: > { %s13_s12 = sadd.s32 1, %s1078_s12  }
 0x14d   : > { %p10_p4 = scmp.ge.s32.totalorder %s13_s12, 4  }
 0x14f   :  { %12 = sbr.rel (!%p10_p4) target bundleno = 1 (0x1), region = 80 }

// kernel: feature_classifier_forward.6
= control target key start
LH: loop header
LB: loop body
LE: loop exit
PB: predicated region body
PF: predicated region fallthrough
CT: control target
= control target key end

     0   :  { %s1336_s27 = smov 0   ;;  %s1582_s0 = inlined_call_operand.vmem [shape: f32[2,16,128], index: 0, kind: input, shape index: {}]   ;;  %s1583_s1 = inlined_call_operand.vmem [shape: f32[128,64], index: 1, kind: input, shape index: {}]   ;;  %s1584_s2 = inlined_call_operand.vmem [shape: f32[1,64], index: 2, kind: input, shape index: {}]   ;;  %s1585_s3 = inlined_call_operand.vmem [shape: f32[9,64], index: 3, kind: input, shape index: {}]   ;;  %s1586_s4 = inlined_call_operand.vmem [shape: f32[1,64], index: 4, kind: input, shape index: {}]   ;;  %s1587_s5 = inlined_call_operand.vmem [shape: f32[64,128], index: 5, kind: input, shape index: {}]   ;;  %s1588_s6 = inlined_call_operand.vmem [shape: f32[1,128], index: 6, kind: input, shape index: {}]   ;;  %s1589_s7 = inlined_call_operand.vmem [shape: f32[1,128], index: 7, kind: input, shape index: {}]   ;;  %s1590_s8 = inlined_call_operand.vmem [shape: f32[2,4,128], index: 8, kind: output, shape index: {}]  }
   0x1 LB: > { %s1004_s28 = sadd.s32 4294967295, %s1286_s27   ;;  %p1008_p0 = scmp.ge.s32.totalorder %s1286_s27, 1  ;;  %s1286_s27 = sphi %s1336_s27, %s18_s27  }
   0x2   : > { %p262_p1 = scmp.lt.s32.totalorder %s1286_s27, 3 }
   0x4   : > { %p263_p2 = pnand %p1008_p0, %p262_p1 }
   0x5   : > { %v306_v0 = vld [vmem:[%s1583_s1] sm:$0xff] (!%p263_p2)  ;;  %v307_v1 = vld [vmem:[%s1583_s1 + $0x8] sm:$0xff] (!%p263_p2)  ;;  %v308_v2 = vld [vmem:[%s1583_s1 + $0x10] sm:$0xff] (!%p263_p2)  ;;  %p295_p3 = scmp.lt.s32.totalorder (!%p263_p2), %s1004_s28, 1  ;;  %vm406_vm0 = vcmask (!%p263_p2), 521216   ;;  %v1288_v26 = vmov (!%p263_p2), 0.0   ;;  %v429_v40 = vlaneseq (!%p263_p2) }
   0x6   : > { %266 = sbr.rel (%p263_p2) target bundleno = 555 (0x22b), region = 52  ;;  %v1189_v3 = vpack.c.bf16 (!%p263_p2), %v307_v1, %v306_v0  ;;  %v309_v4 = vld [vmem:[%s1583_s1 + $0x18] sm:$0xff] (!%p263_p2)  ;;  %v310_v6 = vld [vmem:[%s1583_s1 + $0x20] sm:$0xff] (!%p263_p2)  ;;  %v311_v7 = vld [vmem:[%s1583_s1 + $0x28] sm:$0xff] (!%p263_p2)  ;;  %407 = vst.msk [vmem:[#allocation2] sm:$0x3f] (!%p263_p2), %vm406_vm0, %v1288_v26 }
   0x7   : > { %v1193_v5 = vpack.c.bf16 (!%p263_p2), %v309_v4, %v308_v2  ;;  %v1197_v8 = vpack.c.bf16 (!%p263_p2), %v311_v7, %v310_v6  ;;  %v312_v9 = vld [vmem:[%s1583_s1 + $0x30] sm:$0xff] (!%p263_p2)  ;;  %v313_v10 = vld [vmem:[%s1583_s1 + $0x38] sm:$0xff] (!%p263_p2)  ;;  %v314_v13 = vld [vmem:[%s1583_s1 + $0x40] sm:$0xff] (!%p263_p2)  ;;  %410 = vst.msk [vmem:[#allocation2 + $0x18] sm:$0x3f] (!%p263_p2), %vm406_vm0, %v1288_v26  ;;  %v1289_v30 = vmov (!%p263_p2), 0.0|0.0  }
   0x8   : > { %1190 = vmatprep.subr.bf16.mxu0 (!%p263_p2), %v1189_v3  ;;  %v1201_v12 = vpack.c.bf16 (!%p263_p2), %v313_v10, %v312_v9  ;;  %v315_v14 = vld [vmem:[%s1583_s1 + $0x48] sm:$0xff] (!%p263_p2)  ;;  %v316_v16 = vld [vmem:[%s1583_s1 + $0x50] sm:$0xff] (!%p263_p2)  ;;  %v317_v17 = vld [vmem:[%s1583_s1 + $0x58] sm:$0xff] (!%p263_p2)  ;;  %411 = vst.msk [vmem:[#allocation2 + $0x20] sm:$0x3f] (!%p263_p2), %vm406_vm0, %v1288_v26  ;;  %1221 = vmatprep.subr.bf16.mxu1 (!%p263_p2), %v1289_v30  ;;  %vm1290_vm1 = vmmov (!%p263_p2), 0  }
   0x9   : > { %1192 = vmatpush3.bf16.msra.mxu0 (!%p263_p2), %v1189_v3  ;;  %v1205_v15 = vpack.c.bf16 (!%p263_p2), %v315_v14, %v314_v13  ;;  %v1209_v18 = vpack.c.bf16 (!%p263_p2), %v317_v17, %v316_v16  ;;  %v318_v19 = vld [vmem:[%s1583_s1 + $0x60] sm:$0xff] (!%p263_p2)  ;;  %v319_v20 = vld [vmem:[%s1583_s1 + $0x68] sm:$0xff] (!%p263_p2)  ;;  %v320_v22 = vld [vmem:[%s1583_s1 + $0x70] sm:$0xff] (!%p263_p2)  ;;  %412 = vst.msk [vmem:[#allocation2 + $0x28] sm:$0x3f] (!%p263_p2), %vm406_vm0, %v1288_v26  ;;  %1129 = vmatprep.mubr.msk.f32.mxu1 (!%p263_p2), %vm1290_vm1, %v1288_v26  ;;  %v430_v41 = vshrl.u32 (!%p263_p2), %v429_v40, 7 }
   0xa   : > { %1194 = vmatprep.subr.bf16.mxu0 (!%p263_p2), %v1193_v5  ;;  %v1213_v21 = vpack.c.bf16 (!%p263_p2), %v319_v20, %v318_v19  ;;  %v321_v23 = vld [vmem:[%s1583_s1 + $0x78] sm:$0xff] (!%p263_p2)  ;;  %408 = vst.msk [vmem:[#allocation2 + $0x8] sm:$0x3f] (!%p263_p2), %vm406_vm0, %v1288_v26  ;;  %409 = vst.msk [vmem:[#allocation2 + $0x10] sm:$0x3f] (!%p263_p2), %vm406_vm0, %v1288_v26  ;;  %v580_v27 = vld [vmem:[%s1587_s5] sm:$0xff] (!%p263_p2) }
   0xb   : > { %v1217_v24 = vpack.c.bf16 (!%p263_p2), %v321_v23, %v320_v22  ;;  %590 = vst [vmem:[#allocation3] sm:$0x3f] (!%p263_p2), %v1288_v26  ;;  %591 = vst [vmem:[#allocation3 + $0x8] sm:$0x3f] (!%p263_p2), %v1288_v26  ;;  %v581_v28 = vld [vmem:[%s1587_s5 + $0x8] sm:$0xff] (!%p263_p2)  ;;  %v582_v29 = vld [vmem:[%s1587_s5 + $0x10] sm:$0xff] (!%p263_p2) }
   0xc   : > { %592 = vst [vmem:[#allocation3 + $0x10] sm:$0x3f] (!%p263_p2), %v1288_v26  ;;  %593 = vst [vmem:[#allocation3 + $0x18] sm:$0x3f] (!%p263_p2), %v1288_v26  ;;  %v1429_v31 = vpack.c.bf16 (!%p263_p2), %v581_v28, %v580_v27  ;;  %v583_v32 = vld [vmem:[%s1587_s5 + $0x18] sm:$0xff] (!%p263_p2)  ;;  %v584_v34 = vld [vmem:[%s1587_s5 + $0x20] sm:$0xff] (!%p263_p2) }
   0xd   : > { %s1592_s28 = smov (!%p295_p3, %s1004_s28), 1  ;;  %1196 = vmatpush3.bf16.msra.mxu0 %v1193_v5  ;;  %594 = vst [vmem:[#allocation3 + $0x20] sm:$0x3f] %v1288_v26  ;;  %v1440_v33 = vpack.c.bf16 %v583_v32, %v582_v29  ;;  %v585_v35 = vld [vmem:[%s1587_s5 + $0x28] sm:$0xff]  ;;  %v586_v37 = vld [vmem:[%s1587_s5 + $0x30] sm:$0xff]  ;;  %v587_v38 = vld [vmem:[%s1587_s5 + $0x38] sm:$0xff] }
   0xe   : > { %s1023_s19 = sshll.u32 %s1592_s28, 4  ;;  %1198 = vmatprep.subr.bf16.mxu0 %v1197_v8  ;;  %1223 = vmatpush3.bf16.msra.mxu1 %v1429_v31  ;;  %v1452_v36 = vpack.c.bf16 %v585_v35, %v584_v34  ;;  %v1464_v39 = vpack.c.bf16 %v587_v38, %v586_v37  ;;  %v431_v42 = vsub.s32 0, %v430_v41  ;;  %v447_v43 = vsub.s32 1, %v430_v41  ;;  %v423_v44 = vld [vmem:[%s1585_s3] sm:$0xff]  ;;  %s1011_s11 = sshll.u32 %s1592_s28, 2 }
   0xf   : > { %s1368_s22 = scalar_lea.vmem %s1582_s0, %s1023_s19  ;;  %1224 = vmatprep.subr.bf16.mxu1 %v1289_v30  ;;  %v1012_v45 = vld [vmem:[%s1584_s2] ss:$0 sm:$0xff]  ;;  %v463_v49 = vsub.s32 2, %v430_v41  ;;  %v441_v53 = vld [vmem:[#allocation2 + $0x1] sm:$0xf]  ;;  %vm414_vm2 = vcmask 519168   ;;  %s303_s14 = scalar_lea.vmem %s1590_s8, %s1011_s11 }
  0x10   : > { %v1377_v11 = vld [vmem:[%s1368_s22] sm:$0xff]  ;;  %v1405_v25 = vld [vmem:[%s1368_s22 + $0x8] sm:$0xff]  ;;  %v1478_v47 = vrot.slane %v423_v44, %v431_v42  ;;  %v1480_v48 = vrot.slane %v423_v44, %v447_v43  ;;  %vm417_vm3 = vcmask 523268   ;;  %v479_v61 = vsub.s32 3, %v430_v41 }
  0x11   : > { %1110 = vmatprep.mubr.f32.mxu0 %v1377_v11  ;;  %1200 = vmatpush3.bf16.msra.mxu0 %v1197_v8  ;;  %v425_v52 = vld [vmem:[#allocation2] sm:$0xf]  ;;  %v1484_v59 = vrot.slane %v423_v44, %v463_v49  ;;  %v495_v0 = vsub.s32 4, %v430_v41  ;;  %v511_v1 = vsub.s32 5, %v430_v41  ;;  %v527_v3 = vsub.s32 6, %v430_v41 }
  0x12   : > { %1202 = vmatprep.subr.bf16.mxu0 %v1201_v12  ;;  %1226 = vmatpush3.bf16.msra.mxu1 %v1440_v33  ;;  %v433_v57 = vmul.f32 %v1478_v47, %v425_v52  ;;  %v449_v58 = vmul.f32 %v1480_v48, %v441_v53  ;;  %v457_v60 = vld [vmem:[#allocation2 + $0x2] sm:$0xf]  ;;  %v1487_v2 = vrot.slane %v423_v44, %v479_v61  ;;  %v543_v9 = vsub.s32 7, %v430_v41  ;;  %v1508_v42 = vld [vmem:[%s1585_s3 + $0x8] ss:$0 sm:$0xff] }
  0x13   : > { %1227 = vmatprep.subr.bf16.mxu1 %v1289_v30  ;;  %v465_v63 = vmul.f32 %v1484_v59, %v457_v60  ;;  %v1489_v5 = vrot.slane %v423_v44, %v495_v0  ;;  %v1491_v8 = vrot.slane %v423_v44, %v511_v1  ;;  %v1494_v13 = vrot.slane %v423_v44, %v527_v3 }
  0x14   : > { %v453_v62 = vadd.f32 %v449_v58, %v433_v57  ;;  %vm602_vm4 = vcmask 523264  }
  0x15   : > { %1204 = vmatpush3.bf16.msra.mxu0 %v1201_v12 }
  0x16   : > { %1206 = vmatprep.subr.bf16.mxu0 %v1205_v15  ;;  %1229 = vmatpush3.bf16.msra.mxu1 %v1452_v36  ;;  %v469_v4 = vadd.f32 %v465_v63, %v453_v62 }
  0x17   : > { %1230 = vmatprep.subr.bf16.mxu1 %v1289_v30 }
  0x19   : > { %1208 = vmatpush3.bf16.msra.mxu0 %v1205_v15 }
  0x1a   : > { %1210 = vmatprep.subr.bf16.mxu0 %v1209_v18  ;;  %1232 = vmatpush3.bf16.msra.mxu1 %v1464_v39 }
  0x1b   : > { %1233 = vmatprep.subr.bf16.mxu1 %v1289_v30 }
  0x1d   : > { %1212 = vmatpush3.bf16.msra.mxu0 %v1209_v18 }
  0x1e   : > { %1214 = vmatprep.subr.bf16.mxu0 %v1213_v21 }
  0x21   : > { %1216 = vmatpush3.bf16.msra.mxu0 %v1213_v21 }
  0x22   : > { %1218 = vmatprep.subr.bf16.mxu0 %v1217_v24 }
  0x25   : > { %1220 = vmatpush3.bf16.msra.mxu0 %v1217_v24  ;;  %v1500_v24 = vrot.slane %v423_v44, %v543_v9 }
  0x26   : > { %1245 = vmatprep.subr.bf16.mxu0 %v1289_v30 }
  0x28   : > { %1111 = vmatmul.mubr.f32.vlgmr.msra.gmra.mrb[0].mxu0 %v1405_v25 }
  0x29   : > { %1167 = vmatprep.mubr.msk.f32.mxu0 %vm1290_vm1, %v1288_v26  ;;  %1247 = vmatpush3.bf16.msra.mxu0 %v1429_v31 }
  0x2a   : > { %1248 = vmatprep.subr.bf16.mxu0 %v1289_v30 }
  0x2d   : > { %1250 = vmatpush3.bf16.msra.mxu0 %v1440_v33 }
  0x2e   : > { %1251 = vmatprep.subr.bf16.mxu0 %v1289_v30 }
  0x31   : > { %1253 = vmatpush3.bf16.msra.mxu0 %v1452_v36 }
  0x32   : > { %1254 = vmatprep.subr.bf16.mxu0 %v1289_v30 }
  0x35   : > { %1256 = vmatpush3.bf16.msra.mxu0 %v1464_v39 }
  0xfb   : > { %v1112_v46 = vpop.f32.mrb[0].mxu0 }
  0xfc   : > { %v401_v50 = vadd.f32 %v1112_v46, %v1012_v45  ;;  %v395_v51 = vpop.f32.mrb[1].mxu0 }
  0xfd   : > { %v396_v54 = vadd.f32 %v1012_v45, %v395_v51 }
  0xfe   : > { %v405_v55 = vmax.f32 %v401_v50, 0.0 }
  0xff   : > { %v404_v56 = vmax.f32 %v396_v54, 0.0 }
 0x100   : > { %420 = vst.msk [vmem:[#allocation2 + $0x19] sm:$0xf] %vm414_vm2, %v405_v55 }
 0x101   : > { %422 = vst.msk [vmem:[#allocation2 + $0x1d] sm:$0xf0] %vm417_vm3, %v405_v55  ;;  %418 = vst.msk [vmem:[#allocation2 + $0xd] sm:$0xf0] %vm417_vm3, %v404_v56 }
 0x102   : > { %415 = vst.msk [vmem:[#allocation2 + $0x9] sm:$0xf] %vm414_vm2, %v404_v56 }
 0x107   : > { %v475_v22 = vld [vmem:[#allocation2 + $0x18] sm:$0xf] }
 0x108   : > { %v427_v14 = vld [vmem:[#allocation2 + $0x10] sm:$0xf]  ;;  %v491_v38 = vld [vmem:[#allocation2 + $0x19] sm:$0xf]  ;;  %v483_v44 = vmul.f32 %v1487_v2, %v475_v22  ;;  %v523_v62 = vld [vmem:[#allocation2 + $0x20] sm:$0xf] }
 0x109   : > { %v473_v6 = vld [vmem:[#allocation2 + $0x8] sm:$0xf]  ;;  %v443_v15 = vld [vmem:[#allocation2 + $0x11] sm:$0xf]  ;;  %v435_v20 = vmul.f32 %v1478_v47, %v427_v14  ;;  %v507_v45 = vld [vmem:[#allocation2 + $0x1a] sm:$0xf]  ;;  %v499_v57 = vmul.f32 %v1489_v5, %v491_v38 }
 0x10a   : > { %v489_v7 = vld [vmem:[#allocation2 + $0x9] sm:$0xf]  ;;  %v481_v10 = vmul.f32 %v1487_v2, %v473_v6  ;;  %v459_v16 = vld [vmem:[#allocation2 + $0x12] sm:$0xf]  ;;  %v451_v21 = vmul.f32 %v1480_v48, %v443_v15  ;;  %v428_v55 = vld [vmem:[#allocation2 + $0x18] sm:$0xf]  ;;  %v515_v3 = vmul.f32 %v1491_v8, %v507_v45 }
 0x10b   : > { %v505_v12 = vld [vmem:[#allocation2 + $0xa] sm:$0xf]  ;;  %v497_v18 = vmul.f32 %v1489_v5, %v489_v7  ;;  %v521_v19 = vld [vmem:[#allocation2 + $0x10] sm:$0xf]  ;;  %v467_v27 = vmul.f32 %v1484_v59, %v459_v16  ;;  %v444_v58 = vld [vmem:[#allocation2 + $0x19] sm:$0xf]  ;;  %v436_v7 = vmul.f32 %v1478_v47, %v428_v55 }
 0x10c   : > { %v485_v17 = vadd.f32 %v481_v10, %v469_v4  ;;  %v513_v23 = vmul.f32 %v1491_v8, %v505_v12  ;;  %v426_v28 = vld [vmem:[#allocation2 + $0x8] sm:$0xf]  ;;  %v537_v35 = vld [vmem:[#allocation2 + $0x11] sm:$0xf]  ;;  %v455_v37 = vadd.f32 %v451_v21, %v435_v20  ;;  %v529_v43 = vmul.f32 %v1494_v13, %v521_v19  ;;  %v539_v12 = vld [vmem:[#allocation2 + $0x21] sm:$0xf] }
 0x10d   : > { %v442_v29 = vld [vmem:[#allocation2 + $0x9] sm:$0xf]  ;;  %v434_v40 = vmul.f32 %v1478_v47, %v426_v28  ;;  %v474_v46 = vld [vmem:[#allocation2 + $0x10] sm:$0xf]  ;;  %v545_v56 = vmul.f32 %v1500_v24, %v537_v35  ;;  %v452_v15 = vmul.f32 %v1480_v48, %v444_v58  ;;  %v1524_v16 = vld [vmem:[%s1586_s4] ss:$0 sm:$0xff]  ;;  %v547_v47 = vmul.f32 %v1500_v24, %v539_v12 }
 0x10e   : > { %v458_v32 = vld [vmem:[#allocation2 + $0xa] sm:$0xf]  ;;  %v501_v34 = vadd.f32 %v497_v18, %v485_v17  ;;  %v450_v41 = vmul.f32 %v1480_v48, %v442_v29  ;;  %v553_v50 = vld [vmem:[#allocation2 + $0x12] sm:$0xf]  ;;  %v471_v51 = vadd.f32 %v467_v27, %v455_v37  ;;  %v482_v0 = vmul.f32 %v1487_v2, %v474_v46  ;;  %v555_v22 = vld [vmem:[#allocation2 + $0x22] sm:$0xf] }
 0x10f   : > { %v466_v53 = vmul.f32 %v1484_v59, %v458_v32  ;;  %v490_v54 = vld [vmem:[#allocation2 + $0x11] sm:$0xf]  ;;  %v561_v1 = vmul.f32 %v1508_v42, %v553_v50  ;;  %v531_v17 = vmul.f32 %v1494_v13, %v523_v62  ;;  %v460_v27 = vld [vmem:[#allocation2 + $0x1a] sm:$0xf]  ;;  %v456_v32 = vadd.f32 %v452_v15, %v436_v7  ;;  %v524_v58 = vld [vmem:[#allocation2 + $0x28] sm:$0xf] }
 0x110   : > { %v517_v49 = vadd.f32 %v513_v23, %v501_v34  ;;  %v454_v52 = vadd.f32 %v450_v41, %v434_v40  ;;  %v487_v61 = vadd.f32 %v483_v44, %v471_v51  ;;  %v498_v4 = vmul.f32 %v1489_v5, %v490_v54  ;;  %v506_v6 = vld [vmem:[#allocation2 + $0x12] sm:$0xf]  ;;  %v522_v23 = vld [vmem:[#allocation2 + $0x18] sm:$0xf]  ;;  %v476_v41 = vld [vmem:[#allocation2 + $0x20] sm:$0xf] }
 0x111   : > { %v514_v21 = vmul.f32 %v1491_v8, %v506_v6  ;;  %v563_v35 = vmul.f32 %v1508_v42, %v555_v22  ;;  %v530_v37 = vmul.f32 %v1494_v13, %v522_v23  ;;  %v468_v38 = vmul.f32 %v1484_v59, %v460_v27  ;;  %v538_v40 = vld [vmem:[#allocation2 + $0x19] sm:$0xf]  ;;  %v492_v51 = vld [vmem:[#allocation2 + $0x21] sm:$0xf] }
 0x112   : > { %v533_v60 = vadd.f32 %v529_v43, %v517_v49  ;;  %v470_v63 = vadd.f32 %v466_v53, %v454_v52  ;;  %v503_v10 = vadd.f32 %v499_v57, %v487_v61  ;;  %v546_v49 = vmul.f32 %v1500_v24, %v538_v40  ;;  %v554_v59 = vld [vmem:[#allocation2 + $0x1a] sm:$0xf] }
 0x113   : > { %v472_v45 = vadd.f32 %v468_v38, %v456_v32  ;;  %v484_v50 = vmul.f32 %v1487_v2, %v476_v41  ;;  %v562_v54 = vmul.f32 %v1508_v42, %v554_v59  ;;  %v500_v55 = vmul.f32 %v1489_v5, %v492_v51  ;;  %v540_v5 = vld [vmem:[#allocation2 + $0x29] sm:$0xf] }
 0x114   : > { %v549_v9 = vadd.f32 %v545_v56, %v533_v60  ;;  %v486_v14 = vadd.f32 %v482_v0, %v470_v63  ;;  %v519_v19 = vadd.f32 %v515_v3, %v503_v10  ;;  %v508_v56 = vld [vmem:[#allocation2 + $0x22] sm:$0xf]  ;;  %v532_v63 = vmul.f32 %v1494_v13, %v524_v58 }
 0x115   : > { %v488_v53 = vadd.f32 %v484_v50, %v472_v45  ;;  %v516_v60 = vmul.f32 %v1491_v8, %v508_v56  ;;  %v548_v0 = vmul.f32 %v1500_v24, %v540_v5  ;;  %v1015_v24 = vld [vmem:[%s1588_s6] ss:$0 sm:$0xff] }
 0x116   : > { %v565_v18 = vadd.f32 %v561_v1, %v549_v9  ;;  %v502_v20 = vadd.f32 %v498_v4, %v486_v14  ;;  %v535_v28 = vadd.f32 %v531_v17, %v519_v19  ;;  %v556_v1 = vld [vmem:[#allocation2 + $0x2a] sm:$0xf] }
 0x117   : > { %v504_v57 = vadd.f32 %v500_v55, %v488_v53  ;;  %v564_v13 = vmul.f32 %v1508_v42, %v556_v1 }
 0x118   : > { %v576_v48 = vadd.f32 %v1524_v16, %v565_v18  ;;  %v518_v29 = vadd.f32 %v514_v21, %v502_v20  ;;  %v551_v34 = vadd.f32 %v547_v47, %v535_v28  ;;  %v925_v21 = vld [vmem:[#allocation3] sm:$0x3f] }
 0x119   : > { %v520_v62 = vadd.f32 %v516_v60, %v504_v57 }
 0x11a   : > { %1130 = vmatmul.mubr.msk.f32.vlgmr.msra.gmra.mrb[0].mxu1 %vm602_vm4, %v576_v48  ;;  %v567_v43 = vadd.f32 %v563_v35, %v551_v34  ;;  %v534_v44 = vadd.f32 %v530_v37, %v518_v29 }
 0x11b   : > { %1235 = vmatpush3.bf16.msra.mxu1 %v1429_v31  ;;  %1148 = vmatprep.mubr.msk.f32.mxu1 %vm1290_vm1, %v1288_v26  ;;  %v536_v8 = vadd.f32 %v532_v63, %v520_v62 }
 0x11c   : > { %1236 = vmatprep.subr.bf16.mxu1 %v1289_v30  ;;  %v578_v46 = vadd.f32 %v1524_v16, %v567_v43  ;;  %v550_v52 = vadd.f32 %v546_v49, %v534_v44 }
 0x11d   : > { %v552_v3 = vadd.f32 %v548_v0, %v536_v8 }
 0x11e   : > { %1168 = vmatmul.mubr.msk.f32.vlgmr.msra.gmra.mrb[2].mxu0 %vm602_vm4, %v578_v46  ;;  %v566_v2 = vadd.f32 %v562_v54, %v550_v52 }
 0x11f   : > { %1238 = vmatpush3.bf16.msra.mxu1 %v1440_v33 }
 0x120   : > { %1239 = vmatprep.subr.bf16.mxu1 %v1289_v30  ;;  %v577_v61 = vadd.f32 %v1524_v16, %v566_v2 }
 0x123   : > { %1241 = vmatpush3.bf16.msra.mxu1 %v1452_v36 }
 0x124   : > { %1242 = vmatprep.subr.bf16.mxu1 %v1289_v30 }
 0x127   : > { %1244 = vmatpush3.bf16.msra.mxu1 %v1464_v39 }
 0x128   : > { %1257 = vmatprep.subr.bf16.mxu1 %v1289_v30 }
 0x12a   : > { %1149 = vmatmul.mubr.msk.f32.vlgmr.msra.gmra.mrb[2].mxu1 %vm602_vm4, %v577_v61 }
 0x12b   : > { %1259 = vmatpush3.bf16.msra.mxu1 %v1429_v31  ;;  %1186 = vmatprep.mubr.msk.f32.mxu1 %vm1290_vm1, %v1288_v26  ;;  %v568_v31 = vadd.f32 %v564_v13, %v552_v3 }
 0x12c   : > { %1260 = vmatprep.subr.bf16.mxu1 %v1289_v30 }
 0x12d   : > { %v579_v26 = vadd.f32 %v1524_v16, %v568_v31 }
 0x12f   : > { %1262 = vmatpush3.bf16.msra.mxu1 %v1440_v33  ;;  %v1017_v33 = vld [vmem:[%s1589_s7] ss:$0 sm:$0xff] }
 0x130   : > { %1263 = vmatprep.subr.bf16.mxu1 %v1289_v30  ;;  %v841_v9 = vmul.f32 %v1017_v33, %v1405_v25 }
 0x132   : > { %v920_v48 = vrot.slane %v841_v9, 4 }
 0x133   : > { %1265 = vmatpush3.bf16.msra.mxu1 %v1452_v36  ;;  %v683_v36 = vmul.f32 %v1017_v33, %v1377_v11 }
 0x134   : > { %1266 = vmatprep.subr.bf16.mxu1 %v1289_v30 }
 0x135   : > { %v762_v17 = vrot.slane %v683_v36, 4 }
 0x137   : > { %1268 = vmatpush3.bf16.msra.mxu1 %v1464_v39 }
 0x13a   : > { %1187 = vmatmul.mubr.msk.f32.vlgmr.msra.gmra.mrb[4].mxu1 %vm602_vm4, %v579_v26 }
 0x1ed   : > { %v672_v42 = vpop.f32.mrb[0].mxu1 }
 0x1ee   : > { %v673_v4 = vadd.f32 %v1015_v24, %v672_v42  ;;  %v1131_v30 = vpop.f32.mrb[1].mxu1 }
 0x1f0   : > { %v676_v6 = vmax.f32 %v673_v4, 0.0 }
 0x1f1   : > { %v836_v39 = vpop.f32.mrb[2].mxu0 }
 0x1f2   : > { %v684_v7 = vadd.f32 %v683_v36, %v676_v6  ;;  %v837_v10 = vadd.f32 %v1015_v24, %v836_v39  ;;  %v1169_v12 = vpop.f32.mrb[3].mxu0 }
 0x1f4   : > { %686 = vst [vmem:[#allocation3 + $0x9] sm:$0xf] %v684_v7  ;;  %v840_v14 = vmax.f32 %v837_v10, 0.0 }
 0x1f6   : > { %v842_v15 = vadd.f32 %v841_v9, %v840_v14 }
 0x1f8   : > { %844 = vst [vmem:[#allocation3 + $0x19] sm:$0xf] %v842_v15 }
 0x1fb   : > { %v926_v47 = vld [vmem:[#allocation3 + $0x8] sm:$0x3f] }
 0x1fc   : > { %v927_v22 = vmax.f32 %v925_v21, %v926_v47 }
 0x1fd   : > { %v756_v16 = vpop.f32.mrb[2].mxu1 }
 0x1fe   : > { %v757_v18 = vadd.f32 %v1015_v24, %v756_v16  ;;  %v1150_v19 = vpop.f32.mrb[3].mxu1 }
 0x1ff   : > { %v940_v44 = vld [vmem:[#allocation3 + $0x18] sm:$0x3f] }
 0x200   : > { %v760_v20 = vmax.f32 %v757_v18, 0.0 }
 0x202   : > { %v764_v11 = vadd.f32 %v762_v17, %v760_v20 }
 0x204   : > { %766 = vst [vmem:[#allocation3 + $0x11] sm:$0xf] %v764_v11 }
 0x20b   : > { %v928_v23 = vld [vmem:[#allocation3 + $0x10] sm:$0x3f] }
 0x20c   : > { %v929_v27 = vmax.f32 %v927_v22, %v928_v23  ;;  %v939_v40 = vld [vmem:[#allocation3 + $0x10] sm:$0x3f] }
 0x20d   : > { %v914_v25 = vpop.f32.mrb[4].mxu1  ;;  %v941_v45 = vmax.f32 %v939_v40, %v940_v44 }
 0x20e   : > { %930 = vst [vmem:[#allocation4] sm:$0x3f] %v929_v27  ;;  %v915_v28 = vadd.f32 %v1015_v24, %v914_v25  ;;  %v1188_v29 = vpop.f32.mrb[5].mxu1 }
 0x210   : > { %v918_v32 = vmax.f32 %v915_v28, 0.0 }
 0x212   : > { %v922_v34 = vadd.f32 %v920_v48, %v918_v32 }
 0x214   : > { %924 = vst [vmem:[#allocation3 + $0x21] sm:$0xf] %v922_v34 }
 0x215   : > { %v931_v35 = vld [vmem:[#allocation4] ss:$2 sm:$0x3]  ;;  %v933_v37 = vld [vmem:[#allocation4 + $0x1] ss:$2 sm:$0x3] }
 0x216   : > { %v934_v38 = vmax.f32 %v931_v35, %v933_v37  ;;  %v936_v41 = vld [vmem:[#allocation4 + $0x2] ss:$2 sm:$0x3] }
 0x218   : > { %v937_v43 = vmax.f32 %v934_v38, %v936_v41 }
 0x21a   : > { %938 = vst [vmem:[%s303_s14] sm:$0x3] %v937_v43 }
 0x21b   : > { %v942_v46 = vld [vmem:[#allocation3 + $0x20] sm:$0x3f] }
 0x21c   : > { %v943_v49 = vmax.f32 %v941_v45, %v942_v46 }
 0x21e   : > { %944 = vst [vmem:[#allocation4] sm:$0x3f] %v943_v49 }
 0x225   : > { %v945_v50 = vld [vmem:[#allocation4] ss:$2 sm:$0x3]  ;;  %v946_v59 = vld [vmem:[#allocation4 + $0x1] ss:$2 sm:$0x3] }
 0x226   : > { %v947_v51 = vmax.f32 %v945_v50, %v946_v59  ;;  %v948_v52 = vld [vmem:[#allocation4 + $0x2] ss:$2 sm:$0x3] }
 0x228   : > { %v949_v53 = vmax.f32 %v947_v51, %v948_v52 }
 0x22a   : > { %950 = vst [vmem:[%s303_s14 + $0x2] sm:$0x3] %v949_v53 }
 0x22b PF: > { %s18_s27 = sadd.s32 1, %s1286_s27  }
 0x22c   : > { %p15_p4 = scmp.ge.s32.totalorder %s18_s27, 4  }
 0x22e   :  { %17 = sbr.rel (!%p15_p4) target bundleno = 1 (0x1), region = 92 }

// kernel: feature_classifier_forward.7
= control target key start
LH: loop header
LB: loop body
LE: loop exit
PB: predicated region body
PF: predicated region fallthrough
CT: control target
= control target key end

     0   :  { %12 = vsyncpa [#allocation3], 0  ;;  %v409_v3 = vmov 0.0|0.0   ;;  %vm410_vm0 = vmmov 0   ;;  %v411_v6 = vmov 0.0   ;;  %vm26_vm1 = vcmask 1043456   ;;  %s554_s0 = inlined_call_operand.vmem [shape: f32[2,4,128], index: 0, kind: input, shape index: {}]   ;;  %s555_s1 = inlined_call_operand.vmem [shape: f32[128,20], index: 1, kind: input, shape index: {}]   ;;  %s556_s2 = inlined_call_operand.vmem [shape: f32[1,20], index: 2, kind: input, shape index: {}]   ;;  %s557_s3 = inlined_call_operand.vmem [shape: f32[20,10], index: 3, kind: input, shape index: {}]   ;;  %s558_s4 = inlined_call_operand.vmem [shape: f32[1,10], index: 4, kind: input, shape index: {}]   ;;  %s559_s5 = inlined_call_operand.hbm [shape: f32[2,20], index: 5, kind: output, shape index: {0}]   ;;  %s560_s6 = inlined_call_operand.hbm [shape: f32[2,10], index: 6, kind: output, shape index: {1}]  }
   0x1   :  { %v43_v0 = vld [vmem:[%s555_s1] sm:$0xff]  ;;  %v44_v1 = vld [vmem:[%s555_s1 + $0x8] sm:$0xff]  ;;  %v45_v2 = vld [vmem:[%s555_s1 + $0x10] sm:$0xff]  ;;  %329 = vmatprep.subr.bf16.mxu0 %v409_v3  ;;  %317 = vmatprep.mubr.msk.f32.mxu0 %vm410_vm0, %v411_v6 }
   0x2   :  { %v330_v4 = vpack.c.bf16 %v44_v1, %v43_v0  ;;  %v46_v5 = vld [vmem:[%s555_s1 + $0x18] sm:$0xff]  ;;  %353 = vmatprep.subr.bf16.mxu1 %v409_v3  ;;  %326 = vmatprep.mubr.msk.f32.mxu1 %vm410_vm0, %v411_v6  ;;  %v47_v8 = vld [vmem:[%s555_s1 + $0x20] sm:$0xff]  ;;  %v48_v9 = vld [vmem:[%s555_s1 + $0x28] sm:$0xff] }
   0x3   :  { %v333_v7 = vpack.c.bf16 %v46_v5, %v45_v2  ;;  %v24_v10 = vld [vmem:[%s554_s0] sm:$0xf]  ;;  %v25_v11 = vld [vmem:[%s554_s0 + $0x4] sm:$0xf]  ;;  %v142_v15 = vld [vmem:[%s557_s3 + $0x8] sm:$0xff]  ;;  %v336_v16 = vpack.c.bf16 %v48_v9, %v47_v8 }
   0x4   :  { %331 = vmatpush3.bf16.msra.mxu0 %v330_v4  ;;  %v27_v12 = vsel %vm26_vm1, %v24_v10, 0.0  ;;  %v34_v13 = vsel %vm26_vm1, %v25_v11, 0.0  ;;  %v141_v14 = vld [vmem:[%s557_s3] sm:$0xff] }
   0x5   :  { %332 = vmatprep.subr.bf16.mxu0 %v409_v3  ;;  %v28_v17 = vrot.slane %v27_v12, 4  ;;  %v35_v18 = vrot.slane %v34_v13, 4  ;;  %v354_v19 = vpack.c.bf16 %v142_v15, %v141_v14 }
   0x8   :  { %334 = vmatpush3.bf16.msra.mxu0 %v333_v7 }
   0x9   :  { %13 = vsyncpa [#allocation5], 0  ;;  %335 = vmatprep.subr.bf16.mxu0 %v409_v3  ;;  %v49_v20 = vld [vmem:[%s555_s1 + $0x30] sm:$0xff]  ;;  %v50_v21 = vld [vmem:[%s555_s1 + $0x38] sm:$0xff]  ;;  %v29_v22 = vadd.f32 %v28_v17, %v27_v12  ;;  %v36_v23 = vadd.f32 %v35_v18, %v34_v13  ;;  %355 = vmatpush3.bf16.msra.mxu1 %v354_v19  ;;  %vm68_vm2 = vcmask 1041409   ;;  %vm151_vm3 = vcmask 162816  }
   0xa   :  { %324 = vmatprep.subr.mxu1 %v411_v6  ;;  %v339_v24 = vpack.c.bf16 %v50_v21, %v49_v20  ;;  %v51_v27 = vld [vmem:[%s555_s1 + $0x40] sm:$0xff]  ;;  %v52_v28 = vld [vmem:[%s555_s1 + $0x48] sm:$0xff]  ;;  %v53_v32 = vld [vmem:[%s555_s1 + $0x50] sm:$0xff]  ;;  %vm228_vm4 = vcmask 156672  }
   0xb   :  { %v30_v25 = vrot.slane %v29_v22, 2  ;;  %v37_v26 = vrot.slane %v36_v23, 2  ;;  %v342_v29 = vpack.c.bf16 %v52_v28, %v51_v27  ;;  %v54_v33 = vld [vmem:[%s555_s1 + $0x58] sm:$0xff]  ;;  %v55_v37 = vld [vmem:[%s555_s1 + $0x60] sm:$0xff]  ;;  %v56_v38 = vld [vmem:[%s555_s1 + $0x68] sm:$0xff] }
   0xc   :  { %337 = vmatpush3.bf16.msra.mxu0 %v336_v16  ;;  %v345_v34 = vpack.c.bf16 %v54_v33, %v53_v32  ;;  %v348_v39 = vpack.c.bf16 %v56_v38, %v55_v37  ;;  %v57_v42 = vld [vmem:[%s555_s1 + $0x70] sm:$0xff]  ;;  %v58_v43 = vld [vmem:[%s555_s1 + $0x78] sm:$0xff]  ;;  %v260_v49 = vld [vmem:[%s556_s2] ss:$0 sm:$0xff]  ;;  %s412_s1 = smov [#allocation2]  }
   0xd   :  { %338 = vmatprep.subr.bf16.mxu0 %v409_v3  ;;  %v31_v30 = vadd.f32 %v30_v25, %v29_v22  ;;  %v38_v31 = vadd.f32 %v37_v26, %v36_v23  ;;  %v351_v44 = vpack.c.bf16 %v58_v43, %v57_v42  ;;  %v143_v48 = vld [vmem:[%s557_s3 + $0x10] sm:$0xf]  ;;  %s238_s16 = sshll.u32 %s412_s1, 4  ;;  %s239_s16 = int_to_ptr.vmem [resolvable:$true] %s238_s16 }
   0xe   :  { %325 = vmatpush3.msk.msra.mxu1 %vm26_vm1, %v143_v48  ;;  %s361_s0 = scalar_lea.vmem %s239_s16, 32  ;;  %p366_p1 = scmp.lt.s32.totalorder %s239_s16, %s239_s16 }
   0xf   :  { %v32_v35 = vrot.slane %v31_v30, 1  ;;  %v39_v36 = vrot.slane %v38_v31, 1  ;;  %p362_p0 = scmp.ne.s32.totalorder %s239_s16, %s361_s0  ;;  %p367_p2 = scmp.lt.s32.totalorder %s361_s0, %s361_s0 }
  0x10   :  { %340 = vmatpush3.bf16.msra.mxu0 %v339_v24 }
  0x11   :  { %341 = vmatprep.subr.bf16.mxu0 %v409_v3  ;;  %v33_v40 = vadd.f32 %v32_v35, %v31_v30  ;;  %v40_v41 = vadd.f32 %v39_v36, %v38_v31  ;;  %p368_p3 = por %p367_p2, %p366_p1 }
  0x13   :  { %v41_v45 = vmul.f32 0.25, %v33_v40  ;;  %v42_v46 = vmul.f32 0.25, %v40_v41  ;;  %p369_p4 = pnand %p368_p3, %p362_p0 }
  0x14   :  { %343 = vmatpush3.bf16.msra.mxu0 %v342_v29 }
  0x15   :  { %344 = vmatprep.subr.bf16.mxu0 %v409_v3  ;;  %v69_v47 = vsel %vm68_vm2, %v42_v46, %v41_v45 }
  0x18   :  { %346 = vmatpush3.bf16.msra.mxu0 %v345_v34 }
  0x19   :  { %347 = vmatprep.subr.bf16.mxu0 %v409_v3 }
  0x1c   :  { %349 = vmatpush3.bf16.msra.mxu0 %v348_v39 }
  0x1d   :  { %350 = vmatprep.subr.bf16.mxu0 %v409_v3 }
  0x20   :  { %352 = vmatpush3.bf16.msra.mxu0 %v351_v44 }
  0x23   :  { %318 = vmatmul.mubr.f32.vlgmr.msra.gmra.mrb[0].mxu0 %v69_v47 }
  0xf6   :  { %v137_v50 = vpop.f32.mrb[0].mxu0 }
  0xf7   :  { %v138_v51 = vadd.f32 %v260_v49, %v137_v50  ;;  %v319_v52 = vpop.f32.mrb[1].mxu0 }
  0xf9   :  { %327 = vmatmul.mubr.msk.f32.vlgmr.msra.gmra.mrb[0].mxu1 %vm151_vm3, %v138_v51  ;;  %229 = vst.msk [vmem:[#allocation2] sm:$0x3] %vm228_vm4, %v138_v51 }
  0xfa   :  { %372 = shalt.err (!%p369_p4)
}
  0xfb   :  { %s373_s2 = scalar_lea.hbm %s559_s5, 32 }
  0xfc   :  { %p374_p5 = scmp.ne.s32.totalorder %s559_s5, %s373_s2  ;;  %p377_p6 = scmp.lt.u32.totalorder %s373_s2, %s559_s5 }
  0xfe   :  { %p379_p7 = pnand %p377_p6, %p374_p5 }
 0x100   :  { %382 = shalt.err (!%p379_p7)
}
 0x101   :  { %241 = dma.vmem_to_hbm [thread:$0]  %s239_s16, 32, %s559_s5, [#allocation3]   ;;  %v261_v53 = vld [vmem:[%s558_s4] ss:$0 sm:$0xff]  ;;  %vm230_vm5 = vcmask 74752  }
 0x102   :  { %s413_s26 = smov [#allocation4]  }
 0x103   :  { %s248_s27 = sshll.u32 %s413_s26, 4  ;;  %s249_s27 = int_to_ptr.vmem [resolvable:$true] %s248_s27 }
 0x104   :  { %s383_s28 = scalar_lea.vmem %s249_s27, 32  ;;  %p388_p9 = scmp.lt.s32.totalorder %s249_s27, %s249_s27 }
 0x105   :  { %p384_p8 = scmp.ne.s32.totalorder %s249_s27, %s383_s28  ;;  %p389_p10 = scmp.lt.s32.totalorder %s383_s28, %s383_s28 }
 0x107   :  { %p390_p11 = por %p389_p10, %p388_p9 }
 0x109   :  { %p391_p12 = pnand %p390_p11, %p384_p8 }
 0x1cc   :  { %v224_v54 = vpop.f32.mrb[0].mxu1 }
 0x1cd   :  { %v225_v55 = vadd.f32 %v261_v53, %v224_v54  ;;  %v328_v56 = vpop.f32.mrb[1].mxu1 }
 0x1cf   :  { %231 = vst.msk [vmem:[#allocation4] sm:$0x3] %vm230_vm5, %v225_v55 }
 0x1d0   :  { %394 = shalt.err (!%p391_p12)
}
 0x1d1   :  { %s395_s30 = scalar_lea.hbm %s560_s6, 32 }
 0x1d2   :  { %p396_p13 = scmp.ne.s32.totalorder %s560_s6, %s395_s30  ;;  %p399_p0 = scmp.lt.u32.totalorder %s395_s30, %s560_s6 }
 0x1d4   :  { %p401_p1 = pnand %p399_p0, %p396_p13 }
 0x1d6   :  { %404 = shalt.err (!%p401_p1)
}
 0x1d7   :  { %251 = dma.vmem_to_hbm [thread:$0]  %s249_s27, 32, %s560_s6, [#allocation5]  }
 0x1d8   :  { %405 = dma.done.wait [#allocation3], 32  }
 0x1d9   :  { %406 = vsyncadd [#allocation3], 4294967264 }
 0x1da   :  { %407 = dma.done.wait [#allocation5], 32  }
 0x1db   :  { %408 = vsyncadd [#allocation5], 4294967264 }
 0x1dc   :  { %258 = vsyncpa [#allocation3], 1 }
 0x1dd   :  { %259 = vsyncpa [#allocation5], 1 }

// kernel: feature_classifier_forward.5
= control target key start
LH: loop header
LB: loop body
LE: loop exit
PB: predicated region body
PF: predicated region fallthrough
CT: control target
= control target key end

     0   :  { %s2065_s27 = smov 0   ;;  %s2564_s0 = inlined_call_operand.vmem [shape: f32[2,64,128], index: 0, kind: input, shape index: {}]   ;;  %s2565_s1 = inlined_call_operand.vmem [shape: f32[128,64], index: 1, kind: input, shape index: {}]   ;;  %s2566_s2 = inlined_call_operand.vmem [shape: f32[1,64], index: 2, kind: input, shape index: {}]   ;;  %s2567_s3 = inlined_call_operand.vmem [shape: f32[9,64], index: 3, kind: input, shape index: {}]   ;;  %s2568_s4 = inlined_call_operand.vmem [shape: f32[1,64], index: 4, kind: input, shape index: {}]   ;;  %s2569_s5 = inlined_call_operand.vmem [shape: f32[64,128], index: 5, kind: input, shape index: {}]   ;;  %s2570_s6 = inlined_call_operand.vmem [shape: f32[1,128], index: 6, kind: input, shape index: {}]   ;;  %s2571_s7 = inlined_call_operand.vmem [shape: f32[1,128], index: 7, kind: input, shape index: {}]   ;;  %s2572_s8 = inlined_call_operand.vmem [shape: f32[2,16,128], index: 8, kind: output, shape index: {}]  }
   0x1 LB: > { %s1552_s28 = sadd.s32 4294967295, %s2015_s27   ;;  %p1556_p0 = scmp.ge.s32.totalorder %s2015_s27, 1  ;;  %s2015_s27 = sphi %s2065_s27, %s18_s27  }
   0x2   : > { %p262_p1 = scmp.lt.s32.totalorder %s2015_s27, 3 }
   0x4   : > { %p263_p2 = pnand %p1556_p0, %p262_p1 }
   0x5   : > { %v314_v0 = vld [vmem:[%s2565_s1] sm:$0xff] (!%p263_p2)  ;;  %v315_v1 = vld [vmem:[%s2565_s1 + $0x8] sm:$0xff] (!%p263_p2)  ;;  %v316_v2 = vld [vmem:[%s2565_s1 + $0x10] sm:$0xff] (!%p263_p2)  ;;  %p296_p3 = scmp.lt.s32.totalorder (!%p263_p2), %s1552_s28, 1  ;;  %vm450_vm0 = vcmask (!%p263_p2), 523264   ;;  %vm452_vm1 = vcmask (!%p263_p2), 517120   ;;  %v498_v48 = vlaneseq (!%p263_p2) }
   0x6   : > { %266 = sbr.rel (%p263_p2) target bundleno = 586 (0x24a), region = 52  ;;  %v1870_v3 = vpack.c.bf16 (!%p263_p2), %v315_v1, %v314_v0  ;;  %v317_v4 = vld [vmem:[%s2565_s1 + $0x18] sm:$0xff] (!%p263_p2)  ;;  %v318_v6 = vld [vmem:[%s2565_s1 + $0x20] sm:$0xff] (!%p263_p2)  ;;  %v319_v7 = vld [vmem:[%s2565_s1 + $0x28] sm:$0xff] (!%p263_p2)  ;;  %v2017_v34 = vmov (!%p263_p2), 0.0   ;;  %v2018_v38 = vmov (!%p263_p2), 0.0|0.0  }
   0x7   : > { %v1874_v5 = vpack.c.bf16 (!%p263_p2), %v317_v4, %v316_v2  ;;  %v1878_v8 = vpack.c.bf16 (!%p263_p2), %v319_v7, %v318_v6  ;;  %v320_v9 = vld [vmem:[%s2565_s1 + $0x30] sm:$0xff] (!%p263_p2)  ;;  %v321_v10 = vld [vmem:[%s2565_s1 + $0x38] sm:$0xff] (!%p263_p2)  ;;  %v2112_v12 = vld [vmem:[%s2571_s7] ss:$0 sm:$0xff] (!%p263_p2)  ;;  %456 = vst.msk [vmem:[#allocation2 + $0x20] sm:$0xff] (!%p263_p2), %vm450_vm0, %v2017_v34  ;;  %1902 = vmatprep.subr.bf16.mxu1 (!%p263_p2), %v2018_v38  ;;  %vm2019_vm2 = vmmov (!%p263_p2), 0  }
   0x8   : > { %1871 = vmatprep.subr.bf16.mxu0 (!%p263_p2), %v1870_v3  ;;  %v1882_v14 = vpack.c.bf16 (!%p263_p2), %v321_v10, %v320_v9  ;;  %v322_v16 = vld [vmem:[%s2565_s1 + $0x40] sm:$0xff] (!%p263_p2)  ;;  %v323_v17 = vld [vmem:[%s2565_s1 + $0x48] sm:$0xff] (!%p263_p2)  ;;  %v324_v19 = vld [vmem:[%s2565_s1 + $0x50] sm:$0xff] (!%p263_p2)  ;;  %457 = vst.msk [vmem:[#allocation2 + $0x28] sm:$0x3] (!%p263_p2), %vm452_vm1, %v2017_v34  ;;  %1734 = vmatprep.mubr.msk.f32.mxu1 (!%p263_p2), %vm2019_vm2, %v2017_v34  ;;  %v499_v49 = vshrl.u32 (!%p263_p2), %v498_v48, 7 }
   0x9   : > { %1873 = vmatpush3.bf16.msra.mxu0 (!%p263_p2), %v1870_v3  ;;  %v1886_v18 = vpack.c.bf16 (!%p263_p2), %v323_v17, %v322_v16  ;;  %v325_v20 = vld [vmem:[%s2565_s1 + $0x58] sm:$0xff] (!%p263_p2)  ;;  %v326_v22 = vld [vmem:[%s2565_s1 + $0x60] sm:$0xff] (!%p263_p2)  ;;  %v327_v23 = vld [vmem:[%s2565_s1 + $0x68] sm:$0xff] (!%p263_p2)  ;;  %451 = vst.msk [vmem:[#allocation2] sm:$0xff] (!%p263_p2), %vm450_vm0, %v2017_v34 }
   0xa   : > { %1875 = vmatprep.subr.bf16.mxu0 (!%p263_p2), %v1874_v5  ;;  %v1890_v21 = vpack.c.bf16 (!%p263_p2), %v325_v20, %v324_v19  ;;  %v1894_v24 = vpack.c.bf16 (!%p263_p2), %v327_v23, %v326_v22  ;;  %v328_v25 = vld [vmem:[%s2565_s1 + $0x70] sm:$0xff] (!%p263_p2)  ;;  %v329_v26 = vld [vmem:[%s2565_s1 + $0x78] sm:$0xff] (!%p263_p2)  ;;  %453 = vst.msk [vmem:[#allocation2 + $0x8] sm:$0x3] (!%p263_p2), %vm452_vm1, %v2017_v34  ;;  %455 = vst.msk [vmem:[#allocation2 + $0x18] sm:$0x3] (!%p263_p2), %vm452_vm1, %v2017_v34 }
   0xb   : > { %v1898_v27 = vpack.c.bf16 (!%p263_p2), %v329_v26, %v328_v25  ;;  %454 = vst.msk [vmem:[#allocation2 + $0x10] sm:$0xff] (!%p263_p2), %vm450_vm0, %v2017_v34  ;;  %458 = vst.msk [vmem:[#allocation2 + $0x30] sm:$0xff] (!%p263_p2), %vm450_vm0, %v2017_v34  ;;  %v757_v35 = vld [vmem:[%s2569_s5] sm:$0xff] (!%p263_p2)  ;;  %v758_v36 = vld [vmem:[%s2569_s5 + $0x8] sm:$0xff] (!%p263_p2)  ;;  %v500_v50 = vsub.s32 (!%p263_p2), 0, %v499_v49  ;;  %v528_v51 = vsub.s32 (!%p263_p2), 1, %v499_v49 }
   0xc   : > { %459 = vst.msk [vmem:[#allocation2 + $0x38] sm:$0x3] (!%p263_p2), %vm452_vm1, %v2017_v34  ;;  %461 = vst.msk [vmem:[#allocation2 + $0x48] sm:$0x3] (!%p263_p2), %vm452_vm1, %v2017_v34  ;;  %v759_v37 = vld [vmem:[%s2569_s5 + $0x10] sm:$0xff] (!%p263_p2)  ;;  %v2233_v39 = vpack.c.bf16 (!%p263_p2), %v758_v36, %v757_v35  ;;  %v760_v40 = vld [vmem:[%s2569_s5 + $0x18] sm:$0xff] (!%p263_p2) }
   0xd   : > { %s2574_s28 = smov (!%p296_p3, %s1552_s28), 1  ;;  %1877 = vmatpush3.bf16.msra.mxu0 %v1874_v5  ;;  %460 = vst.msk [vmem:[#allocation2 + $0x40] sm:$0xff] %vm450_vm0, %v2017_v34  ;;  %462 = vst.msk [vmem:[#allocation2 + $0x50] sm:$0xff] %vm450_vm0, %v2017_v34  ;;  %v2240_v41 = vpack.c.bf16 %v760_v40, %v759_v37  ;;  %v761_v42 = vld [vmem:[%s2569_s5 + $0x20] sm:$0xff]  ;;  %v762_v43 = vld [vmem:[%s2569_s5 + $0x28] sm:$0xff]  ;;  %v556_v57 = vsub.s32 2, %v499_v49 }
   0xe   : > { %s1576_s19 = sshll.u32 %s2574_s28, 6  ;;  %1879 = vmatprep.subr.bf16.mxu0 %v1878_v8  ;;  %463 = vst.msk [vmem:[#allocation2 + $0x58] sm:$0x3] %vm452_vm1, %v2017_v34  ;;  %465 = vst.msk [vmem:[#allocation2 + $0x68] sm:$0x3] %vm452_vm1, %v2017_v34  ;;  %1904 = vmatpush3.bf16.msra.mxu1 %v2233_v39  ;;  %v2256_v44 = vpack.c.bf16 %v762_v43, %v761_v42  ;;  %v763_v45 = vld [vmem:[%s2569_s5 + $0x30] sm:$0xff] }
   0xf   : > { %s2097_s22 = scalar_lea.vmem %s2564_s0, %s1576_s19  ;;  %464 = vst.msk [vmem:[#allocation2 + $0x60] sm:$0xff] %vm450_vm0, %v2017_v34  ;;  %466 = vst.msk [vmem:[#allocation2 + $0x70] sm:$0xff] %vm450_vm0, %v2017_v34  ;;  %1905 = vmatprep.subr.bf16.mxu1 %v2018_v38  ;;  %v764_v46 = vld [vmem:[%s2569_s5 + $0x38] sm:$0xff]  ;;  %v488_v52 = vld [vmem:[%s2567_s3] sm:$0xff]  ;;  %v584_v9 = vsub.s32 3, %v499_v49  ;;  %v696_v25 = vsub.s32 7, %v499_v49 }
  0x10   : > { %v2106_v11 = vld [vmem:[%s2097_s22] sm:$0xff]  ;;  %v313_v13 = vld [vmem:[%s2097_s22 + $0x38] sm:$0xff]  ;;  %v2143_v28 = vld [vmem:[%s2097_s22 + $0x8] sm:$0xff]  ;;  %467 = vst.msk [vmem:[#allocation2 + $0x78] sm:$0x3] %vm452_vm1, %v2017_v34  ;;  %v2268_v47 = vpack.c.bf16 %v764_v46, %v763_v45  ;;  %v2283_v55 = vrot.slane %v488_v52, %v500_v50  ;;  %v2285_v56 = vrot.slane %v488_v52, %v528_v51  ;;  %v2289_v4 = vrot.slane %v488_v52, %v556_v57  ;;  %s1577_s11 = sshll.u32 %s2574_s28, 4 }
  0x11   : > { %1706 = vmatprep.mubr.f32.mxu0 %v2106_v11  ;;  %v2116_v15 = vmul.f32 %v2112_v12, %v313_v13  ;;  %1881 = vmatpush3.bf16.msra.mxu0 %v1878_v8  ;;  %v2146_v29 = vld [vmem:[%s2097_s22 + $0x10] sm:$0xff]  ;;  %v2151_v30 = vld [vmem:[%s2097_s22 + $0x18] sm:$0xff]  ;;  %v2154_v31 = vld [vmem:[%s2097_s22 + $0x20] sm:$0xff]  ;;  %468 = vst.msk [vmem:[#allocation2 + $0x80] sm:$0xff] %vm450_vm0, %v2017_v34  ;;  %v2296_v23 = vrot.slane %v488_v52, %v584_v9  ;;  %s2550_s14 = scalar_lea.vmem %s2572_s8, %s1577_s11 }
  0x12   : > { %1883 = vmatprep.subr.bf16.mxu0 %v1882_v14  ;;  %v2159_v32 = vld [vmem:[%s2097_s22 + $0x28] sm:$0xff]  ;;  %v2162_v33 = vld [vmem:[%s2097_s22 + $0x30] sm:$0xff]  ;;  %469 = vst.msk [vmem:[#allocation2 + $0x88] sm:$0x3] %vm452_vm1, %v2017_v34  ;;  %471 = vst.msk [vmem:[#allocation2 + $0x98] sm:$0x3] %vm452_vm1, %v2017_v34  ;;  %1907 = vmatpush3.bf16.msra.mxu1 %v2240_v41 }
  0x13   : > { %470 = vst.msk [vmem:[#allocation2 + $0x90] sm:$0xff] %vm450_vm0, %v2017_v34  ;;  %768 = vst [vmem:[#allocation3 + $0x8] sm:$0x3] %v2017_v34  ;;  %1908 = vmatprep.subr.bf16.mxu1 %v2018_v38  ;;  %v1561_v53 = vld [vmem:[%s2566_s2] ss:$0 sm:$0xff]  ;;  %v518_v61 = vld [vmem:[#allocation2 + $0x1] sm:$0xff] }
  0x14   : > { %769 = vst [vmem:[#allocation3 + $0x10] sm:$0xff] %v2017_v34  ;;  %770 = vst [vmem:[#allocation3 + $0x18] sm:$0x3] %v2017_v34  ;;  %v490_v60 = vld [vmem:[#allocation2] sm:$0xff]  ;;  %v530_v3 = vmul.f32 %v2285_v56, %v518_v61  ;;  %v2321_v9 = vld [vmem:[%s2567_s3 + $0x8] ss:$0 sm:$0xff] }
  0x15   : > { %1885 = vmatpush3.bf16.msra.mxu0 %v1882_v14  ;;  %771 = vst [vmem:[#allocation3 + $0x20] sm:$0xff] %v2017_v34  ;;  %772 = vst [vmem:[#allocation3 + $0x28] sm:$0x3] %v2017_v34  ;;  %v502_v2 = vmul.f32 %v2283_v55, %v490_v60  ;;  %v546_v7 = vld [vmem:[#allocation2 + $0x2] sm:$0xff] }
  0x16   : > { %1887 = vmatprep.subr.bf16.mxu0 %v1886_v18  ;;  %773 = vst [vmem:[#allocation3 + $0x30] sm:$0xff] %v2017_v34  ;;  %774 = vst [vmem:[#allocation3 + $0x38] sm:$0x3] %v2017_v34  ;;  %1910 = vmatpush3.bf16.msra.mxu1 %v2256_v44 }
  0x17   : > { %775 = vst [vmem:[#allocation3 + $0x40] sm:$0xff] %v2017_v34  ;;  %776 = vst [vmem:[#allocation3 + $0x48] sm:$0x3] %v2017_v34  ;;  %1911 = vmatprep.subr.bf16.mxu1 %v2018_v38  ;;  %v538_v17 = vadd.f32 %v530_v3, %v502_v2 }
  0x18   : > { %777 = vst [vmem:[#allocation3 + $0x50] sm:$0xff] %v2017_v34  ;;  %778 = vst [vmem:[#allocation3 + $0x58] sm:$0x3] %v2017_v34 }
  0x19   : > { %1889 = vmatpush3.bf16.msra.mxu0 %v1886_v18  ;;  %779 = vst [vmem:[#allocation3 + $0x60] sm:$0xff] %v2017_v34  ;;  %780 = vst [vmem:[#allocation3 + $0x68] sm:$0x3] %v2017_v34  ;;  %v558_v18 = vmul.f32 %v2289_v4, %v546_v7 }
  0x1a   : > { %1891 = vmatprep.subr.bf16.mxu0 %v1890_v21  ;;  %781 = vst [vmem:[#allocation3 + $0x70] sm:$0xff] %v2017_v34  ;;  %782 = vst [vmem:[#allocation3 + $0x78] sm:$0x3] %v2017_v34  ;;  %1913 = vmatpush3.bf16.msra.mxu1 %v2268_v47 }
  0x1b   : > { %783 = vst [vmem:[#allocation3 + $0x80] sm:$0xff] %v2017_v34  ;;  %784 = vst [vmem:[#allocation3 + $0x88] sm:$0x3] %v2017_v34  ;;  %1914 = vmatprep.subr.bf16.mxu1 %v2018_v38  ;;  %v566_v36 = vadd.f32 %v558_v18, %v538_v17 }
  0x1d   : > { %1893 = vmatpush3.bf16.msra.mxu0 %v1890_v21  ;;  %v640_v21 = vsub.s32 5, %v499_v49 }
  0x1e   : > { %1895 = vmatprep.subr.bf16.mxu0 %v1894_v24 }
  0x1f   : > { %v2301_v46 = vrot.slane %v488_v52, %v640_v21 }
  0x21   : > { %1897 = vmatpush3.bf16.msra.mxu0 %v1894_v24  ;;  %v668_v24 = vsub.s32 6, %v499_v49 }
  0x22   : > { %1899 = vmatprep.subr.bf16.mxu0 %v1898_v27 }
  0x23   : > { %v2306_v57 = vrot.slane %v488_v52, %v668_v24 }
  0x25   : > { %1901 = vmatpush3.bf16.msra.mxu0 %v1898_v27 }
  0x26   : > { %1926 = vmatprep.subr.bf16.mxu0 %v2018_v38 }
  0x28   : > { %1707 = vmatmul.mubr.f32.vlgmr.msra.gmra.mrb[0].mxu0 %v2143_v28 }
  0x29   : > { %1709 = vmatprep.mubr.f32.mxu0 %v2146_v29  ;;  %1928 = vmatpush3.bf16.msra.mxu0 %v2233_v39 }
  0x2a   : > { %1929 = vmatprep.subr.bf16.mxu0 %v2018_v38 }
  0x2c   : > { %1710 = vmatmul.mubr.f32.gmra.mrb[2].mxu0 %v2151_v30 }
  0x2d   : > { %1712 = vmatprep.mubr.f32.mxu0 %v2154_v31  ;;  %1931 = vmatpush3.bf16.msra.mxu0 %v2240_v41 }
  0x2e   : > { %1932 = vmatprep.subr.bf16.mxu0 %v2018_v38 }
  0x30   : > { %1713 = vmatmul.mubr.f32.gmra.mrb[4].mxu0 %v2159_v32 }
  0x31   : > { %1715 = vmatprep.mubr.f32.mxu0 %v2162_v33  ;;  %1934 = vmatpush3.bf16.msra.mxu0 %v2256_v44 }
  0x32   : > { %1935 = vmatprep.subr.bf16.mxu0 %v2018_v38 }
  0x34   : > { %1716 = vmatmul.mubr.f32.gmra.mrb[6].mxu0 %v313_v13  ;;  %v612_v13 = vsub.s32 4, %v499_v49 }
  0x35   : > { %1772 = vmatprep.mubr.msk.f32.mxu0 %vm2019_vm2, %v2017_v34  ;;  %1937 = vmatpush3.bf16.msra.mxu0 %v2268_v47 }
  0x36   : > { %1950 = vmatprep.subr.bf16.mxu0 %v2018_v38  ;;  %v2298_v27 = vrot.slane %v488_v52, %v612_v13 }
  0xfb   : > { %v1708_v54 = vpop.f32.mrb[0].mxu0 }
  0xfc   : > { %v409_v58 = vadd.f32 %v1708_v54, %v1561_v53  ;;  %v403_v59 = vpop.f32.mrb[1].mxu0 }
  0xfd   : > { %v404_v62 = vadd.f32 %v1561_v53, %v403_v59 }
  0xfe   : > { %v443_v63 = vmax.f32 %v409_v58, 0.0  ;;  %v2308_v58 = vrot.slane %v488_v52, %v696_v25 }
  0xff   : > { %v442_v0 = vmax.f32 %v404_v62, 0.0  ;;  %v1711_v1 = vpop.f32.mrb[2].mxu0 }
 0x100   : > { %475 = vst.msk [vmem:[#allocation2 + $0x21] sm:$0xff] %vm450_vm0, %v443_v63  ;;  %v419_v5 = vadd.f32 %v1711_v1, %v1561_v53  ;;  %v413_v6 = vpop.f32.mrb[3].mxu0 }
 0x101   : > { %473 = vst.msk [vmem:[#allocation2 + $0x11] sm:$0xff] %vm450_vm0, %v442_v0  ;;  %v414_v8 = vadd.f32 %v1561_v53, %v413_v6 }
 0x102   : > { %v445_v10 = vmax.f32 %v419_v5, 0.0 }
 0x103   : > { %v444_v14 = vmax.f32 %v414_v8, 0.0  ;;  %v1714_v16 = vpop.f32.mrb[4].mxu0 }
 0x104   : > { %479 = vst.msk [vmem:[#allocation2 + $0x41] sm:$0xff] %vm450_vm0, %v445_v10  ;;  %v429_v19 = vadd.f32 %v1714_v16, %v1561_v53  ;;  %v423_v20 = vpop.f32.mrb[5].mxu0 }
 0x105   : > { %477 = vst.msk [vmem:[#allocation2 + $0x31] sm:$0xff] %vm450_vm0, %v444_v14  ;;  %v424_v22 = vadd.f32 %v1561_v53, %v423_v20 }
 0x106   : > { %v447_v26 = vmax.f32 %v429_v19, 0.0 }
 0x107   : > { %v446_v35 = vmax.f32 %v424_v22, 0.0  ;;  %v658_v37 = vld [vmem:[#allocation2 + $0x20] sm:$0xff]  ;;  %v1717_v42 = vpop.f32.mrb[6].mxu0 }
 0x108   : > { %v686_v40 = vld [vmem:[#allocation2 + $0x21] sm:$0xff]  ;;  %483 = vst.msk [vmem:[#allocation2 + $0x61] sm:$0xff] %vm450_vm0, %v447_v26  ;;  %v574_v43 = vld [vmem:[#allocation2 + $0x10] sm:$0xff]  ;;  %v504_v50 = vmul.f32 %v658_v37, %v2283_v55  ;;  %v433_v51 = vpop.f32.mrb[7].mxu0  ;;  %v439_v61 = vadd.f32 %v1717_v42, %v1561_v53  ;;  %v670_v17 = vmul.f32 %v2306_v57, %v658_v37 }
 0x109   : > { %v602_v45 = vld [vmem:[#allocation2 + $0x11] sm:$0xff]  ;;  %v714_v48 = vld [vmem:[#allocation2 + $0x22] sm:$0xff]  ;;  %481 = vst.msk [vmem:[#allocation2 + $0x51] sm:$0xff] %vm450_vm0, %v446_v35  ;;  %v586_v49 = vmul.f32 %v2296_v23, %v574_v43  ;;  %v532_v59 = vmul.f32 %v686_v40, %v2285_v56  ;;  %v434_v62 = vadd.f32 %v1561_v53, %v433_v51  ;;  %v503_v63 = vmul.f32 %v574_v43, %v2283_v55 }
 0x10a   : > { %v630_v54 = vld [vmem:[#allocation2 + $0x12] sm:$0xff]  ;;  %v614_v60 = vmul.f32 %v2298_v27, %v602_v45  ;;  %v560_v2 = vmul.f32 %v714_v48, %v2289_v4  ;;  %v531_v3 = vmul.f32 %v602_v45, %v2285_v56  ;;  %v449_v8 = vmax.f32 %v439_v61, 0.0 }
 0x10b   : > { %v594_v0 = vadd.f32 %v586_v49, %v566_v36  ;;  %v540_v1 = vadd.f32 %v532_v59, %v504_v50  ;;  %v642_v5 = vmul.f32 %v2301_v46, %v630_v54  ;;  %v660_v16 = vld [vmem:[#allocation2 + $0x40] sm:$0xff]  ;;  %v448_v18 = vmax.f32 %v434_v62, 0.0 }
 0x10c   : > { %v576_v6 = vld [vmem:[#allocation2 + $0x30] sm:$0xff]  ;;  %487 = vst.msk [vmem:[#allocation2 + $0x81] sm:$0xff] %vm450_vm0, %v449_v8  ;;  %v539_v19 = vadd.f32 %v531_v3, %v503_v63  ;;  %v559_v20 = vmul.f32 %v630_v54, %v2289_v4  ;;  %v698_v22 = vmul.f32 %v2308_v58, %v686_v40  ;;  %v2331_v26 = vld [vmem:[#allocation2 + $0x41] sm:$0xff]  ;;  %v726_v35 = vmul.f32 %v2321_v9, %v714_v48 }
 0x10d   : > { %v604_v7 = vld [vmem:[#allocation2 + $0x31] sm:$0xff]  ;;  %v622_v53 = vadd.f32 %v614_v60, %v594_v0  ;;  %v568_v10 = vadd.f32 %v560_v2, %v540_v1  ;;  %v588_v13 = vmul.f32 %v2296_v23, %v576_v6  ;;  %v672_v36 = vmul.f32 %v2306_v57, %v660_v16  ;;  %485 = vst.msk [vmem:[#allocation2 + $0x71] sm:$0xff] %vm450_vm0, %v448_v18  ;;  %v2339_v49 = vld [vmem:[#allocation2 + $0x42] sm:$0xff] }
 0x10e   : > { %v2316_v52 = vld [vmem:[#allocation2 + $0x32] sm:$0xff]  ;;  %v616_v14 = vmul.f32 %v2298_v27, %v604_v7  ;;  %v567_v42 = vadd.f32 %v559_v20, %v539_v19  ;;  %v587_v43 = vmul.f32 %v658_v37, %v2296_v23  ;;  %v506_v54 = vmul.f32 %v660_v16, %v2283_v55 }
 0x10f   : > { %v650_v21 = vadd.f32 %v642_v5, %v622_v53  ;;  %v596_v24 = vadd.f32 %v588_v13, %v568_v10  ;;  %v644_v25 = vmul.f32 %v2301_v46, %v2316_v52  ;;  %v534_v59 = vmul.f32 %v2331_v26, %v2285_v56  ;;  %v2356_v5 = vld [vmem:[%s2568_s4] ss:$0 sm:$0xff] }
 0x110   : > { %v2337_v45 = vld [vmem:[#allocation2 + $0x50] sm:$0xff]  ;;  %v700_v61 = vmul.f32 %v2308_v58, %v2331_v26  ;;  %v595_v62 = vadd.f32 %v587_v43, %v567_v42  ;;  %v615_v63 = vmul.f32 %v686_v40, %v2298_v27  ;;  %v562_v37 = vmul.f32 %v2339_v49, %v2289_v4 }
 0x111   : > { %v678_v50 = vadd.f32 %v670_v17, %v650_v21  ;;  %v624_v51 = vadd.f32 %v616_v14, %v596_v24  ;;  %v2344_v60 = vld [vmem:[#allocation2 + $0x51] sm:$0xff]  ;;  %v542_v2 = vadd.f32 %v534_v59, %v506_v54  ;;  %v590_v3 = vmul.f32 %v2296_v23, %v2337_v45  ;;  %v2379_v59 = vld [vmem:[#allocation2 + $0x61] sm:$0xff] }
 0x112   : > { %v728_v8 = vmul.f32 %v2321_v9, %v2339_v49  ;;  %v623_v53 = vadd.f32 %v615_v63, %v595_v62  ;;  %v643_v40 = vmul.f32 %v714_v48, %v2301_v46  ;;  %v618_v10 = vmul.f32 %v2298_v27, %v2344_v60  ;;  %v2363_v13 = vld [vmem:[#allocation2 + $0x52] sm:$0xff]  ;;  %v2385_v63 = vld [vmem:[#allocation2 + $0x62] sm:$0xff] }
 0x113   : > { %v706_v0 = vadd.f32 %v698_v22, %v678_v50  ;;  %v652_v1 = vadd.f32 %v644_v25, %v624_v51  ;;  %v570_v18 = vadd.f32 %v562_v37, %v542_v2  ;;  %v505_v19 = vmul.f32 %v576_v6, %v2283_v55  ;;  %v2367_v22 = vld [vmem:[#allocation2 + $0x60] sm:$0xff] }
 0x114   : > { %v651_v20 = vadd.f32 %v643_v40, %v623_v53  ;;  %v671_v21 = vmul.f32 %v2306_v57, %v576_v6  ;;  %v533_v24 = vmul.f32 %v604_v7, %v2285_v56  ;;  %v561_v48 = vmul.f32 %v2316_v52, %v2289_v4 }
 0x115   : > { %v734_v14 = vadd.f32 %v726_v35, %v706_v0  ;;  %v680_v17 = vadd.f32 %v672_v36, %v652_v1  ;;  %v598_v43 = vadd.f32 %v590_v3, %v570_v18  ;;  %v646_v35 = vmul.f32 %v2301_v46, %v2363_v13  ;;  %v2389_v0 = vld [vmem:[#allocation2 + $0x70] sm:$0xff] }
 0x116   : > { %v699_v36 = vmul.f32 %v2308_v58, %v604_v7  ;;  %v541_v50 = vadd.f32 %v533_v24, %v505_v19  ;;  %v674_v54 = vmul.f32 %v2306_v57, %v2367_v22  ;;  %v589_v62 = vmul.f32 %v660_v16, %v2296_v23 }
 0x117   : > { %v749_v25 = vadd.f32 %v2356_v5, %v734_v14  ;;  %v708_v42 = vadd.f32 %v700_v61, %v680_v17  ;;  %v626_v51 = vadd.f32 %v618_v10, %v598_v43  ;;  %v679_v61 = vadd.f32 %v671_v21, %v651_v20  ;;  %v2408_v20 = vld [vmem:[#allocation2 + $0x71] sm:$0xff] }
 0x118   : > { %v569_v7 = vadd.f32 %v561_v48, %v541_v50  ;;  %v508_v37 = vmul.f32 %v2367_v22, %v2283_v55  ;;  %v536_v16 = vmul.f32 %v2379_v59, %v2285_v56  ;;  %v564_v3 = vmul.f32 %v2385_v63, %v2289_v4 }
 0x119   : > { %1735 = vmatmul.mubr.msk.f32.vlgmr.msra.gmra.mrb[0].mxu1 %vm450_vm0, %v749_v25  ;;  %v736_v6 = vadd.f32 %v728_v8, %v708_v42  ;;  %v654_v2 = vadd.f32 %v646_v35, %v626_v51  ;;  %v702_v8 = vmul.f32 %v2308_v58, %v2379_v59  ;;  %v727_v53 = vmul.f32 %v2321_v9, %v2316_v52  ;;  %v2418_v42 = vld [vmem:[#allocation2 + $0x72] sm:$0xff] }
 0x11a   : > { %1916 = vmatpush3.bf16.msra.mxu1 %v2233_v39  ;;  %1753 = vmatprep.mubr.msk.f32.mxu1 %vm2019_vm2, %v2017_v34  ;;  %v544_v10 = vadd.f32 %v536_v16, %v508_v37  ;;  %v592_v14 = vmul.f32 %v2296_v23, %v2389_v0  ;;  %v707_v17 = vadd.f32 %v699_v36, %v679_v61  ;;  %v664_v61 = vld [vmem:[#allocation2 + $0x80] sm:$0xff] }
 0x11b   : > { %1917 = vmatprep.subr.bf16.mxu1 %v2018_v38  ;;  %v751_v1 = vadd.f32 %v2356_v5, %v736_v6  ;;  %v682_v40 = vadd.f32 %v674_v54, %v654_v2  ;;  %v597_v18 = vadd.f32 %v589_v62, %v569_v7  ;;  %v617_v19 = vmul.f32 %v2331_v26, %v2298_v27 }
 0x11c   : > { %v572_v52 = vadd.f32 %v564_v3, %v544_v10  ;;  %v730_v24 = vmul.f32 %v2321_v9, %v2385_v63  ;;  %v620_v25 = vmul.f32 %v2298_v27, %v2408_v20  ;;  %v735_v26 = vadd.f32 %v727_v53, %v707_v17 }
 0x11d   : > { %1773 = vmatmul.mubr.msk.f32.vlgmr.msra.gmra.mrb[8].mxu0 %vm450_vm0, %v751_v1  ;;  %v710_v21 = vadd.f32 %v702_v8, %v682_v40  ;;  %v625_v43 = vadd.f32 %v617_v19, %v597_v18  ;;  %v645_v35 = vmul.f32 %v2339_v49, %v2301_v46  ;;  %v507_v36 = vmul.f32 %v2337_v45, %v2283_v55  ;;  %v692_v8 = vld [vmem:[#allocation2 + $0x81] sm:$0xff] }
 0x11e   : > { %1919 = vmatpush3.bf16.msra.mxu1 %v2240_v41  ;;  %1952 = vmatpush3.bf16.msra.mxu0 %v2233_v39  ;;  %v600_v48 = vadd.f32 %v592_v14, %v572_v52  ;;  %v535_v50 = vmul.f32 %v2344_v60, %v2285_v56  ;;  %v673_v51 = vmul.f32 %v2306_v57, %v2337_v45  ;;  %v720_v18 = vld [vmem:[#allocation2 + $0x82] sm:$0xff]  ;;  %v665_v52 = vld [vmem:[#allocation2 + $0x90] sm:$0xff] }
 0x11f   : > { %1920 = vmatprep.subr.bf16.mxu1 %v2018_v38  ;;  %1953 = vmatprep.subr.bf16.mxu0 %v2018_v38  ;;  %v738_v6 = vadd.f32 %v730_v24, %v710_v21  ;;  %v648_v54 = vmul.f32 %v2301_v46, %v2418_v42  ;;  %v509_v49 = vmul.f32 %v2389_v0, %v2283_v55 }
 0x120   : > { %1810 = vmatprep.mubr.msk.f32.mxu0 %vm2019_vm2, %v2017_v34  ;;  %v628_v62 = vadd.f32 %v620_v25, %v600_v48  ;;  %v537_v7 = vmul.f32 %v2408_v20, %v2285_v56  ;;  %v565_v37 = vmul.f32 %v2418_v42, %v2289_v4  ;;  %v750_v1 = vadd.f32 %v2356_v5, %v735_v26  ;;  %v693_v25 = vld [vmem:[#allocation2 + $0x91] sm:$0xff] }
 0x121   : > { %v653_v45 = vadd.f32 %v645_v35, %v625_v43  ;;  %v563_v2 = vmul.f32 %v2363_v13, %v2289_v4  ;;  %v543_v55 = vadd.f32 %v535_v50, %v507_v36  ;;  %v593_v56 = vmul.f32 %v664_v61, %v2296_v23  ;;  %v721_v50 = vld [vmem:[#allocation2 + $0x92] sm:$0xff] }
 0x122   : > { %1922 = vmatpush3.bf16.msra.mxu1 %v2256_v44  ;;  %1955 = vmatpush3.bf16.msra.mxu0 %v2240_v41  ;;  %v545_v16 = vadd.f32 %v537_v7, %v509_v49  ;;  %v676_v3 = vmul.f32 %v2306_v57, %v664_v61  ;;  %v753_v53 = vadd.f32 %v2356_v5, %v738_v6 }
 0x123   : > { %1923 = vmatprep.subr.bf16.mxu1 %v2018_v38  ;;  %1956 = vmatprep.subr.bf16.mxu0 %v2018_v38  ;;  %v656_v40 = vadd.f32 %v648_v54, %v628_v62  ;;  %v621_v14 = vmul.f32 %v692_v8, %v2298_v27  ;;  %v681_v4 = vadd.f32 %v673_v51, %v653_v45 }
 0x124   : > { %v573_v10 = vadd.f32 %v565_v37, %v545_v16  ;;  %v701_v17 = vmul.f32 %v2308_v58, %v2344_v60  ;;  %v591_v19 = vmul.f32 %v2367_v22, %v2296_v23  ;;  %v571_v21 = vadd.f32 %v563_v2, %v543_v55 }
 0x125   : > { %v649_v48 = vmul.f32 %v720_v18, %v2301_v46  ;;  %v684_v60 = vadd.f32 %v676_v3, %v656_v40  ;;  %v704_v26 = vmul.f32 %v2308_v58, %v692_v8  ;;  %v677_v23 = vmul.f32 %v2306_v57, %v665_v52 }
 0x126   : > { %1925 = vmatpush3.bf16.msra.mxu1 %v2268_v47  ;;  %1958 = vmatpush3.bf16.msra.mxu0 %v2256_v44  ;;  %v601_v24 = vadd.f32 %v593_v56, %v573_v10  ;;  %v729_v22 = vmul.f32 %v2321_v9, %v2363_v13  ;;  %v619_v35 = vmul.f32 %v2379_v59, %v2298_v27 }
 0x127   : > { %1938 = vmatprep.subr.bf16.mxu1 %v2018_v38  ;;  %1959 = vmatprep.subr.bf16.mxu0 %v2018_v38  ;;  %v705_v36 = vmul.f32 %v2308_v58, %v693_v25  ;;  %v709_v6 = vadd.f32 %v701_v17, %v681_v4  ;;  %v599_v51 = vadd.f32 %v591_v19, %v571_v21 }
 0x128   : > { %v629_v43 = vadd.f32 %v621_v14, %v601_v24  ;;  %v712_v62 = vadd.f32 %v704_v26, %v684_v60  ;;  %v732_v61 = vmul.f32 %v2321_v9, %v720_v18  ;;  %v733_v49 = vmul.f32 %v2321_v9, %v721_v50  ;;  %v1424_v60 = vld [vmem:[#allocation3 + $0x8] sm:$0x3] }
 0x129   : > { %1754 = vmatmul.mubr.msk.f32.vlgmr.msra.gmra.mrb[2].mxu1 %vm450_vm0, %v750_v1  ;;  %v647_v27 = vmul.f32 %v2385_v63, %v2301_v46  ;;  %v737_v59 = vadd.f32 %v729_v22, %v709_v6  ;;  %v627_v7 = vadd.f32 %v619_v35, %v599_v51  ;;  %v675_v2 = vmul.f32 %v2306_v57, %v2389_v0 }
 0x12a   : > { %1940 = vmatpush3.bf16.msra.mxu1 %v2233_v39  ;;  %1961 = vmatpush3.bf16.msra.mxu0 %v2268_v47  ;;  %v657_v54 = vadd.f32 %v649_v48, %v629_v43  ;;  %v740_v1 = vadd.f32 %v732_v61, %v712_v62  ;;  %v703_v0 = vmul.f32 %v2308_v58, %v2408_v20 }
 0x12b   : > { %1941 = vmatprep.subr.bf16.mxu1 %v2018_v38  ;;  %1974 = vmatprep.subr.bf16.mxu0 %v2018_v38  ;;  %v752_v55 = vadd.f32 %v2356_v5, %v737_v59  ;;  %v655_v46 = vadd.f32 %v647_v27, %v627_v7  ;;  %v731_v3 = vmul.f32 %v2321_v9, %v2418_v42 }
 0x12c   : > { %1791 = vmatprep.mubr.msk.f32.mxu1 %vm2019_vm2, %v2017_v34  ;;  %v685_v13 = vadd.f32 %v677_v23, %v657_v54  ;;  %v755_v16 = vadd.f32 %v2356_v5, %v740_v1  ;;  %v873_v58 = vmul.f32 %v2112_v12, %v2106_v11  ;;  %v951_v11 = vmul.f32 %v2112_v12, %v2143_v28 }
 0x12d   : > { %1811 = vmatmul.mubr.msk.f32.vlgmr.msra.gmra.mrb[10].mxu0 %vm450_vm0, %v753_v53  ;;  %v683_v57 = vadd.f32 %v675_v2, %v655_v46 }
 0x12e   : > { %1943 = vmatpush3.bf16.msra.mxu1 %v2240_v41  ;;  %1976 = vmatpush3.bf16.msra.mxu0 %v2233_v39  ;;  %v713_v37 = vadd.f32 %v705_v36, %v685_v13  ;;  %v1341_v13 = vmul.f32 %v2112_v12, %v2162_v33 }
 0x12f   : > { %1944 = vmatprep.subr.bf16.mxu1 %v2018_v38  ;;  %1977 = vmatprep.subr.bf16.mxu0 %v2018_v38  ;;  %v711_v56 = vadd.f32 %v703_v0, %v683_v57 }
 0x130   : > { %1848 = vmatprep.mubr.msk.f32.mxu0 %vm2019_vm2, %v2017_v34  ;;  %v741_v45 = vadd.f32 %v733_v49, %v713_v37 }
 0x131   : > { %v739_v8 = vadd.f32 %v731_v3, %v711_v56 }
 0x132   : > { %1946 = vmatpush3.bf16.msra.mxu1 %v2256_v44  ;;  %1979 = vmatpush3.bf16.msra.mxu0 %v2240_v41  ;;  %v756_v63 = vadd.f32 %v2356_v5, %v741_v45 }
 0x133   : > { %1947 = vmatprep.subr.bf16.mxu1 %v2018_v38  ;;  %1980 = vmatprep.subr.bf16.mxu0 %v2018_v38  ;;  %v754_v53 = vadd.f32 %v2356_v5, %v739_v8 }
 0x136   : > { %1949 = vmatpush3.bf16.msra.mxu1 %v2268_v47  ;;  %1982 = vmatpush3.bf16.msra.mxu0 %v2256_v44 }
 0x137   : > { %1962 = vmatprep.subr.bf16.mxu1 %v2018_v38  ;;  %1983 = vmatprep.subr.bf16.mxu0 %v2018_v38 }
 0x139   : > { %1792 = vmatmul.mubr.msk.f32.vlgmr.msra.gmra.mrb[4].mxu1 %vm450_vm0, %v752_v55 }
 0x13a   : > { %1964 = vmatpush3.bf16.msra.mxu1 %v2233_v39  ;;  %1985 = vmatpush3.bf16.msra.mxu0 %v2268_v47 }
 0x13b   : > { %1965 = vmatprep.subr.bf16.mxu1 %v2018_v38  ;;  %1829 = vmatprep.mubr.msk.f32.mxu1 %vm2019_vm2, %v2017_v34 }
 0x13d   : > { %1849 = vmatmul.mubr.msk.f32.vlgmr.msra.gmra.mrb[12].mxu0 %vm450_vm0, %v755_v16 }
 0x13e   : > { %1967 = vmatpush3.bf16.msra.mxu1 %v2240_v41 }
 0x13f   : > { %1968 = vmatprep.subr.bf16.mxu1 %v2018_v38 }
 0x142   : > { %1970 = vmatpush3.bf16.msra.mxu1 %v2256_v44 }
 0x143   : > { %1971 = vmatprep.subr.bf16.mxu1 %v2018_v38 }
 0x146   : > { %1973 = vmatpush3.bf16.msra.mxu1 %v2268_v47 }
 0x147   : > { %1986 = vmatprep.subr.bf16.mxu1 %v2018_v38 }
 0x149   : > { %1830 = vmatmul.mubr.msk.f32.vlgmr.msra.gmra.mrb[6].mxu1 %vm450_vm0, %v754_v53 }
 0x14a   : > { %1988 = vmatpush3.bf16.msra.mxu1 %v2233_v39  ;;  %1867 = vmatprep.mubr.msk.f32.mxu1 %vm2019_vm2, %v2017_v34  ;;  %v2526_v39 = vld [vmem:[%s2570_s6] ss:$0 sm:$0xff] }
 0x14b   : > { %1989 = vmatprep.subr.bf16.mxu1 %v2018_v38 }
 0x14e   : > { %1991 = vmatpush3.bf16.msra.mxu1 %v2240_v41 }
 0x14f   : > { %1992 = vmatprep.subr.bf16.mxu1 %v2018_v38 }
 0x152   : > { %1994 = vmatpush3.bf16.msra.mxu1 %v2256_v44 }
 0x153   : > { %1995 = vmatprep.subr.bf16.mxu1 %v2018_v38  ;;  %v1029_v38 = vmul.f32 %v2112_v12, %v2146_v29  ;;  %v1185_v29 = vmul.f32 %v2112_v12, %v2154_v31  ;;  %v1107_v31 = vmul.f32 %v2112_v12, %v2151_v30 }
 0x156   : > { %1997 = vmatpush3.bf16.msra.mxu1 %v2268_v47 }
 0x159   : > { %1868 = vmatmul.mubr.msk.f32.vlgmr.msra.gmra.mrb[8].mxu1 %vm450_vm0, %v756_v63 }
 0x1ec   : > { %v862_v34 = vpop.f32.mrb[0].mxu1 }
 0x1ed   : > { %v863_v41 = vadd.f32 %v2526_v39, %v862_v34  ;;  %v1736_v9 = vpop.f32.mrb[1].mxu1  ;;  %v1263_v34 = vmul.f32 %v2112_v12, %v2159_v32 }
 0x1ef   : > { %v866_v5 = vmax.f32 %v863_v41, 0.0 }
 0x1f0   : > { %v1024_v44 = vpop.f32.mrb[8].mxu0 }
 0x1f1   : > { %v874_v47 = vadd.f32 %v873_v58, %v866_v5  ;;  %v1025_v20 = vadd.f32 %v2526_v39, %v1024_v44  ;;  %v1774_v42 = vpop.f32.mrb[9].mxu0 }
 0x1f3   : > { %876 = vst [vmem:[#allocation3 + $0x11] sm:$0xff] %v874_v47  ;;  %v1028_v40 = vmax.f32 %v1025_v20, 0.0 }
 0x1f5   : > { %v1030_v10 = vadd.f32 %v1029_v38, %v1028_v40 }
 0x1f7   : > { %1032 = vst [vmem:[#allocation3 + $0x31] sm:$0xff] %v1030_v10 }
 0x1fa   : > { %v1425_v26 = vld [vmem:[#allocation3 + $0x10] sm:$0xff]  ;;  %v1426_v43 = vld [vmem:[#allocation3 + $0x18] sm:$0x3] }
 0x1fb   : > { %v1427_v28 = vmax.f32 %v1425_v26, 0.0  ;;  %v1428_v23 = vmax.f32 %v1424_v60, %v1426_v43 }
 0x1fc   : > { %v946_v14 = vpop.f32.mrb[2].mxu1 }
 0x1fd   : > { %v947_v4 = vadd.f32 %v2526_v39, %v946_v14  ;;  %v1755_v17 = vpop.f32.mrb[3].mxu1 }
 0x1fe   : > { %v1445_v46 = vld [vmem:[#allocation3 + $0x30] sm:$0xff]  ;;  %v1446_v63 = vld [vmem:[#allocation3 + $0x38] sm:$0x3] }
 0x1ff   : > { %v950_v18 = vmax.f32 %v947_v4, 0.0 }
 0x200   : > { %v1180_v19 = vpop.f32.mrb[10].mxu0 }
 0x201   : > { %v952_v52 = vadd.f32 %v951_v11, %v950_v18  ;;  %v1181_v21 = vadd.f32 %v2526_v39, %v1180_v19  ;;  %v1812_v24 = vpop.f32.mrb[11].mxu0 }
 0x203   : > { %954 = vst [vmem:[#allocation3 + $0x21] sm:$0xff] %v952_v52  ;;  %v1184_v48 = vmax.f32 %v1181_v21, 0.0 }
 0x205   : > { %v1186_v25 = vadd.f32 %v1185_v29, %v1184_v48 }
 0x207   : > { %1188 = vst [vmem:[#allocation3 + $0x51] sm:$0xff] %v1186_v25 }
 0x20a   : > { %v1429_v22 = vld [vmem:[#allocation3 + $0x20] sm:$0xff]  ;;  %v1430_v35 = vld [vmem:[#allocation3 + $0x28] sm:$0x3] }
 0x20b   : > { %v1431_v36 = vmax.f32 %v1427_v28, %v1429_v22  ;;  %v1432_v50 = vmax.f32 %v1428_v23, %v1430_v35  ;;  %v1444_v2 = vld [vmem:[#allocation3 + $0x28] sm:$0x3]  ;;  %v1447_v16 = vmax.f32 %v1429_v22, %v1445_v46 }
 0x20c   : > { %v1102_v6 = vpop.f32.mrb[4].mxu1  ;;  %v1448_v57 = vmax.f32 %v1444_v2, %v1446_v63 }
 0x20d   : > { %1433 = vst [vmem:[#allocation4] sm:$0xff] %v1431_v36  ;;  %1434 = vst [vmem:[#allocation4 + $0x8] sm:$0x3] %v1432_v50  ;;  %v1103_v51 = vadd.f32 %v2526_v39, %v1102_v6  ;;  %v1793_v54 = vpop.f32.mrb[5].mxu1 }
 0x20e   : > { %v1463_v10 = vld [vmem:[#allocation3 + $0x50] sm:$0xff]  ;;  %v1464_v14 = vld [vmem:[#allocation3 + $0x58] sm:$0x3] }
 0x20f   : > { %v1106_v62 = vmax.f32 %v1103_v51, 0.0 }
 0x210   : > { %v1336_v61 = vpop.f32.mrb[12].mxu0 }
 0x211   : > { %v1108_v49 = vadd.f32 %v1107_v31, %v1106_v62  ;;  %v1337_v27 = vadd.f32 %v2526_v39, %v1336_v61  ;;  %v1850_v59 = vpop.f32.mrb[13].mxu0 }
 0x213   : > { %1110 = vst [vmem:[#allocation3 + $0x41] sm:$0xff] %v1108_v49  ;;  %v1340_v7 = vmax.f32 %v1337_v27, 0.0 }
 0x214   : > { %v1435_v37 = vld [vmem:[#allocation4] ss:$2 sm:$0xf]  ;;  %v1437_v1 = vld [vmem:[#allocation4 + $0x1] ss:$2 sm:$0xf] }
 0x215   : > { %v1438_v30 = vmax.f32 %v1435_v37, %v1437_v1  ;;  %v1342_v45 = vadd.f32 %v1341_v13, %v1340_v7  ;;  %v1440_v55 = vld [vmem:[#allocation4 + $0x2] ss:$2 sm:$0xf] }
 0x217   : > { %v1441_v33 = vmax.f32 %v1438_v30, %v1440_v55  ;;  %1344 = vst [vmem:[#allocation3 + $0x71] sm:$0xff] %v1342_v45 }
 0x219   : > { %1442 = vst [vmem:[%s2550_s14] sm:$0xf] %v1441_v33 }
 0x21a   : > { %v1449_v0 = vld [vmem:[#allocation3 + $0x40] sm:$0xff]  ;;  %v1450_v56 = vld [vmem:[#allocation3 + $0x48] sm:$0x3] }
 0x21b   : > { %v1451_v3 = vmax.f32 %v1447_v16, %v1449_v0  ;;  %v1452_v8 = vmax.f32 %v1448_v57, %v1450_v56  ;;  %v1462_v20 = vld [vmem:[#allocation3 + $0x48] sm:$0x3]  ;;  %v1465_v11 = vmax.f32 %v1449_v0, %v1463_v10 }
 0x21c   : > { %v1258_v53 = vpop.f32.mrb[6].mxu1  ;;  %v1466_v4 = vmax.f32 %v1462_v20, %v1464_v14 }
 0x21d   : > { %1453 = vst [vmem:[#allocation4] sm:$0xff] %v1451_v3  ;;  %1454 = vst [vmem:[#allocation4 + $0x8] sm:$0x3] %v1452_v8  ;;  %v1259_v58 = vadd.f32 %v2526_v39, %v1258_v53  ;;  %v1831_v41 = vpop.f32.mrb[7].mxu1 }
 0x21e   : > { %v1481_v23 = vld [vmem:[#allocation3 + $0x70] sm:$0xff]  ;;  %v1482_v22 = vld [vmem:[#allocation3 + $0x78] sm:$0x3] }
 0x21f   : > { %v1262_v9 = vmax.f32 %v1259_v58, 0.0 }
 0x221   : > { %v1264_v5 = vadd.f32 %v1263_v34, %v1262_v9 }
 0x223   : > { %1266 = vst [vmem:[#allocation3 + $0x61] sm:$0xff] %v1264_v5 }
 0x224   : > { %v1455_v44 = vld [vmem:[#allocation4] ss:$2 sm:$0xf]  ;;  %v1456_v38 = vld [vmem:[#allocation4 + $0x1] ss:$2 sm:$0xf] }
 0x225   : > { %v1457_v47 = vmax.f32 %v1455_v44, %v1456_v38  ;;  %v1458_v42 = vld [vmem:[#allocation4 + $0x2] ss:$2 sm:$0xf] }
 0x227   : > { %v1459_v40 = vmax.f32 %v1457_v47, %v1458_v42 }
 0x229   : > { %1460 = vst [vmem:[%s2550_s14 + $0x4] sm:$0xf] %v1459_v40 }
 0x22a   : > { %v1467_v12 = vld [vmem:[#allocation3 + $0x60] sm:$0xff]  ;;  %v1468_v32 = vld [vmem:[#allocation3 + $0x68] sm:$0x3] }
 0x22b   : > { %v1469_v17 = vmax.f32 %v1465_v11, %v1467_v12  ;;  %v1470_v18 = vmax.f32 %v1466_v4, %v1468_v32  ;;  %v1480_v26 = vld [vmem:[#allocation3 + $0x68] sm:$0x3]  ;;  %v1483_v35 = vmax.f32 %v1467_v12, %v1481_v23 }
 0x22c   : > { %v1414_v19 = vpop.f32.mrb[8].mxu1  ;;  %v1484_v36 = vmax.f32 %v1480_v26, %v1482_v22 }
 0x22d   : > { %1471 = vst [vmem:[#allocation4] sm:$0xff] %v1469_v17  ;;  %1472 = vst [vmem:[#allocation4 + $0x8] sm:$0x3] %v1470_v18  ;;  %v1415_v29 = vadd.f32 %v2526_v39, %v1414_v19  ;;  %v1869_v52 = vpop.f32.mrb[9].mxu1 }
 0x22f   : > { %v1418_v21 = vmax.f32 %v1415_v29, 0.0 }
 0x231   : > { %v1420_v24 = vadd.f32 %v2116_v15, %v1418_v21 }
 0x233   : > { %1422 = vst [vmem:[#allocation3 + $0x81] sm:$0xff] %v1420_v24 }
 0x234   : > { %v1473_v48 = vld [vmem:[#allocation4] ss:$2 sm:$0xf]  ;;  %v1474_v25 = vld [vmem:[#allocation4 + $0x1] ss:$2 sm:$0xf] }
 0x235   : > { %v1475_v60 = vmax.f32 %v1473_v48, %v1474_v25  ;;  %v1476_v43 = vld [vmem:[#allocation4 + $0x2] ss:$2 sm:$0xf] }
 0x237   : > { %v1477_v28 = vmax.f32 %v1475_v60, %v1476_v43 }
 0x239   : > { %1478 = vst [vmem:[%s2550_s14 + $0x8] sm:$0xf] %v1477_v28 }
 0x23a   : > { %v1485_v50 = vld [vmem:[#allocation3 + $0x80] sm:$0xff]  ;;  %v1486_v6 = vld [vmem:[#allocation3 + $0x88] sm:$0x3] }
 0x23b   : > { %v1487_v39 = vmax.f32 %v1483_v35, %v1485_v50  ;;  %v1488_v31 = vmax.f32 %v1484_v36, %v1486_v6 }
 0x23d   : > { %1489 = vst [vmem:[#allocation4] sm:$0xff] %v1487_v39  ;;  %1490 = vst [vmem:[#allocation4 + $0x8] sm:$0x3] %v1488_v31 }
 0x244   : > { %v1491_v15 = vld [vmem:[#allocation4] ss:$2 sm:$0xf]  ;;  %v1492_v51 = vld [vmem:[#allocation4 + $0x1] ss:$2 sm:$0xf] }
 0x245   : > { %v1493_v54 = vmax.f32 %v1491_v15, %v1492_v51  ;;  %v1494_v62 = vld [vmem:[#allocation4 + $0x2] ss:$2 sm:$0xf] }
 0x247   : > { %v1495_v61 = vmax.f32 %v1493_v54, %v1494_v62 }
 0x249   : > { %1496 = vst [vmem:[%s2550_s14 + $0xc] sm:$0xf] %v1495_v61 }
 0x24a PF: > { %s18_s27 = sadd.s32 1, %s2015_s27  }
 0x24b   : > { %p15_p4 = scmp.ge.s32.totalorder %s18_s27, 4  }
 0x24d   :  { %17 = sbr.rel (!%p15_p4) target bundleno = 1 (0x1), region = 100 }

</bundles_post_ra>
